<compile_context>
chip_gen: v7x
topology: tpu7x:2x2x1
jax: 0.10.0
libtpu: 0.0.40
codegen_flags: <defaults>
</compile_context>

<pallas_src>
import functools

import jax
import jax.numpy as jnp
from jax.experimental import pallas as pl
from jax.experimental.pallas import tpu as pltpu


# ----------------------------------------------------------------------------
# Pallas kernel: one EncoderLayer step of the fused stack.
# Grid = (batch_blocks, n_layers); layer axis is grid axis 1 ("arbitrary").
# The output block (residual stream) is VMEM-resident across the layer axis.
# ----------------------------------------------------------------------------
def encoder_stack_kernel(
    x_ref,      # (Bblk, T, C)  input activations (bf16), read only at l == 0
    wqkv_ref,   # (C, 3C)       [Q | K | V] column blocks (layer l)
    bqkv_ref,   # (1, 3C)
    wo_ref,     # (C, C)
    bo_ref,     # (1, C)
    g1_ref,     # (1, C)   LayerNorm1 gamma
    be1_ref,    # (1, C)   LayerNorm1 beta
    w1_ref,     # (C, dff)
    bf1_ref,    # (1, dff)
    w2_ref,     # (dff, C)
    bf2_ref,    # (1, C)
    g2_ref,     # (1, C)   LayerNorm2 gamma
    be2_ref,    # (1, C)   LayerNorm2 beta
    o_ref,      # (Bblk, T, C)  residual stream / output (resident across l)
    heads_ref,  # (Bblk*T, C)   VMEM scratch: concatenated per-head outputs
    *,
    n_heads: int,
    head_size: int,
    eps: float,
):
    Bblk, T, C = x_ref.shape
    M = Bblk * T
    cdt = x_ref.dtype                                  # MXU operand dtype (bf16)

    # Seed the residual stream from the input on the first layer step.
    @pl.when(pl.program_id(1) == 0)
    def _():
        o_ref[...] = x_ref[...]

    x2d = o_ref[...].reshape(M, C)                     # (M, C) bf16 residual in

    # ---- hoisted f32 bias / affine vectors (defined exactly once) -----------
    bqkv = bqkv_ref[...].astype(jnp.float32)
    bo = bo_ref[...].astype(jnp.float32)
    g1 = g1_ref[...].astype(jnp.float32)
    be1 = be1_ref[...].astype(jnp.float32)
    bf1 = bf1_ref[...].astype(jnp.float32)
    bf2 = bf2_ref[...].astype(jnp.float32)
    g2 = g2_ref[...].astype(jnp.float32)
    be2 = be2_ref[...].astype(jnp.float32)

    # ---- QKV projection: single big GEMM, f32 accumulation ------------------
    qkv = jnp.dot(x2d, wqkv_ref[...], preferred_element_type=jnp.float32) + bqkv
    q = qkv[:, 0 * C:1 * C].astype(cdt).reshape(Bblk, T, C)   # lane-aligned slices
    k = qkv[:, 1 * C:2 * C].astype(cdt).reshape(Bblk, T, C)
    v = qkv[:, 2 * C:3 * C].astype(cdt).reshape(Bblk, T, C)

    # ---- Multi-head self-attention (heads unrolled, batched over Bblk) ------
    scale = 1.0 / (float(head_size) ** 0.5)
    for h in range(n_heads):
        lo = h * head_size
        qh = q[:, :, lo:lo + head_size]                # (Bblk, T, hs)
        kh = k[:, :, lo:lo + head_size]
        vh = v[:, :, lo:lo + head_size]

        s = jnp.einsum("btd,bsd->bts", qh, kh,
                       preferred_element_type=jnp.float32) * scale
        s = s - jnp.max(s, axis=-1, keepdims=True)     # stable softmax
        p = jnp.exp(s)
        p = p * pl.reciprocal(jnp.sum(p, axis=-1, keepdims=True), approx=True)
        oh = jnp.einsum("bts,bsd->btd", p.astype(cdt), vh,
                        preferred_element_type=jnp.float32)  # (Bblk, T, hs)

        # Lane-aligned store into the concat scratch (hs = multiple of 128):
        # avoids per-head K=128 GEMMs that only half-fill the 256-wide MXU.
        heads_ref[:, lo:lo + head_size] = oh.reshape(M, head_size).astype(cdt)

    # One full-width output projection GEMM (K = C).
    attn = jnp.dot(heads_ref[...], wo_ref[...],
                   preferred_element_type=jnp.float32) + bo

    # ---- residual + LayerNorm 1 (f32) ----------------------------------------
    h1 = attn + x2d.astype(jnp.float32)
    mu1 = jnp.mean(h1, axis=-1, keepdims=True)
    d1 = h1 - mu1
    var1 = jnp.mean(d1 * d1, axis=-1, keepdims=True)
    h1n = g1 * (d1 * jax.lax.rsqrt(var1 + eps)) + be1

    # ---- FeedForward (bf16 operands, f32 accumulation) -----------------------
    f = jnp.dot(h1n.astype(cdt), w1_ref[...],
                preferred_element_type=jnp.float32) + bf1
    f = jnp.maximum(f, 0.0)
    f = jnp.dot(f.astype(cdt), w2_ref[...],
                preferred_element_type=jnp.float32) + bf2

    # ---- residual + LayerNorm 2 (f32) ----------------------------------------
    h2 = f + h1n
    mu2 = jnp.mean(h2, axis=-1, keepdims=True)
    d2 = h2 - mu2
    var2 = jnp.mean(d2 * d2, axis=-1, keepdims=True)
    out = g2 * (d2 * jax.lax.rsqrt(var2 + eps)) + be2

    o_ref[...] = out.reshape(Bblk, T, C).astype(o_ref.dtype)


def _pick_block_b(B, T, target_m=1024):
    """Largest batch block that divides B with Bblk*T <= target_m.

    No forced >=2-step split: on single-TC v5e/v6e a bigger M is a pure win;
    on v7x multiple batch steps arise naturally once B*T > target_m, and the
    layer grid axis already provides >=2 grid steps."""
    cap = max(1, target_m // max(T, 1))
    bb = max(1, min(B, cap))
    while B % bb:
        bb -= 1
    return bb


def encoder_stack_apply(x, p, *, n_heads):
    """Apply the full encoder stack via a single pallas_call. x: (B, T, C)."""
    B, T, C = x.shape
    L = p["wqkv"].shape[0]
    dff = p["w1"].shape[2]
    bb = _pick_block_b(B, T)

    kernel = functools.partial(
        encoder_stack_kernel,
        n_heads=n_heads,
        head_size=C // n_heads,
        eps=1e-5,
    )

    def wspec(*dims):
        # Layer-stacked weight: leading (squeezed) layer dim indexed by l.
        n = len(dims)
        return pl.BlockSpec((None,) + dims, lambda b, l, n=n: (l,) + (0,) * n)

    in_specs = [
        pl.BlockSpec((bb, T, C), lambda b, l: (b, 0, 0)),   # x (read at l == 0)
        wspec(C, 3 * C), wspec(1, 3 * C),                   # qkv_proj
        wspec(C, C), wspec(1, C),                           # attn output linear
        wspec(1, C), wspec(1, C),                           # ln1 gamma/beta
        wspec(C, dff), wspec(1, dff),                       # ff linear1
        wspec(dff, C), wspec(1, C),                         # ff linear2
        wspec(1, C), wspec(1, C),                           # ln2 gamma/beta
    ]
    # Output block index constant along the layer axis -> residual stream stays
    # resident in VMEM for all layers of a batch block (one HBM writeback).
    out_spec = pl.BlockSpec((bb, T, C), lambda b, l: (b, 0, 0))

    return pl.pallas_call(
        kernel,
        out_shape=jax.ShapeDtypeStruct((B, T, C), x.dtype),
        grid=(B // bb, L),
        in_specs=in_specs,
        out_specs=out_spec,
        scratch_shapes=[pltpu.VMEM((bb * T, C), x.dtype)],   # head-concat scratch
        compiler_params=pltpu.CompilerParams(
            dimension_semantics=("parallel", "arbitrary"),
            vmem_limit_bytes=48 * 1024 * 1024,
        ),
    )(
        x,
        p["wqkv"], p["bqkv"],
        p["wo"], p["bo"],
        p["gamma1"], p["beta1"],
        p["w1"], p["bf1"],
        p["w2"], p["bf2"],
        p["gamma2"], p["beta2"],
    )


# ----------------------------------------------------------------------------
# Glue: tokenization, embedding, positional encoding (plain JAX / Python).
# ----------------------------------------------------------------------------
def batch_tokenize(batch, lang2idx, max_len, START, END, PAD,
                   start_token=True, end_token=True):
    out = []
    for sentence in batch:
        ids = [lang2idx[tok] for tok in list(sentence)]
        if start_token:
            ids.insert(0, lang2idx[START])
        if end_token:
            ids.append(lang2idx[END])
        while len(ids) < max_len:
            ids.append(lang2idx[PAD])
        ids = ids[:max_len]
        out.append(ids)
    return jnp.array(out, dtype=jnp.int32)


def positional_embedding(T, d_model):
    even_i = jnp.arange(0, d_model, 2, dtype=jnp.float32)
    denominator = jnp.power(10000.0, even_i / d_model)
    pos = jnp.arange(0, T, dtype=jnp.float32)[:, None]
    odd_pos = jnp.cos(pos / denominator)
    even_pos = jnp.sin(pos / denominator)
    stacked = jnp.stack([even_pos, odd_pos], axis=2)     # (T, d_model//2, 2)
    return stacked.reshape(T, d_model)                   # interleaved sin/cos


def init_encoder_params(key, vocab_size, d_model, d_ff, n_layers,
                        dtype=jnp.bfloat16):
    keys = jax.random.split(key, 1 + n_layers)
    params = {
        "embedding": jax.random.normal(
            keys[0], (vocab_size, d_model), jnp.float32).astype(dtype)
    }
    per_layer = []
    for l in range(n_layers):
        k = jax.random.split(keys[1 + l], 4)
        per_layer.append({
            # [Q | K | V] contiguous C-wide column blocks (lane aligned).
            "wqkv": (0.02 * jax.random.normal(k[0], (d_model, 3 * d_model),
                                              jnp.float32)).astype(dtype),
            "bqkv": jnp.zeros((1, 3 * d_model), dtype),
            "wo":   (0.02 * jax.random.normal(k[1], (d_model, d_model),
                                              jnp.float32)).astype(dtype),
            "bo":   jnp.zeros((1, d_model), dtype),
            "gamma1": jnp.ones((1, d_model), dtype),
            "beta1":  jnp.zeros((1, d_model), dtype),
            "w1":   (0.02 * jax.random.normal(k[2], (d_model, d_ff),
                                              jnp.float32)).astype(dtype),
            "bf1":  jnp.zeros((1, d_ff), dtype),
            "w2":   (0.02 * jax.random.normal(k[3], (d_ff, d_model),
                                              jnp.float32)).astype(dtype),
            "bf2":  jnp.zeros((1, d_model), dtype),
            "gamma2": jnp.ones((1, d_model), dtype),
            "beta2":  jnp.zeros((1, d_model), dtype),
        })
    # Stack every layer parameter along a leading layer dim so the fused
    # kernel can stream layer l's weights via the grid's layer axis.
    params["layers"] = {
        name: jnp.stack([lp[name] for lp in per_layer], axis=0)
        for name in per_layer[0]
    }
    return params


def encoder_forward(sentences, params, lang2idx, *, max_len, n_heads,
                    START, END, PAD, start_token=True, end_token=True):
    # TransformerEmbedding (dropout = identity)
    tokens = batch_tokenize(sentences, lang2idx, max_len, START, END, PAD,
                            start_token, end_token)            # (B, T) int32
    emb = jnp.take(params["embedding"], tokens, axis=0).astype(jnp.float32)
    d_model = emb.shape[-1]
    x = emb + positional_embedding(max_len, d_model)[None, :, :]
    x = x.astype(jnp.bfloat16)                                 # bf16 activations
    # Whole encoder stack in one fused pallas_call (layer axis inside the grid).
    return encoder_stack_apply(x, params["layers"], n_heads=n_heads)


# ----------------------------------------------------------------------------
if __name__ == "__main__":
    # Small but lane-aligned configuration: d_model multiple of 128 and
    # head_size = 128 so every Q/K/V and per-head output slice is lane-dense.
    d_model = 256
    d_ff = 512
    n_heads = 2            # head_size = 128
    n_layers = 2
    max_sequence_length = 16
    START_TOKEN, END_TOKEN, PADDING_TOKEN = "<S>", "<E>", "<P>"

    sentences = ["hello", "world!", "pallas", "tpu"]
    vocab_chars = sorted(set("".join(sentences)))
    vocab = vocab_chars + [START_TOKEN, END_TOKEN, PADDING_TOKEN]
    language_to_index = {tok: i for i, tok in enumerate(vocab)}

    key = jax.random.PRNGKey(0)
    params = init_encoder_params(key, len(language_to_index), d_model, d_ff,
                                 n_layers)

    out = encoder_forward(
        sentences, params, language_to_index,
        max_len=max_sequence_length, n_heads=n_heads,
        START=START_TOKEN, END=END_TOKEN, PAD=PADDING_TOKEN,
    )
    out = jax.block_until_ready(out)
    assert out.shape == (len(sentences), max_sequence_length, d_model)
    assert bool(jnp.all(jnp.isfinite(out.astype(jnp.float32))))
    print("KERNEL_OK")
</pallas_src>

<mosaic_0001>
module attributes {stable_mosaic.version = 11 : i64} {
  func.func @encoder_stack_kernel(%arg0: i32, %arg1: i32, %arg2: memref<4x16x256xbf16, #tpu.memory_space<vmem>>, %arg3: memref<1x256x768xbf16, #tpu.memory_space<vmem>>, %arg4: memref<1x1x768xbf16, #tpu.memory_space<vmem>>, %arg5: memref<1x256x256xbf16, #tpu.memory_space<vmem>>, %arg6: memref<1x1x256xbf16, #tpu.memory_space<vmem>>, %arg7: memref<1x1x256xbf16, #tpu.memory_space<vmem>>, %arg8: memref<1x1x256xbf16, #tpu.memory_space<vmem>>, %arg9: memref<1x256x512xbf16, #tpu.memory_space<vmem>>, %arg10: memref<1x1x512xbf16, #tpu.memory_space<vmem>>, %arg11: memref<1x512x256xbf16, #tpu.memory_space<vmem>>, %arg12: memref<1x1x256xbf16, #tpu.memory_space<vmem>>, %arg13: memref<1x1x256xbf16, #tpu.memory_space<vmem>>, %arg14: memref<1x1x256xbf16, #tpu.memory_space<vmem>>, %arg15: memref<4x16x256xbf16, #tpu.memory_space<vmem>>, %arg16: memref<64x256xbf16, #tpu.memory_space<vmem>>) attributes {dimension_semantics = [#tpu.dimension_semantics<parallel>, #tpu.dimension_semantics<arbitrary>], iteration_bounds = array<i64: 1, 2>, scalar_prefetch = 0 : i64, scratch_operands = 1 : i64, tpu.core_type = #tpu.core_type<tc>, window_params = [{transform_indices = @transform_0, window_bounds = array<i64: 4, 16, 256>}, {transform_indices = @transform_1, window_bounds = array<i64: 1, 256, 768>}, {transform_indices = @transform_2, window_bounds = array<i64: 1, 1, 768>}, {transform_indices = @transform_3, window_bounds = array<i64: 1, 256, 256>}, {transform_indices = @transform_4, window_bounds = array<i64: 1, 1, 256>}, {transform_indices = @transform_5, window_bounds = array<i64: 1, 1, 256>}, {transform_indices = @transform_6, window_bounds = array<i64: 1, 1, 256>}, {transform_indices = @transform_7, window_bounds = array<i64: 1, 256, 512>}, {transform_indices = @transform_8, window_bounds = array<i64: 1, 1, 512>}, {transform_indices = @transform_9, window_bounds = array<i64: 1, 512, 256>}, {transform_indices = @transform_10, window_bounds = array<i64: 1, 1, 256>}, {transform_indices = @transform_11, window_bounds = array<i64: 1, 1, 256>}, {transform_indices = @transform_12, window_bounds = array<i64: 1, 1, 256>}, {transform_indices = @transform_13, window_bounds = array<i64: 4, 16, 256>}]} {
    %c0_i32 = arith.constant 0 : i32
    %0 = arith.cmpi eq, %arg1, %c0_i32 : i32
    %1 = arith.extui %0 : i1 to i32
    %c0_i32_0 = arith.constant 0 : i32
    %2 = arith.cmpi ne, %1, %c0_i32_0 : i32
    scf.if %2 {
      %c0_71 = arith.constant 0 : index
      %c0_72 = arith.constant 0 : index
      %c0_73 = arith.constant 0 : index
      %151 = vector.load %arg2[%c0_71, %c0_72, %c0_73] : memref<4x16x256xbf16, #tpu.memory_space<vmem>>, vector<4x16x256xbf16>
      %c0_74 = arith.constant 0 : index
      %c0_75 = arith.constant 0 : index
      %c0_76 = arith.constant 0 : index
      %152 = vector.load %arg15[%c0_74, %c0_75, %c0_76] : memref<4x16x256xbf16, #tpu.memory_space<vmem>>, vector<4x16x256xbf16>
      tpu.vector_store %arg15[%c0_74, %c0_75, %c0_76], %151 {strides = array<i32>} : memref<4x16x256xbf16, #tpu.memory_space<vmem>>, vector<4x16x256xbf16>,
    } else {
    }
    %c0 = arith.constant 0 : index
    %c0_1 = arith.constant 0 : index
    %c0_2 = arith.constant 0 : index
    %3 = vector.load %arg15[%c0, %c0_1, %c0_2] : memref<4x16x256xbf16, #tpu.memory_space<vmem>>, vector<4x16x256xbf16>
    %4 = vector.shape_cast %3 : vector<4x16x256xbf16> to vector<64x256xbf16>
    %c0_3 = arith.constant 0 : index
    %c0_4 = arith.constant 0 : index
    %c0_5 = arith.constant 0 : index
    %5 = vector.load %arg4[%c0_3, %c0_4, %c0_5] : memref<1x1x768xbf16, #tpu.memory_space<vmem>>, vector<1x1x768xbf16>
    %6 = vector.shape_cast %5 : vector<1x1x768xbf16> to vector<1x768xbf16>
    %7 = arith.extf %6 : vector<1x768xbf16> to vector<1x768xf32>
    %c0_6 = arith.constant 0 : index
    %c0_7 = arith.constant 0 : index
    %c0_8 = arith.constant 0 : index
    %8 = vector.load %arg6[%c0_6, %c0_7, %c0_8] : memref<1x1x256xbf16, #tpu.memory_space<vmem>>, vector<1x1x256xbf16>
    %9 = vector.shape_cast %8 : vector<1x1x256xbf16> to vector<1x256xbf16>
    %10 = arith.extf %9 : vector<1x256xbf16> to vector<1x256xf32>
    %c0_9 = arith.constant 0 : index
    %c0_10 = arith.constant 0 : index
    %c0_11 = arith.constant 0 : index
    %11 = vector.load %arg7[%c0_9, %c0_10, %c0_11] : memref<1x1x256xbf16, #tpu.memory_space<vmem>>, vector<1x1x256xbf16>
    %12 = vector.shape_cast %11 : vector<1x1x256xbf16> to vector<1x256xbf16>
    %13 = arith.extf %12 : vector<1x256xbf16> to vector<1x256xf32>
    %c0_12 = arith.constant 0 : index
    %c0_13 = arith.constant 0 : index
    %c0_14 = arith.constant 0 : index
    %14 = vector.load %arg8[%c0_12, %c0_13, %c0_14] : memref<1x1x256xbf16, #tpu.memory_space<vmem>>, vector<1x1x256xbf16>
    %15 = vector.shape_cast %14 : vector<1x1x256xbf16> to vector<1x256xbf16>
    %16 = arith.extf %15 : vector<1x256xbf16> to vector<1x256xf32>
    %c0_15 = arith.constant 0 : index
    %c0_16 = arith.constant 0 : index
    %c0_17 = arith.constant 0 : index
    %17 = vector.load %arg10[%c0_15, %c0_16, %c0_17] : memref<1x1x512xbf16, #tpu.memory_space<vmem>>, vector<1x1x512xbf16>
    %18 = vector.shape_cast %17 : vector<1x1x512xbf16> to vector<1x512xbf16>
    %19 = arith.extf %18 : vector<1x512xbf16> to vector<1x512xf32>
    %c0_18 = arith.constant 0 : index
    %c0_19 = arith.constant 0 : index
    %c0_20 = arith.constant 0 : index
    %20 = vector.load %arg12[%c0_18, %c0_19, %c0_20] : memref<1x1x256xbf16, #tpu.memory_space<vmem>>, vector<1x1x256xbf16>
    %21 = vector.shape_cast %20 : vector<1x1x256xbf16> to vector<1x256xbf16>
    %22 = arith.extf %21 : vector<1x256xbf16> to vector<1x256xf32>
    %c0_21 = arith.constant 0 : index
    %c0_22 = arith.constant 0 : index
    %c0_23 = arith.constant 0 : index
    %23 = vector.load %arg13[%c0_21, %c0_22, %c0_23] : memref<1x1x256xbf16, #tpu.memory_space<vmem>>, vector<1x1x256xbf16>
    %24 = vector.shape_cast %23 : vector<1x1x256xbf16> to vector<1x256xbf16>
    %25 = arith.extf %24 : vector<1x256xbf16> to vector<1x256xf32>
    %c0_24 = arith.constant 0 : index
    %c0_25 = arith.constant 0 : index
    %c0_26 = arith.constant 0 : index
    %26 = vector.load %arg14[%c0_24, %c0_25, %c0_26] : memref<1x1x256xbf16, #tpu.memory_space<vmem>>, vector<1x1x256xbf16>
    %27 = vector.shape_cast %26 : vector<1x1x256xbf16> to vector<1x256xbf16>
    %28 = arith.extf %27 : vector<1x256xbf16> to vector<1x256xf32>
    %c0_27 = arith.constant 0 : index
    %c0_28 = arith.constant 0 : index
    %c0_29 = arith.constant 0 : index
    %29 = vector.load %arg3[%c0_27, %c0_28, %c0_29] : memref<1x256x768xbf16, #tpu.memory_space<vmem>>, vector<1x256x768xbf16>
    %30 = vector.shape_cast %29 : vector<1x256x768xbf16> to vector<256x768xbf16>
    %cst = arith.constant dense<0.000000e+00> : vector<64x768xf32>
    %31 = tpu.matmul %4, %30, %cst {dimension_numbers = #tpu.dot_dimension_numbers<[1], [0], [0], [1], [0, 0, 1, 1], [], []>} : vector<64x256xbf16>, vector<256x768xbf16>, vector<64x768xf32> -> vector<64x768xf32>
    %32 = vector.broadcast %7 : vector<1x768xf32> to vector<64x768xf32>
    %33 = arith.addf %31, %32 : vector<64x768xf32>
    %34 = vector.extract_strided_slice %33 {offsets = [0, 0], sizes = [64, 256], strides = [1, 1]} : vector<64x768xf32> to vector<64x256xf32>
    %35 = arith.truncf %34 : vector<64x256xf32> to vector<64x256xbf16>
    %36 = vector.shape_cast %35 : vector<64x256xbf16> to vector<4x16x256xbf16>
    %37 = vector.extract_strided_slice %33 {offsets = [0, 256], sizes = [64, 256], strides = [1, 1]} : vector<64x768xf32> to vector<64x256xf32>
    %38 = arith.truncf %37 : vector<64x256xf32> to vector<64x256xbf16>
    %39 = vector.shape_cast %38 : vector<64x256xbf16> to vector<4x16x256xbf16>
    %40 = vector.extract_strided_slice %33 {offsets = [0, 512], sizes = [64, 256], strides = [1, 1]} : vector<64x768xf32> to vector<64x256xf32>
    %41 = arith.truncf %40 : vector<64x256xf32> to vector<64x256xbf16>
    %42 = vector.shape_cast %41 : vector<64x256xbf16> to vector<4x16x256xbf16>
    %43 = vector.extract_strided_slice %36 {offsets = [0, 0, 0], sizes = [4, 16, 128], strides = [1, 1, 1]} : vector<4x16x256xbf16> to vector<4x16x128xbf16>
    %44 = vector.extract_strided_slice %39 {offsets = [0, 0, 0], sizes = [4, 16, 128], strides = [1, 1, 1]} : vector<4x16x256xbf16> to vector<4x16x128xbf16>
    %45 = vector.extract_strided_slice %42 {offsets = [0, 0, 0], sizes = [4, 16, 128], strides = [1, 1, 1]} : vector<4x16x256xbf16> to vector<4x16x128xbf16>
    "tpu.trace_start"() <{level = 10 : i32, message = "btd,bsd->bts"}> : () -> ()
    %cst_30 = arith.constant dense<0.000000e+00> : vector<4x16x16xf32>
    %46 = tpu.matmul %43, %44, %cst_30 {dimension_numbers = #tpu.dot_dimension_numbers<[2], [2], [1], [1], [0, 0, 0, 1, 1, 1], [0], [0]>} : vector<4x16x128xbf16>, vector<4x16x128xbf16>, vector<4x16x16xf32> -> vector<4x16x16xf32>
    "tpu.trace_stop"() : () -> ()
    %cst_31 = arith.constant 0.0883883461 : f32
    %47 = vector.broadcast %cst_31 : f32 to vector<4x16x16xf32>
    %48 = arith.mulf %46, %47 : vector<4x16x16xf32>
    %cst_32 = arith.constant dense<0xFF800000> : vector<4x16xf32>
    %49 = vector.multi_reduction <maximumf>, %48, %cst_32 [2] : vector<4x16x16xf32> to vector<4x16xf32>
    %50 = vector.shape_cast %49 : vector<4x16xf32> to vector<4x16x1xf32>
    %51 = vector.broadcast %50 : vector<4x16x1xf32> to vector<4x16x16xf32>
    %52 = arith.subf %48, %51 : vector<4x16x16xf32>
    %53 = math.exp %52 : vector<4x16x16xf32>
    %cst_33 = arith.constant dense<0.000000e+00> : vector<4x16xf32>
    %54 = vector.multi_reduction <add>, %53, %cst_33 [2] : vector<4x16x16xf32> to vector<4x16xf32>
    %55 = vector.shape_cast %54 : vector<4x16xf32> to vector<4x16x1xf32>
    %56 = tpu.reciprocal %55 {approx = true} : vector<4x16x1xf32> -> vector<4x16x1xf32>
    %57 = vector.broadcast %56 : vector<4x16x1xf32> to vector<4x16x16xf32>
    %58 = arith.mulf %53, %57 : vector<4x16x16xf32>
    %59 = arith.truncf %58 : vector<4x16x16xf32> to vector<4x16x16xbf16>
    "tpu.trace_start"() <{level = 10 : i32, message = "bts,bsd->btd"}> : () -> ()
    %cst_34 = arith.constant dense<0.000000e+00> : vector<4x16x128xf32>
    %60 = tpu.matmul %59, %45, %cst_34 {dimension_numbers = #tpu.dot_dimension_numbers<[2], [1], [1], [2], [0, 0, 0, 1, 1, 2], [0], [0]>} : vector<4x16x16xbf16>, vector<4x16x128xbf16>, vector<4x16x128xf32> -> vector<4x16x128xf32>
    "tpu.trace_stop"() : () -> ()
    %61 = vector.shape_cast %60 : vector<4x16x128xf32> to vector<64x128xf32>
    %62 = arith.truncf %61 : vector<64x128xf32> to vector<64x128xbf16>
    %c0_35 = arith.constant 0 : index
    %c0_36 = arith.constant 0 : index
    %63 = vector.load %arg16[%c0_35, %c0_36] : memref<64x256xbf16, #tpu.memory_space<vmem>>, vector<64x128xbf16>
    tpu.vector_store %arg16[%c0_35, %c0_36], %62 {strides = array<i32>} : memref<64x256xbf16, #tpu.memory_space<vmem>>, vector<64x128xbf16>,
    %64 = vector.extract_strided_slice %36 {offsets = [0, 0, 128], sizes = [4, 16, 128], strides = [1, 1, 1]} : vector<4x16x256xbf16> to vector<4x16x128xbf16>
    %65 = vector.extract_strided_slice %39 {offsets = [0, 0, 128], sizes = [4, 16, 128], strides = [1, 1, 1]} : vector<4x16x256xbf16> to vector<4x16x128xbf16>
    %66 = vector.extract_strided_slice %42 {offsets = [0, 0, 128], sizes = [4, 16, 128], strides = [1, 1, 1]} : vector<4x16x256xbf16> to vector<4x16x128xbf16>
    "tpu.trace_start"() <{level = 10 : i32, message = "btd,bsd->bts"}> : () -> ()
    %cst_37 = arith.constant dense<0.000000e+00> : vector<4x16x16xf32>
    %67 = tpu.matmul %64, %65, %cst_37 {dimension_numbers = #tpu.dot_dimension_numbers<[2], [2], [1], [1], [0, 0, 0, 1, 1, 1], [0], [0]>} : vector<4x16x128xbf16>, vector<4x16x128xbf16>, vector<4x16x16xf32> -> vector<4x16x16xf32>
    "tpu.trace_stop"() : () -> ()
    %cst_38 = arith.constant 0.0883883461 : f32
    %68 = vector.broadcast %cst_38 : f32 to vector<4x16x16xf32>
    %69 = arith.mulf %67, %68 : vector<4x16x16xf32>
    %cst_39 = arith.constant dense<0xFF800000> : vector<4x16xf32>
    %70 = vector.multi_reduction <maximumf>, %69, %cst_39 [2] : vector<4x16x16xf32> to vector<4x16xf32>
    %71 = vector.shape_cast %70 : vector<4x16xf32> to vector<4x16x1xf32>
    %72 = vector.broadcast %71 : vector<4x16x1xf32> to vector<4x16x16xf32>
    %73 = arith.subf %69, %72 : vector<4x16x16xf32>
    %74 = math.exp %73 : vector<4x16x16xf32>
    %cst_40 = arith.constant dense<0.000000e+00> : vector<4x16xf32>
    %75 = vector.multi_reduction <add>, %74, %cst_40 [2] : vector<4x16x16xf32> to vector<4x16xf32>
    %76 = vector.shape_cast %75 : vector<4x16xf32> to vector<4x16x1xf32>
    %77 = tpu.reciprocal %76 {approx = true} : vector<4x16x1xf32> -> vector<4x16x1xf32>
    %78 = vector.broadcast %77 : vector<4x16x1xf32> to vector<4x16x16xf32>
    %79 = arith.mulf %74, %78 : vector<4x16x16xf32>
    %80 = arith.truncf %79 : vector<4x16x16xf32> to vector<4x16x16xbf16>
    "tpu.trace_start"() <{level = 10 : i32, message = "bts,bsd->btd"}> : () -> ()
    %cst_41 = arith.constant dense<0.000000e+00> : vector<4x16x128xf32>
    %81 = tpu.matmul %80, %66, %cst_41 {dimension_numbers = #tpu.dot_dimension_numbers<[2], [1], [1], [2], [0, 0, 0, 1, 1, 2], [0], [0]>} : vector<4x16x16xbf16>, vector<4x16x128xbf16>, vector<4x16x128xf32> -> vector<4x16x128xf32>
    "tpu.trace_stop"() : () -> ()
    %82 = vector.shape_cast %81 : vector<4x16x128xf32> to vector<64x128xf32>
    %83 = arith.truncf %82 : vector<64x128xf32> to vector<64x128xbf16>
    %c0_42 = arith.constant 0 : index
    %c128 = arith.constant 128 : index
    %84 = vector.load %arg16[%c0_42, %c128] : memref<64x256xbf16, #tpu.memory_space<vmem>>, vector<64x128xbf16>
    tpu.vector_store %arg16[%c0_42, %c128], %83 {strides = array<i32>} : memref<64x256xbf16, #tpu.memory_space<vmem>>, vector<64x128xbf16>,
    %c0_43 = arith.constant 0 : index
    %c0_44 = arith.constant 0 : index
    %85 = vector.load %arg16[%c0_43, %c0_44] : memref<64x256xbf16, #tpu.memory_space<vmem>>, vector<64x256xbf16>
    %c0_45 = arith.constant 0 : index
    %c0_46 = arith.constant 0 : index
    %c0_47 = arith.constant 0 : index
    %86 = vector.load %arg5[%c0_45, %c0_46, %c0_47] : memref<1x256x256xbf16, #tpu.memory_space<vmem>>, vector<1x256x256xbf16>
    %87 = vector.shape_cast %86 : vector<1x256x256xbf16> to vector<256x256xbf16>
    %cst_48 = arith.constant dense<0.000000e+00> : vector<64x256xf32>
    %88 = tpu.matmul %85, %87, %cst_48 {dimension_numbers = #tpu.dot_dimension_numbers<[1], [0], [0], [1], [0, 0, 1, 1], [], []>} : vector<64x256xbf16>, vector<256x256xbf16>, vector<64x256xf32> -> vector<64x256xf32>
    %89 = vector.broadcast %10 : vector<1x256xf32> to vector<64x256xf32>
    %90 = arith.addf %88, %89 : vector<64x256xf32>
    %91 = arith.extf %4 : vector<64x256xbf16> to vector<64x256xf32>
    %92 = arith.addf %90, %91 : vector<64x256xf32>
    %cst_49 = arith.constant dense<0.000000e+00> : vector<64xf32>
    %93 = vector.multi_reduction <add>, %92, %cst_49 [1] : vector<64x256xf32> to vector<64xf32>
    %94 = vector.shape_cast %93 : vector<64xf32> to vector<64x1xf32>
    %cst_50 = arith.constant 2.560000e+02 : f32
    %95 = vector.broadcast %cst_50 : f32 to vector<64x1xf32>
    %96 = arith.divf %94, %95 : vector<64x1xf32>
    %97 = vector.broadcast %96 : vector<64x1xf32> to vector<64x256xf32>
    %98 = arith.subf %92, %97 : vector<64x256xf32>
    %99 = arith.mulf %98, %98 : vector<64x256xf32>
    %cst_51 = arith.constant dense<0.000000e+00> : vector<64xf32>
    %100 = vector.multi_reduction <add>, %99, %cst_51 [1] : vector<64x256xf32> to vector<64xf32>
    %101 = vector.shape_cast %100 : vector<64xf32> to vector<64x1xf32>
    %cst_52 = arith.constant 2.560000e+02 : f32
    %102 = vector.broadcast %cst_52 : f32 to vector<64x1xf32>
    %103 = arith.divf %101, %102 : vector<64x1xf32>
    %cst_53 = arith.constant 9.99999974E-6 : f32
    %104 = vector.broadcast %cst_53 : f32 to vector<64x1xf32>
    %105 = arith.addf %103, %104 : vector<64x1xf32>
    %106 = math.rsqrt %105 : vector<64x1xf32>
    %107 = vector.broadcast %106 : vector<64x1xf32> to vector<64x256xf32>
    %108 = arith.mulf %98, %107 : vector<64x256xf32>
    %109 = vector.broadcast %13 : vector<1x256xf32> to vector<64x256xf32>
    %110 = arith.mulf %109, %108 : vector<64x256xf32>
    %111 = vector.broadcast %16 : vector<1x256xf32> to vector<64x256xf32>
    %112 = arith.addf %110, %111 : vector<64x256xf32>
    %113 = arith.truncf %112 : vector<64x256xf32> to vector<64x256xbf16>
    %c0_54 = arith.constant 0 : index
    %c0_55 = arith.constant 0 : index
    %c0_56 = arith.constant 0 : index
    %114 = vector.load %arg9[%c0_54, %c0_55, %c0_56] : memref<1x256x512xbf16, #tpu.memory_space<vmem>>, vector<1x256x512xbf16>
    %115 = vector.shape_cast %114 : vector<1x256x512xbf16> to vector<256x512xbf16>
    %cst_57 = arith.constant dense<0.000000e+00> : vector<64x512xf32>
    %116 = tpu.matmul %113, %115, %cst_57 {dimension_numbers = #tpu.dot_dimension_numbers<[1], [0], [0], [1], [0, 0, 1, 1], [], []>} : vector<64x256xbf16>, vector<256x512xbf16>, vector<64x512xf32> -> vector<64x512xf32>
    %117 = vector.broadcast %19 : vector<1x512xf32> to vector<64x512xf32>
    %118 = arith.addf %116, %117 : vector<64x512xf32>
    %cst_58 = arith.constant 0.000000e+00 : f32
    %119 = vector.broadcast %cst_58 : f32 to vector<64x512xf32>
    %120 = arith.maximumf %118, %119 : vector<64x512xf32>
    %121 = arith.truncf %120 : vector<64x512xf32> to vector<64x512xbf16>
    %c0_59 = arith.constant 0 : index
    %c0_60 = arith.constant 0 : index
    %c0_61 = arith.constant 0 : index
    %122 = vector.load %arg11[%c0_59, %c0_60, %c0_61] : memref<1x512x256xbf16, #tpu.memory_space<vmem>>, vector<1x512x256xbf16>
    %123 = vector.shape_cast %122 : vector<1x512x256xbf16> to vector<512x256xbf16>
    %cst_62 = arith.constant dense<0.000000e+00> : vector<64x256xf32>
    %124 = tpu.matmul %121, %123, %cst_62 {dimension_numbers = #tpu.dot_dimension_numbers<[1], [0], [0], [1], [0, 0, 1, 1], [], []>} : vector<64x512xbf16>, vector<512x256xbf16>, vector<64x256xf32> -> vector<64x256xf32>
    %125 = vector.broadcast %22 : vector<1x256xf32> to vector<64x256xf32>
    %126 = arith.addf %124, %125 : vector<64x256xf32>
    %127 = arith.addf %126, %112 : vector<64x256xf32>
    %cst_63 = arith.constant dense<0.000000e+00> : vector<64xf32>
    %128 = vector.multi_reduction <add>, %127, %cst_63 [1] : vector<64x256xf32> to vector<64xf32>
    %129 = vector.shape_cast %128 : vector<64xf32> to vector<64x1xf32>
    %cst_64 = arith.constant 2.560000e+02 : f32
    %130 = vector.broadcast %cst_64 : f32 to vector<64x1xf32>
    %131 = arith.divf %129, %130 : vector<64x1xf32>
    %132 = vector.broadcast %131 : vector<64x1xf32> to vector<64x256xf32>
    %133 = arith.subf %127, %132 : vector<64x256xf32>
    %134 = arith.mulf %133, %133 : vector<64x256xf32>
    %cst_65 = arith.constant dense<0.000000e+00> : vector<64xf32>
    %135 = vector.multi_reduction <add>, %134, %cst_65 [1] : vector<64x256xf32> to vector<64xf32>
    %136 = vector.shape_cast %135 : vector<64xf32> to vector<64x1xf32>
    %cst_66 = arith.constant 2.560000e+02 : f32
    %137 = vector.broadcast %cst_66 : f32 to vector<64x1xf32>
    %138 = arith.divf %136, %137 : vector<64x1xf32>
    %cst_67 = arith.constant 9.99999974E-6 : f32
    %139 = vector.broadcast %cst_67 : f32 to vector<64x1xf32>
    %140 = arith.addf %138, %139 : vector<64x1xf32>
    %141 = math.rsqrt %140 : vector<64x1xf32>
    %142 = vector.broadcast %141 : vector<64x1xf32> to vector<64x256xf32>
    %143 = arith.mulf %133, %142 : vector<64x256xf32>
    %144 = vector.broadcast %25 : vector<1x256xf32> to vector<64x256xf32>
    %145 = arith.mulf %144, %143 : vector<64x256xf32>
    %146 = vector.broadcast %28 : vector<1x256xf32> to vector<64x256xf32>
    %147 = arith.addf %145, %146 : vector<64x256xf32>
    %148 = vector.shape_cast %147 : vector<64x256xf32> to vector<4x16x256xf32>
    %149 = arith.truncf %148 : vector<4x16x256xf32> to vector<4x16x256xbf16>
    %c0_68 = arith.constant 0 : index
    %c0_69 = arith.constant 0 : index
    %c0_70 = arith.constant 0 : index
    %150 = vector.load %arg15[%c0_68, %c0_69, %c0_70] : memref<4x16x256xbf16, #tpu.memory_space<vmem>>, vector<4x16x256xbf16>
    tpu.vector_store %arg15[%c0_68, %c0_69, %c0_70], %149 {strides = array<i32>} : memref<4x16x256xbf16, #tpu.memory_space<vmem>>, vector<4x16x256xbf16>,
    return
  }
  func.func @transform_0(%arg0: i32, %arg1: i32) -> (i32, i32, i32) {
    %c0_i32 = arith.constant 0 : i32
    %c0_i32_0 = arith.constant 0 : i32
    %c0_i32_1 = arith.constant 0 : i32
    return %arg0, %c0_i32, %c0_i32_0 : i32, i32, i32
  }
  func.func @transform_1(%arg0: i32, %arg1: i32) -> (i32, i32, i32) {
    %c0_i32 = arith.constant 0 : i32
    %c0_i32_0 = arith.constant 0 : i32
    %c0_i32_1 = arith.constant 0 : i32
    return %arg1, %c0_i32, %c0_i32_0 : i32, i32, i32
  }
  func.func @transform_2(%arg0: i32, %arg1: i32) -> (i32, i32, i32) {
    %c0_i32 = arith.constant 0 : i32
    %c0_i32_0 = arith.constant 0 : i32
    %c0_i32_1 = arith.constant 0 : i32
    return %arg1, %c0_i32, %c0_i32_0 : i32, i32, i32
  }
  func.func @transform_3(%arg0: i32, %arg1: i32) -> (i32, i32, i32) {
    %c0_i32 = arith.constant 0 : i32
    %c0_i32_0 = arith.constant 0 : i32
    %c0_i32_1 = arith.constant 0 : i32
    return %arg1, %c0_i32, %c0_i32_0 : i32, i32, i32
  }
  func.func @transform_4(%arg0: i32, %arg1: i32) -> (i32, i32, i32) {
    %c0_i32 = arith.constant 0 : i32
    %c0_i32_0 = arith.constant 0 : i32
    %c0_i32_1 = arith.constant 0 : i32
    return %arg1, %c0_i32, %c0_i32_0 : i32, i32, i32
  }
  func.func @transform_5(%arg0: i32, %arg1: i32) -> (i32, i32, i32) {
    %c0_i32 = arith.constant 0 : i32
    %c0_i32_0 = arith.constant 0 : i32
    %c0_i32_1 = arith.constant 0 : i32
    return %arg1, %c0_i32, %c0_i32_0 : i32, i32, i32
  }
  func.func @transform_6(%arg0: i32, %arg1: i32) -> (i32, i32, i32) {
    %c0_i32 = arith.constant 0 : i32
    %c0_i32_0 = arith.constant 0 : i32
    %c0_i32_1 = arith.constant 0 : i32
    return %arg1, %c0_i32, %c0_i32_0 : i32, i32, i32
  }
  func.func @transform_7(%arg0: i32, %arg1: i32) -> (i32, i32, i32) {
    %c0_i32 = arith.constant 0 : i32
    %c0_i32_0 = arith.constant 0 : i32
    %c0_i32_1 = arith.constant 0 : i32
    return %arg1, %c0_i32, %c0_i32_0 : i32, i32, i32
  }
  func.func @transform_8(%arg0: i32, %arg1: i32) -> (i32, i32, i32) {
    %c0_i32 = arith.constant 0 : i32
    %c0_i32_0 = arith.constant 0 : i32
    %c0_i32_1 = arith.constant 0 : i32
    return %arg1, %c0_i32, %c0_i32_0 : i32, i32, i32
  }
  func.func @transform_9(%arg0: i32, %arg1: i32) -> (i32, i32, i32) {
    %c0_i32 = arith.constant 0 : i32
    %c0_i32_0 = arith.constant 0 : i32
    %c0_i32_1 = arith.constant 0 : i32
    return %arg1, %c0_i32, %c0_i32_0 : i32, i32, i32
  }
  func.func @transform_10(%arg0: i32, %arg1: i32) -> (i32, i32, i32) {
    %c0_i32 = arith.constant 0 : i32
    %c0_i32_0 = arith.constant 0 : i32
    %c0_i32_1 = arith.constant 0 : i32
    return %arg1, %c0_i32, %c0_i32_0 : i32, i32, i32
  }
  func.func @transform_11(%arg0: i32, %arg1: i32) -> (i32, i32, i32) {
    %c0_i32 = arith.constant 0 : i32
    %c0_i32_0 = arith.constant 0 : i32
    %c0_i32_1 = arith.constant 0 : i32
    return %arg1, %c0_i32, %c0_i32_0 : i32, i32, i32
  }
  func.func @transform_12(%arg0: i32, %arg1: i32) -> (i32, i32, i32) {
    %c0_i32 = arith.constant 0 : i32
    %c0_i32_0 = arith.constant 0 : i32
    %c0_i32_1 = arith.constant 0 : i32
    return %arg1, %c0_i32, %c0_i32_0 : i32, i32, i32
  }
  func.func @transform_13(%arg0: i32, %arg1: i32) -> (i32, i32, i32) {
    %c0_i32 = arith.constant 0 : i32
    %c0_i32_0 = arith.constant 0 : i32
    %c0_i32_1 = arith.constant 0 : i32
    return %arg0, %c0_i32, %c0_i32_0 : i32, i32, i32
  }
}

</mosaic_0001>

<bundles_post_ra>
// kernel: tpu_custom_call.1
= control target key start
LH: loop header
LB: loop body
LE: loop exit
PB: predicated region body
PF: predicated region fallthrough
CT: control target
= control target key end

     0   :  { %s7784_s0 = inlined_call_operand.vmem [shape: bf16[4,16,256], index: 0, kind: input, shape index: {}]   ;;  %s7785_s1 = inlined_call_operand.hbm [shape: bf16[2,256,768], index: 1, kind: input, shape index: {}]   ;;  %s7786_s2 = inlined_call_operand.vmem [shape: bf16[2,1,768], index: 2, kind: input, shape index: {}]   ;;  %s7787_s3 = inlined_call_operand.hbm [shape: bf16[2,256,256], index: 3, kind: input, shape index: {}]   ;;  %s7788_s4 = inlined_call_operand.vmem [shape: bf16[2,1,256], index: 4, kind: input, shape index: {}]   ;;  %s7789_s5 = inlined_call_operand.vmem [shape: bf16[2,1,256], index: 5, kind: input, shape index: {}]   ;;  %s7790_s6 = inlined_call_operand.vmem [shape: bf16[2,1,256], index: 6, kind: input, shape index: {}]   ;;  %s7791_s7 = inlined_call_operand.hbm [shape: bf16[2,256,512], index: 7, kind: input, shape index: {}]   ;;  %s7792_s8 = inlined_call_operand.vmem [shape: bf16[2,1,512], index: 8, kind: input, shape index: {}]   ;;  %s7793_s9 = inlined_call_operand.hbm [shape: bf16[2,512,256], index: 9, kind: input, shape index: {}]   ;;  %s7794_s10 = inlined_call_operand.vmem [shape: bf16[2,1,256], index: 10, kind: input, shape index: {}]   ;;  %s7795_s11 = inlined_call_operand.vmem [shape: bf16[2,1,256], index: 11, kind: input, shape index: {}]   ;;  %s7796_s12 = inlined_call_operand.vmem [shape: bf16[2,1,256], index: 12, kind: input, shape index: {}]   ;;  %s7797_s13 = inlined_call_operand.hbm [shape: bf16[4,16,256], index: 13, kind: output, shape index: {}]  }
   0x1   :  { %7824 = sst [smem:[#allocation35_spill]] %s7784_s0 }
   0x2   :  { %7825 = sst [smem:[#allocation36_spill]] %s7785_s1 }
   0x3   :  { %7826 = sst [smem:[#allocation37_spill]] %s7786_s2 }
   0x4   :  { %7827 = sst [smem:[#allocation38_spill]] %s7787_s3 }
   0x5   :  { %7828 = sst [smem:[#allocation39_spill]] %s7791_s7 }
   0x6   :  { %7829 = sst [smem:[#allocation40_spill]] %s7793_s9 }
   0x7   :  { %7830 = sst [smem:[#allocation41_spill]] %s7795_s11 }
   0x8   :  { %7831 = sst [smem:[#allocation42_spill]] %s7796_s12 }
   0x9   :  { %7832 = sst [smem:[#allocation43_spill]] %s7797_s13 }
   0xa   :  { %18 = vsyncpa [#allocation4], 0 }
   0xb   :  { %20 = vsyncpa [#allocation4 + $0x1], 0 }
   0xc   :  { %21 = vsyncpa [#allocation7], 0 }
   0xd   :  { %23 = vsyncpa [#allocation7 + $0x1], 0 }
   0xe   :  { %24 = vsyncpa [#allocation10], 0 }
   0xf   :  { %26 = vsyncpa [#allocation10 + $0x1], 0 }
  0x10   :  { %27 = vsyncpa [#allocation5], 0  ;;  %s6212_s25 = smov 0   ;;  %s6214_s26 = smov 0  }
  0x11   :  { %s6216_s27 = smov 0   ;;  %s6218_s28 = smov 0  }
  0x12   :  { %s6220_s29 = smov 0   ;;  %s6222_s30 = smov 0  }
  0x13 LB: > { %7833 = sst [smem:[#allocation16_spill]] %s6109_s26  ;;  %s6241_s14 = sadd.s32 4294967295, %s6125_s30   ;;  %s6125_s30 = sphi %s6222_s30, %s33_s30   ;;  %s6121_s29 = sphi %s6220_s29, %s7894_s29   ;;  %s6117_s28 = sphi %s6218_s28, %s7893_s28   ;;  %s6113_s27 = sphi %s6216_s27, %s7892_s27   ;;  %s6109_s26 = sphi %s6214_s26, %s7891_s26   ;;  %s6105_s25 = sphi %s6212_s25, %s7890_s25  }
  0x14   : > { %7834 = sst [smem:[#allocation17_spill]] %s6113_s27  ;;  %s42_s15 = sadd.s32 1, %s6121_s29 }
  0x15   : > { %7835 = sst [smem:[#allocation18_spill]] %s6121_s29  ;;  %p43_p0 = scmp.ge.s32.totalorder %s42_s15, 2 }
  0x16   : > { %7836 = sst [smem:[#allocation19_spill]] %s6125_s30  ;;  %s78_s16 = sadd.s32 1, %s6113_s27 }
  0x17   : > { %7837 = sst [smem:[#allocation20_spill]] %s6241_s14  ;;  %p85_p1 = scmp.ne.s32.totalorder %s6113_s27, %s6109_s26 }
  0x18   : > { %p86_p2 = scmp.eq.s32.totalorder %s6125_s30, 0  ;;  %s7896_s15 = smov (%p43_p0, %s42_s15), 0 }
  0x19   : > { %7838 = sst [smem:[#allocation21_spill]] %s7896_s15  ;;  %p91_p4 = scmp.ne.s32.totalorder %s6109_s26, %s6105_s25 }
  0x1a   : > { %p87_p3 = por %p86_p2, %p85_p1  ;;  %s75_s17 = ssub.s32 %s6121_s29, %s7896_s15 }
  0x1b   : > { %p92_p5 = scmp.eq.s32.totalorder %s6241_s14, 0  ;;  %p76_p6 = scmp.eq.s32.totalorder %s75_s17, 0 }
  0x1c   : > { %p5359_p8 = scmp.lt.s32.totalorder %s6125_s30, 2  ;;  %s6263_s20 = sand.u32 1, %s6113_s27  }
  0x1d   : > { %p6254_p7 = por %p92_p5, %p91_p4  ;;  %s465_s22 = sand.u32 1, %s6125_s30  }
  0x1e   : > { %s6260_s19 = scalar_select %p76_p6, %s6113_s27, %s78_s16  }
  0x1f   : > { %s7839_s18 = scalar_select %p6254_p7, 1, 0 }
  0x20   : > { %7840 = sst [smem:[#allocation22_spill]] %s6260_s19  ;;  %p6265_p9 = pnand %p5359_p8, %p87_p3 }
  0x21   : > { %s4822_s23 = sshll.u32 %s6263_s20, 8  ;;  %s5127_s24 = sshll.u32 %s6121_s29, 12 }
  0x22   : > { %s7842_s3 = sld [smem:[#allocation38_spill]]  ;;  %s469_s16 = scalar_lea.vmem [#allocation6], %s4822_s23 }
  0x23   : > { %s476_s19 = sshll.u32 %s469_s16, 4  ;;  %s6280_s27 = scalar_lea.sflag [#allocation7], %s465_s22  ;;  %s6277_s19 = int_to_ptr.vmem [resolvable:$true] %s476_s19 }
  0x24   : > { %p6286_p12 = pneg %p6265_p9 }
  0x28   : > { %s6275_s15 = scalar_lea.hbm %s7842_s3, %s5127_s24  ;;  %s5922_s23 = scalar_lea.hbm %s7842_s3, 8192 }
  0x29   : > { %s5917_s13 = scalar_lea.hbm %s6275_s15, 4096  ;;  %p5923_p1 = scmp.lt.u32.totalorder %s6275_s15, %s7842_s3 }
  0x2a   : > { %p5918_p11 = scmp.ne.s32.totalorder %s6275_s15, %s5917_s13  ;;  %p5924_p2 = scmp.lt.u32.totalorder %s5922_s23, %s5917_s13 }
  0x2b   : > { %p5926_p4 = scmp.lt.u32.totalorder %s5917_s13, %s6275_s15 }
  0x2c   : > { %p5920_p13 = pnand %p6286_p12, %p5918_p11  ;;  %p5925_p3 = por %p5924_p2, %p5923_p1 }
  0x2e   : > { %p5921_p0 = pneg %p5920_p13  ;;  %p5927_p5 = por %p5926_p4, %p5925_p3 }
  0x30   : > { %p5928_p6 = pnand %p5927_p5, %p5921_p0 }
  0x32   : > { %5931 = shalt.err (!%p5928_p6)
}
  0x33   : > { %s5932_s22 = scalar_lea.vmem %s6277_s19, 4096  ;;  %s6127_s24 = smov [#allocation6]  }
  0x34   : > { %p5933_p8 = scmp.ne.s32.totalorder %s6277_s19, %s5932_s22  ;;  %s5937_s25 = sshll.u32 %s6127_s24, 4  ;;  %s5938_s25 = int_to_ptr.vmem [resolvable:$false] %s5937_s25 }
  0x35   : > { %s5939_s17 = scalar_lea.vmem %s5938_s25, 8192  ;;  %p5940_p10 = scmp.lt.s32.totalorder %s6277_s19, %s5938_s25 }
  0x36   : > { %p5935_p11 = pnand %p5933_p8, %p6286_p12  ;;  %p5941_p7 = scmp.lt.s32.totalorder %s5939_s17, %s5932_s22 }
  0x38   : > { %p5936_p13 = pneg %p5935_p11  ;;  %p5942_p1 = por %p5941_p7, %p5940_p10 }
  0x3a   : > { %p5943_p2 = pnand %p5942_p1, %p5936_p13 }
  0x3c   : > { %5946 = shalt.err (!%p5943_p2)
}
  0x3d   : > { %s7803_s13 = smov 128   ;;  %s7804_s23 = smov 8  }
  0x3e   : > { %5352 = dma.hbm_to_vmem [thread:$0]  (!%p6265_p9), %s6275_s15, 4096, %s6277_s19, %s6280_s27, %s7803_s13, %s7803_s13, %s7804_s23  }
  0x3f   : > { %p575_p7 = scmp.lt.s32.totalorder %s6125_s30, 3  ;;  %p7844_p10 = scmp.ge.s32.totalorder %s6125_s30, 1 }
  0x40   : > { %s5330_s22 = smul.u32 768, %s6263_s20  ;;  %s7846_s1 = sld [smem:[#allocation36_spill]] }
  0x41   : > { %p6316_p0 = pnand %p7844_p10, %p575_p7  ;;  %s5331_s24 = smul.u32 12288, %s6121_s29 }
  0x42   : > { %s441_s12 = scalar_lea.vmem [#allocation3], %s5330_s22  ;;  %s4825_s15 = sshll.u32 %s6263_s20, 9 }
  0x43   : > { %s7845_s16 = scalar_select %p6316_p0, 1, 0 }
  0x44   : > { %s448_s11 = sshll.u32 %s441_s12, 4  ;;  %s438_s19 = scalar_lea.sflag [#allocation4], %s6263_s20  ;;  %s6327_s11 = int_to_ptr.vmem [resolvable:$true] %s448_s11 }
  0x46   : > { %s6325_s3 = scalar_lea.hbm %s7846_s1, %s5331_s24  ;;  %s5952_s24 = scalar_lea.hbm %s7846_s1, 24576 }
  0x47   : > { %s5947_s13 = scalar_lea.hbm %s6325_s3, 12288  ;;  %p5953_p6 = scmp.lt.u32.totalorder %s6325_s3, %s7846_s1 }
  0x48   : > { %p5948_p3 = scmp.ne.s32.totalorder %s6325_s3, %s5947_s13  ;;  %p5954_p8 = scmp.lt.u32.totalorder %s5952_s24, %s5947_s13 }
  0x49   : > { %p5956_p13 = scmp.lt.u32.totalorder %s5947_s13, %s6325_s3 }
  0x4a   : > { %p5950_p4 = pnand %p5948_p3, %p6286_p12  ;;  %p5955_p11 = por %p5954_p8, %p5953_p6 }
  0x4c   : > { %p5951_p5 = pneg %p5950_p4  ;;  %p5957_p1 = por %p5956_p13, %p5955_p11 }
  0x4e   : > { %p5958_p2 = pnand %p5957_p1, %p5951_p5 }
  0x50   : > { %5961 = shalt.err (!%p5958_p2)
}
  0x51   : > { %s5962_s12 = scalar_lea.vmem %s6327_s11, 12288  ;;  %s6130_s30 = smov [#allocation3]  }
  0x52   : > { %p5963_p7 = scmp.ne.s32.totalorder %s6327_s11, %s5962_s12  ;;  %s5967_s23 = sshll.u32 %s6130_s30, 4  ;;  %s5968_s23 = int_to_ptr.vmem [resolvable:$false] %s5967_s23 }
  0x53   : > { %s5969_s22 = scalar_lea.vmem %s5968_s23, 24576  ;;  %p5970_p4 = scmp.lt.s32.totalorder %s6327_s11, %s5968_s23 }
  0x54   : > { %p5965_p10 = pnand %p5963_p7, %p6286_p12  ;;  %p5971_p0 = scmp.lt.s32.totalorder %s5969_s22, %s5962_s12 }
  0x56   : > { %p5966_p3 = pneg %p5965_p10  ;;  %p5972_p6 = por %p5971_p0, %p5970_p4 }
  0x58   : > { %p5973_p8 = pnand %p5972_p6, %p5966_p3 }
  0x5a   : > { %5976 = shalt.err (!%p5973_p8)
}
  0x5b   : > { %s6131_s13 = smov 384   ;;  %s6132_s24 = smov 24  }
  0x5c   : > { %5349 = dma.hbm_to_vmem [thread:$0]  (!%p6265_p9), %s6325_s3, 12288, %s6327_s11, %s438_s19, %s6131_s13, %s6131_s13, %s6132_s24  }
  0x5d   : > { %s5128_s25 = sshll.u32 %s6121_s29, 13  ;;  %s7847_s7 = sld [smem:[#allocation39_spill]] }
  0x5e   : > { %s511_s23 = scalar_lea.vmem [#allocation8], %s4825_s15 }
  0x5f   : > { %s518_s22 = sshll.u32 %s511_s23, 4  ;;  %s6364_s22 = int_to_ptr.vmem [resolvable:$true] %s518_s22 }
  0x63   : > { %s6360_s30 = scalar_lea.hbm %s7847_s7, %s5128_s25  ;;  %s5982_s19 = scalar_lea.hbm %s7847_s7, 16384 }
  0x64   : > { %s5977_s1 = scalar_lea.hbm %s6360_s30, 8192  ;;  %p5983_p13 = scmp.lt.u32.totalorder %s6360_s30, %s7847_s7 }
  0x65   : > { %p5978_p0 = scmp.ne.s32.totalorder %s6360_s30, %s5977_s1  ;;  %p5984_p1 = scmp.lt.u32.totalorder %s5982_s19, %s5977_s1 }
  0x66   : > { %p5986_p7 = scmp.lt.u32.totalorder %s5977_s1, %s6360_s30 }
  0x67   : > { %p5980_p5 = pnand %p5978_p0, %p6286_p12  ;;  %p5985_p2 = por %p5984_p1, %p5983_p13 }
  0x69   : > { %p5981_p11 = pneg %p5980_p5  ;;  %p5987_p10 = por %p5986_p7, %p5985_p2 }
  0x6b   : > { %p5988_p3 = pnand %p5987_p10, %p5981_p11 }
  0x6d   : > { %5991 = shalt.err (!%p5988_p3)
}
  0x6e   : > { %s5992_s17 = scalar_lea.vmem %s6364_s22, 8192  ;;  %s6133_s12 = smov [#allocation8]  }
  0x6f   : > { %p5993_p4 = scmp.ne.s32.totalorder %s6364_s22, %s5992_s17  ;;  %s5997_s23 = sshll.u32 %s6133_s12, 4  ;;  %s5998_s23 = int_to_ptr.vmem [resolvable:$false] %s5997_s23 }
  0x70   : > { %s5999_s3 = scalar_lea.vmem %s5998_s23, 16384  ;;  %p6000_p0 = scmp.lt.s32.totalorder %s6364_s22, %s5998_s23 }
  0x71   : > { %p5995_p6 = pnand %p5993_p4, %p6286_p12  ;;  %p6001_p5 = scmp.lt.s32.totalorder %s5999_s3, %s5992_s17 }
  0x73   : > { %p5996_p8 = pneg %p5995_p6  ;;  %p6002_p13 = por %p6001_p5, %p6000_p0 }
  0x75   : > { %p6003_p1 = pnand %p6002_p13, %p5996_p8 }
  0x77   : > { %6006 = shalt.err (!%p6003_p1)
}
  0x78   : > { %s6134_s1 = smov 256   ;;  %s6135_s11 = smov 16  }
  0x79   : > { %5355 = dma.hbm_to_vmem [thread:$0]  (!%p6265_p9), %s6360_s30, 8192, %s6364_s22, %s6280_s27, %s6134_s1, %s6134_s1, %s6135_s11  }
  0x7a   : > { %s7848_s9 = sld [smem:[#allocation40_spill]]  ;;  %s539_s17 = scalar_lea.vmem [#allocation9], %s4825_s15 }
  0x7b   : > { %s546_s12 = sshll.u32 %s539_s17, 4  ;;  %s536_s23 = scalar_lea.sflag [#allocation10], %s6263_s20  ;;  %s6397_s12 = int_to_ptr.vmem [resolvable:$true] %s546_s12 }
  0x80   : > { %s6393_s24 = scalar_lea.hbm %s7848_s9, %s5128_s25  ;;  %s6012_s25 = scalar_lea.hbm %s7848_s9, 16384 }
  0x81   : > { %s6007_s3 = scalar_lea.hbm %s6393_s24, 8192  ;;  %p6013_p10 = scmp.lt.u32.totalorder %s6393_s24, %s7848_s9 }
  0x82   : > { %p6008_p11 = scmp.ne.s32.totalorder %s6393_s24, %s6007_s3  ;;  %p6014_p3 = scmp.lt.u32.totalorder %s6012_s25, %s6007_s3 }
  0x83   : > { %p6016_p6 = scmp.lt.u32.totalorder %s6007_s3, %s6393_s24 }
  0x84   : > { %p6010_p2 = pnand %p6008_p11, %p6286_p12  ;;  %p6015_p4 = por %p6014_p3, %p6013_p10 }
  0x86   : > { %p6011_p7 = pneg %p6010_p2  ;;  %p6017_p8 = por %p6016_p6, %p6015_p4 }
  0x88   : > { %p6018_p0 = pnand %p6017_p8, %p6011_p7 }
  0x8a   : > { %6021 = shalt.err (!%p6018_p0)
}
  0x8b   : > { %s6022_s15 = scalar_lea.vmem %s6397_s12, 8192  ;;  %s6136_s11 = smov [#allocation9]  }
  0x8c   : > { %p6023_p5 = scmp.ne.s32.totalorder %s6397_s12, %s6022_s15  ;;  %s6027_s19 = sshll.u32 %s6136_s11, 4  ;;  %s6028_s19 = int_to_ptr.vmem [resolvable:$false] %s6027_s19 }
  0x8d   : > { %s6029_s13 = scalar_lea.vmem %s6028_s19, 16384  ;;  %p6030_p11 = scmp.lt.s32.totalorder %s6397_s12, %s6028_s19 }
  0x8e   : > { %p6025_p13 = pnand %p6023_p5, %p6286_p12  ;;  %p6031_p2 = scmp.lt.s32.totalorder %s6029_s13, %s6022_s15 }
  0x90   : > { %p6026_p1 = pneg %p6025_p13  ;;  %p6032_p10 = por %p6031_p2, %p6030_p11 }
  0x92   : > { %p6033_p3 = pnand %p6032_p10, %p6026_p1 }
  0x94   : > { %6036 = shalt.err (!%p6033_p3)
}
  0x95   : > { %s7849_s17 = smov 8   ;;  %s7850_s3 = smov 128  }
  0x96   : > { %5358 = dma.hbm_to_vmem [thread:$0]  (!%p6265_p9), %s6393_s24, 8192, %s6397_s12, %s536_s23, %s7850_s3, %s7850_s3, %s7849_s17  }
  0x97   : > { %p7851_p12 = scmp.ne.s32.totalorder %s7845_s16, 0 }
  0x99   : > { %579 = sbr.rel (%p7851_p12) target bundleno = 3141 (0xc45), region = 72 }
  0xa0   : > { %s581_s0 = sand.u32 1, %s6109_s26   ;;  %p7852_p7 = scmp.ne.s32.totalorder %s7839_s18, 0 }
  0xa1   : > { %s5332_s27 = smul.u32 768, %s581_s0  ;;  %s582_s30 = scalar_lea.sflag [#allocation4], %s581_s0 }
  0xa3   : > { %s6429_s25 = scalar_lea.vmem [#allocation3], %s5332_s27 }
  0xa4   : > { %6088 = dma.done.wait (%p7852_p7), %s582_s30, 12288  }
  0xa5   : > { %6090 = vsyncadd (%p7852_p7), %s582_s30, 4294955008  ;;  %s590_s20 = sand.u32 1, %s6241_s14   ;;  %s4832_s21 = sshll.u32 %s581_s0, 8 }
  0xa6   : > { %s591_s24 = scalar_lea.sflag [#allocation7], %s590_s20  ;;  %s6436_s12 = scalar_lea.vmem [#allocation6], %s4832_s21 }
  0xa7   : > { %6092 = dma.done.wait (%p7852_p7), %s591_s24, 12288  }
  0xa8   : > { %6094 = vsyncadd (%p7852_p7), %s591_s24, 4294955008  ;;  %s4833_s16 = sshll.u32 %s581_s0, 9  ;;  %s609_s22 = scalar_lea.sflag [#allocation10], %s581_s0 }
  0xa9   : > { %s6442_s23 = scalar_lea.vmem [#allocation8], %s4833_s16  ;;  %s6444_s1 = scalar_lea.vmem [#allocation9], %s4833_s16 }
  0xaa   : > { %6096 = dma.done.wait (%p7852_p7), %s609_s22, 8192  }
  0xab   : > { %6098 = vsyncadd (%p7852_p7), %s609_s22, 4294959104  ;;  %p710_p9 = scmp.lt.s32.totalorder %s6117_s28, 1  ;;  %s7853_s2 = sld [smem:[#allocation37_spill]] }
  0xac   : > { %s7854_s27 = sld [smem:[#allocation41_spill]]  ;;  %p4842_p4 = scmp.ne.s32.totalorder %s6117_s28, 0 }
  0xad   : > { %s711_s15 = scalar_select %p710_p9, %s6117_s28, 1 }
  0xae   : > { %s7856_s7 = sld [smem:[#allocation35_spill]] (!%p4842_p4) }
  0xaf   : > { %s5333_s11 = smul.u32 6, %s711_s15  ;;  %s6452_s19 = sshll.u32 %s711_s15, 1 }
  0xb0   : > { %s725_s22 = scalar_lea.vmem %s7790_s6, %s6452_s19  ;;  %s4838_s13 = sshll.u32 %s711_s15, 2 }
  0xb1   : > { %s6465_s21 = scalar_lea.vmem %s7853_s2, %s5333_s11  ;;  %s733_s9 = scalar_lea.vmem %s7794_s10, %s6452_s19 }
  0xb2   : > { %s6478_s26 = scalar_lea.vmem %s7792_s8, %s4838_s13  ;;  %s737_s30 = scalar_lea.vmem %s7854_s27, %s6452_s19 }
  0xb3   : > { %s7855_s2 = sld [smem:[#allocation42_spill]]  ;;  %747 = sbr.rel (%p4842_p4) target bundleno = 186 (0xba), region = 92 }
  0xb4   : > { %v748_v0 = vld [vmem:[%s7856_s7] sm:$0xff] (!%p4842_p4)  ;;  %v749_v1 = vld [vmem:[%s7856_s7 + $0x8] sm:$0xff] (!%p4842_p4)  ;;  %v750_v2 = vld [vmem:[%s7856_s7 + $0x10] sm:$0xff] (!%p4842_p4) }
  0xb5   : > { %756 = vst [vmem:[#allocation11] sm:$0xff] (!%p4842_p4), %v748_v0  ;;  %757 = vst [vmem:[#allocation11 + $0x8] sm:$0xff] (!%p4842_p4), %v749_v1  ;;  %v751_v3 = vld [vmem:[%s7856_s7 + $0x18] sm:$0xff] (!%p4842_p4)  ;;  %v752_v4 = vld [vmem:[%s7856_s7 + $0x20] sm:$0xff] (!%p4842_p4) }
  0xb6   : > { %758 = vst [vmem:[#allocation11 + $0x10] sm:$0xff] (!%p4842_p4), %v750_v2  ;;  %v753_v5 = vld [vmem:[%s7856_s7 + $0x28] sm:$0xff] (!%p4842_p4)  ;;  %759 = vst [vmem:[#allocation11 + $0x18] sm:$0xff] (!%p4842_p4), %v751_v3  ;;  %v754_v6 = vld [vmem:[%s7856_s7 + $0x30] sm:$0xff] (!%p4842_p4) }
  0xb7   : > { %760 = vst [vmem:[#allocation11 + $0x20] sm:$0xff] (!%p4842_p4), %v752_v4  ;;  %761 = vst [vmem:[#allocation11 + $0x28] sm:$0xff] (!%p4842_p4), %v753_v5  ;;  %v755_v7 = vld [vmem:[%s7856_s7 + $0x38] sm:$0xff] (!%p4842_p4) }
  0xb8   : > { %762 = vst [vmem:[#allocation11 + $0x30] sm:$0xff] (!%p4842_p4), %v754_v6  ;;  %763 = vst [vmem:[#allocation11 + $0x38] sm:$0xff] (!%p4842_p4), %v755_v7 }
  0xb9   : > { %s741_s14 = scalar_lea.vmem %s7855_s2, %s6452_s19 }
  0xba PF: > { %v5421_v8 = vld [vmem:[%s6429_s25 + $0xc] ss:$24 sps:$4 sm:$0xff]   ;;  %v5423_v9 = vld [vmem:[%s6429_s25 + $0x8] ss:$24 sps:$4 sm:$0xff]   ;;  %v5424_v10 = vld [vmem:[%s6429_s25 + $0x3c] ss:$24 sps:$4 sm:$0xff]   ;;  %s7858_s17 = scalar_lea.vmem %s7789_s5, %s6452_s19 }
  0xbb   : > { %1534 = vmatprep.subr.bf16.mxu1 %v5421_v8  ;;  %v5426_v11 = vld [vmem:[%s6429_s25 + $0x38] ss:$24 sps:$4 sm:$0xff]   ;;  %v5427_v12 = vld [vmem:[%s6429_s25 + $0x4] ss:$24 sps:$4 sm:$0xff]   ;;  %v5433_v15 = vld [vmem:[%s6429_s25 + $0x34] ss:$24 sps:$4 sm:$0xff]  }
  0xbc   : > { %1535 = vmatpush1.bf16.msra.mxu1 %v5423_v9  ;;  %v5429_v13 = vld [vmem:[%s6429_s25] ss:$24 sps:$4 sm:$0xff]   ;;  %v5430_v14 = vld [vmem:[%s6429_s25 + $0x6c] ss:$24 sps:$4 sm:$0xff]   ;;  %1461 = vmatprep.subr.bf16.mxu0 %v5427_v12  ;;  %v5435_v16 = vld [vmem:[%s6429_s25 + $0x30] ss:$24 sps:$4 sm:$0xff]  }
  0xbd   : > { %1536 = vmatprep.subr.bf16.mxu1 %v5424_v10  ;;  %1462 = vmatpush1.bf16.msra.mxu0 %v5429_v13  ;;  %v5432_v17 = vld [vmem:[%s6429_s25 + $0x68] ss:$24 sps:$4 sm:$0xff]   ;;  %v5436_v18 = vld [vmem:[%s6429_s25 + $0x9c] ss:$24 sps:$4 sm:$0xff]   ;;  %v5438_v21 = vld [vmem:[%s6429_s25 + $0x98] ss:$24 sps:$4 sm:$0xff]  }
  0xbe   : > { %1463 = vmatprep.subr.bf16.mxu0 %v5433_v15  ;;  %v5439_v19 = vld [vmem:[%s6429_s25 + $0x64] ss:$24 sps:$4 sm:$0xff]   ;;  %v5441_v20 = vld [vmem:[%s6429_s25 + $0x60] ss:$24 sps:$4 sm:$0xff]   ;;  %v5445_v22 = vld [vmem:[%s6429_s25 + $0x94] ss:$24 sps:$4 sm:$0xff]  }
  0xbf   : > { %v5442_v23 = vld [vmem:[%s6429_s25 + $0xcc] ss:$24 sps:$4 sm:$0xff]   ;;  %v5447_v24 = vld [vmem:[%s6429_s25 + $0x90] ss:$24 sps:$4 sm:$0xff]   ;;  %v5448_v27 = vld [vmem:[%s6429_s25 + $0xfc] ss:$24 sps:$4 sm:$0xff]  }
  0xc0   : > { %1537 = vmatpush1.bf16.msra.mxu1 %v5426_v11  ;;  %v5444_v25 = vld [vmem:[%s6429_s25 + $0xc8] ss:$24 sps:$4 sm:$0xff]   ;;  %v5451_v26 = vld [vmem:[%s6429_s25 + $0xc4] ss:$24 sps:$4 sm:$0xff]   ;;  %v5450_v29 = vld [vmem:[%s6429_s25 + $0xf8] ss:$24 sps:$4 sm:$0xff]  }
  0xc1   : > { %1538 = vmatprep.subr.bf16.mxu1 %v5430_v14  ;;  %1464 = vmatpush1.bf16.msra.mxu0 %v5435_v16  ;;  %v5453_v28 = vld [vmem:[%s6429_s25 + $0xc0] ss:$24 sps:$4 sm:$0xff]   ;;  %v5457_v30 = vld [vmem:[%s6429_s25 + $0xf4] ss:$24 sps:$4 sm:$0xff]   ;;  %v5459_v32 = vld [vmem:[%s6429_s25 + $0xf0] ss:$24 sps:$4 sm:$0xff]  }
  0xc2   : > { %1465 = vmatprep.subr.bf16.mxu0 %v5439_v19  ;;  %v5454_v31 = vld [vmem:[%s6429_s25 + $0x12c] ss:$24 sps:$4 sm:$0xff]   ;;  %v5456_v33 = vld [vmem:[%s6429_s25 + $0x128] ss:$24 sps:$4 sm:$0xff]   ;;  %v5460_v35 = vld [vmem:[%s6429_s25 + $0x15c] ss:$24 sps:$4 sm:$0xff]  }
  0xc3   : > { %v5463_v34 = vld [vmem:[%s6429_s25 + $0x124] ss:$24 sps:$4 sm:$0xff]   ;;  %v5465_v36 = vld [vmem:[%s6429_s25 + $0x120] ss:$24 sps:$4 sm:$0xff]   ;;  %v5469_v38 = vld [vmem:[%s6429_s25 + $0x154] ss:$24 sps:$4 sm:$0xff]  }
  0xc4   : > { %1539 = vmatpush1.bf16.msra.mxu1 %v5432_v17  ;;  %v5462_v37 = vld [vmem:[%s6429_s25 + $0x158] ss:$24 sps:$4 sm:$0xff]   ;;  %v5466_v39 = vld [vmem:[%s6429_s25 + $0x18c] ss:$24 sps:$4 sm:$0xff]   ;;  %v5468_v41 = vld [vmem:[%s6429_s25 + $0x188] ss:$24 sps:$4 sm:$0xff]  }
  0xc5   : > { %1540 = vmatprep.subr.bf16.mxu1 %v5436_v18  ;;  %1466 = vmatpush1.bf16.msra.mxu0 %v5441_v20  ;;  %v5471_v40 = vld [vmem:[%s6429_s25 + $0x150] ss:$24 sps:$4 sm:$0xff]   ;;  %v5475_v42 = vld [vmem:[%s6429_s25 + $0x184] ss:$24 sps:$4 sm:$0xff]   ;;  %v5477_v44 = vld [vmem:[%s6429_s25 + $0x180] ss:$24 sps:$4 sm:$0xff]  }
  0xc6   : > { %1467 = vmatprep.subr.bf16.mxu0 %v5445_v22  ;;  %v5472_v43 = vld [vmem:[%s6429_s25 + $0x1bc] ss:$24 sps:$4 sm:$0xff]   ;;  %v5474_v45 = vld [vmem:[%s6429_s25 + $0x1b8] ss:$24 sps:$4 sm:$0xff]   ;;  %v5478_v47 = vld [vmem:[%s6429_s25 + $0x1ec] ss:$24 sps:$4 sm:$0xff]  }
  0xc7   : > { %v5481_v46 = vld [vmem:[%s6429_s25 + $0x1b4] ss:$24 sps:$4 sm:$0xff]   ;;  %v5483_v48 = vld [vmem:[%s6429_s25 + $0x1b0] ss:$24 sps:$4 sm:$0xff]   ;;  %v5487_v50 = vld [vmem:[%s6429_s25 + $0x1e4] ss:$24 sps:$4 sm:$0xff]  }
  0xc8   : > { %1541 = vmatpush1.bf16.msra.mxu1 %v5438_v21  ;;  %v5480_v49 = vld [vmem:[%s6429_s25 + $0x1e8] ss:$24 sps:$4 sm:$0xff]   ;;  %v5484_v51 = vld [vmem:[%s6429_s25 + $0x21c] ss:$24 sps:$4 sm:$0xff]   ;;  %v5486_v56 = vld [vmem:[%s6429_s25 + $0x218] ss:$24 sps:$4 sm:$0xff]  }
  0xc9   : > { %1542 = vmatprep.subr.bf16.mxu1 %v5442_v23  ;;  %1468 = vmatpush1.bf16.msra.mxu0 %v5447_v24  ;;  %v764_v52 = vld [vmem:[#allocation11] sm:$0xff]  ;;  %v765_v53 = vld [vmem:[#allocation11 + $0x8] sm:$0xff]  ;;  %v5496_v62 = vld [vmem:[%s6429_s25 + $0x27c] ss:$24 sps:$4 sm:$0xff]   ;;  %vm6138_vm0 = vmmov 0   ;;  %vm1876_vm1 = vcmask 130048  }
  0xca   : > { %1469 = vmatprep.subr.bf16.mxu0 %v5451_v26  ;;  %v5489_v54 = vld [vmem:[%s6429_s25 + $0x1e0] ss:$24 sps:$4 sm:$0xff]   ;;  %v6558_v55 = vcombine.high %v764_v52, %v765_v53  ;;  %v5493_v57 = vld [vmem:[%s6429_s25 + $0x214] ss:$24 sps:$4 sm:$0xff]   ;;  %v5495_v59 = vld [vmem:[%s6429_s25 + $0x210] ss:$24 sps:$4 sm:$0xff]   ;;  %v6580_v12 = vcombine.low %v764_v52, %v765_v53 }
  0xcb   : > { %v5490_v58 = vld [vmem:[%s6429_s25 + $0x24c] ss:$24 sps:$4 sm:$0xff]   ;;  %v5492_v60 = vld [vmem:[%s6429_s25 + $0x248] ss:$24 sps:$4 sm:$0xff]   ;;  %v5498_v0 = vld [vmem:[%s6429_s25 + $0x278] ss:$24 sps:$4 sm:$0xff]  }
  0xcc   : > { %1543 = vmatpush1.bf16.msra.mxu1 %v5444_v25  ;;  %1566 = vmatprep.mubr.bf16.mxu1 %v6558_v55  ;;  %v5499_v61 = vld [vmem:[%s6429_s25 + $0x244] ss:$24 sps:$4 sm:$0xff]   ;;  %v5501_v63 = vld [vmem:[%s6429_s25 + $0x240] ss:$24 sps:$4 sm:$0xff]   ;;  %v5505_v1 = vld [vmem:[%s6429_s25 + $0x274] ss:$24 sps:$4 sm:$0xff]  }
  0xcd   : > { %1544 = vmatprep.subr.bf16.mxu1 %v5448_v27  ;;  %1470 = vmatpush1.bf16.msra.mxu0 %v5453_v28  ;;  %v5502_v2 = vld [vmem:[%s6429_s25 + $0x2ac] ss:$24 sps:$4 sm:$0xff]   ;;  %v5507_v3 = vld [vmem:[%s6429_s25 + $0x270] ss:$24 sps:$4 sm:$0xff]   ;;  %v5508_v6 = vld [vmem:[%s6429_s25 + $0x2dc] ss:$24 sps:$4 sm:$0xff]  }
  0xce   : > { %1471 = vmatprep.subr.bf16.mxu0 %v5457_v30  ;;  %1493 = vmatprep.mubr.bf16.mxu0 %v6558_v55  ;;  %v5504_v4 = vld [vmem:[%s6429_s25 + $0x2a8] ss:$24 sps:$4 sm:$0xff]   ;;  %v5511_v5 = vld [vmem:[%s6429_s25 + $0x2a4] ss:$24 sps:$4 sm:$0xff]   ;;  %v5510_v7 = vld [vmem:[%s6429_s25 + $0x2d8] ss:$24 sps:$4 sm:$0xff]  }
  0xcf   : > { %v5514_v8 = vld [vmem:[%s6429_s25 + $0x2a0] ss:$24 sps:$4 sm:$0xff]   ;;  %v5516_v9 = vld [vmem:[%s6429_s25 + $0x2d4] ss:$24 sps:$4 sm:$0xff]   ;;  %v5518_v13 = vld [vmem:[%s6429_s25 + $0x2d0] ss:$24 sps:$4 sm:$0xff]  }
  0xd0   : > { %1545 = vmatpush1.bf16.msra.mxu1 %v5450_v29  ;;  %v766_v10 = vld [vmem:[#allocation11 + $0x10] sm:$0xff]  ;;  %v767_v11 = vld [vmem:[#allocation11 + $0x18] sm:$0xff]  ;;  %v768_v16 = vld [vmem:[#allocation11 + $0x20] sm:$0xff] }
  0xd1   : > { %1546 = vmatprep.subr.bf16.mxu1 %v5454_v31  ;;  %1472 = vmatpush1.bf16.msra.mxu0 %v5459_v32  ;;  %v6583_v14 = vcombine.high %v766_v10, %v767_v11  ;;  %v5527_v15 = vld [vmem:[%s6429_s25 + $0x14] ss:$24 sps:$4 sm:$0xff]   ;;  %v5525_v18 = vld [vmem:[%s6429_s25 + $0x10] ss:$24 sps:$4 sm:$0xff]   ;;  %v5530_v19 = vld [vmem:[%s6429_s25 + $0x44] ss:$24 sps:$4 sm:$0xff]   ;;  %v6593_v22 = vcombine.low %v766_v10, %v767_v11 }
  0xd2   : > { %1473 = vmatprep.subr.bf16.mxu0 %v5463_v34  ;;  %v769_v17 = vld [vmem:[#allocation11 + $0x28] sm:$0xff]  ;;  %v5528_v20 = vld [vmem:[%s6429_s25 + $0x40] ss:$24 sps:$4 sm:$0xff]   ;;  %v5536_v25 = vld [vmem:[%s6429_s25 + $0xa4] ss:$24 sps:$4 sm:$0xff]  }
  0xd3   : > { %v5533_v21 = vld [vmem:[%s6429_s25 + $0x74] ss:$24 sps:$4 sm:$0xff]   ;;  %v6596_v23 = vcombine.high %v768_v16, %v769_v17  ;;  %v5531_v24 = vld [vmem:[%s6429_s25 + $0x70] ss:$24 sps:$4 sm:$0xff]   ;;  %v771_v27 = vld [vmem:[#allocation11 + $0x38] sm:$0xff]  ;;  %v6605_v30 = vcombine.low %v768_v16, %v769_v17 }
  0xd4   : > { %1547 = vmatpush1.bf16.msra.mxu1 %v5456_v33  ;;  %v770_v26 = vld [vmem:[#allocation11 + $0x30] sm:$0xff]  ;;  %v5534_v28 = vld [vmem:[%s6429_s25 + $0xa0] ss:$24 sps:$4 sm:$0xff]   ;;  %v5542_v33 = vld [vmem:[%s6429_s25 + $0x104] ss:$24 sps:$4 sm:$0xff]  }
  0xd5   : > { %1548 = vmatprep.subr.bf16.mxu1 %v5460_v35  ;;  %1474 = vmatpush1.bf16.msra.mxu0 %v5465_v36  ;;  %v5539_v29 = vld [vmem:[%s6429_s25 + $0xd4] ss:$24 sps:$4 sm:$0xff]   ;;  %v4850_v31 = vcombine.high %v770_v26, %v771_v27  ;;  %v5537_v32 = vld [vmem:[%s6429_s25 + $0xd0] ss:$24 sps:$4 sm:$0xff]   ;;  %v5540_v34 = vld [vmem:[%s6429_s25 + $0x100] ss:$24 sps:$4 sm:$0xff]   ;;  %v4849_v36 = vcombine.low %v770_v26, %v771_v27 }
  0xd6   : > { %1475 = vmatprep.subr.bf16.mxu0 %v5469_v38  ;;  %v5545_v35 = vld [vmem:[%s6429_s25 + $0x134] ss:$24 sps:$4 sm:$0xff]   ;;  %v5548_v38 = vld [vmem:[%s6429_s25 + $0x164] ss:$24 sps:$4 sm:$0xff]   ;;  %v5567_v53 = vld [vmem:[%s6429_s25 + $0x2b0] ss:$24 sps:$4 sm:$0xff]  }
  0xd7   : > { %v5569_v52 = vld [vmem:[%s6429_s25 + $0x2b4] ss:$24 sps:$4 sm:$0xff]  }
  0xd8   : > { %1549 = vmatpush1.bf16.msra.mxu1 %v5462_v37  ;;  %v5543_v37 = vld [vmem:[%s6429_s25 + $0x130] ss:$24 sps:$4 sm:$0xff]  }
  0xd9   : > { %1550 = vmatprep.subr.bf16.mxu1 %v5466_v39  ;;  %1476 = vmatpush1.bf16.msra.mxu0 %v5471_v40  ;;  %v5546_v39 = vld [vmem:[%s6429_s25 + $0x160] ss:$24 sps:$4 sm:$0xff]   ;;  %v5551_v40 = vld [vmem:[%s6429_s25 + $0x194] ss:$24 sps:$4 sm:$0xff]  }
  0xda   : > { %1477 = vmatprep.subr.bf16.mxu0 %v5475_v42  ;;  %v5554_v42 = vld [vmem:[%s6429_s25 + $0x1c4] ss:$24 sps:$4 sm:$0xff]  }
  0xdc   : > { %1551 = vmatpush1.bf16.msra.mxu1 %v5468_v41  ;;  %v5549_v41 = vld [vmem:[%s6429_s25 + $0x190] ss:$24 sps:$4 sm:$0xff]  }
  0xdd   : > { %1552 = vmatprep.subr.bf16.mxu1 %v5472_v43  ;;  %1478 = vmatpush1.bf16.msra.mxu0 %v5477_v44  ;;  %v5552_v43 = vld [vmem:[%s6429_s25 + $0x1c0] ss:$24 sps:$4 sm:$0xff]   ;;  %v5557_v44 = vld [vmem:[%s6429_s25 + $0x1f4] ss:$24 sps:$4 sm:$0xff]  }
  0xde   : > { %1479 = vmatprep.subr.bf16.mxu0 %v5481_v46  ;;  %v5560_v46 = vld [vmem:[%s6429_s25 + $0x224] ss:$24 sps:$4 sm:$0xff]  }
  0xe0   : > { %1553 = vmatpush1.bf16.msra.mxu1 %v5474_v45  ;;  %v5555_v45 = vld [vmem:[%s6429_s25 + $0x1f0] ss:$24 sps:$4 sm:$0xff]  }
  0xe1   : > { %1554 = vmatprep.subr.bf16.mxu1 %v5478_v47  ;;  %1480 = vmatpush1.bf16.msra.mxu0 %v5483_v48  ;;  %v5558_v47 = vld [vmem:[%s6429_s25 + $0x220] ss:$24 sps:$4 sm:$0xff]   ;;  %v5563_v48 = vld [vmem:[%s6429_s25 + $0x254] ss:$24 sps:$4 sm:$0xff]  }
  0xe2   : > { %1481 = vmatprep.subr.bf16.mxu0 %v5487_v50  ;;  %v5566_v50 = vld [vmem:[%s6429_s25 + $0x284] ss:$24 sps:$4 sm:$0xff]  }
  0xe4   : > { %1555 = vmatpush1.bf16.msra.mxu1 %v5480_v49  ;;  %v5561_v49 = vld [vmem:[%s6429_s25 + $0x250] ss:$24 sps:$4 sm:$0xff]  }
  0xe5   : > { %1556 = vmatprep.subr.bf16.mxu1 %v5484_v51  ;;  %1482 = vmatpush1.bf16.msra.mxu0 %v5489_v54  ;;  %v5564_v51 = vld [vmem:[%s6429_s25 + $0x280] ss:$24 sps:$4 sm:$0xff]   ;;  %v5572_v54 = vld [vmem:[%s6429_s25 + $0x2e4] ss:$24 sps:$4 sm:$0xff]  }
  0xe6   : > { %1483 = vmatprep.subr.bf16.mxu0 %v5493_v57  ;;  %v887_v57 = vlaneseq }
  0xe8   : > { %1557 = vmatpush1.bf16.msra.mxu1 %v5486_v56  ;;  %v6137_v56 = vmov 0.0  }
  0xe9   : > { %1558 = vmatprep.subr.bf16.mxu1 %v5490_v58  ;;  %1484 = vmatpush1.bf16.msra.mxu0 %v5495_v59  ;;  %v6645_v58 = vshrl.u32 %v887_v57, 7  ;;  %v6648_v59 = vld [vmem:[%s6465_s21] sm:$0x3f]  ;;  %s7857_s21 = scalar_lea.vmem %s7788_s4, %s6452_s19  ;;  %s6139_s19 = smov [#allocation11]  }
  0xea   : > { %1485 = vmatprep.subr.bf16.mxu0 %v5499_v61 }
  0xeb   : > { %v7811_v61 = vsub.s32 4, %v6645_v58 }
  0xec   : > { %1559 = vmatpush1.bf16.msra.mxu1 %v5492_v60  ;;  %v773_v60 = vunpack.c.l.bf16 %v6648_v59 }
  0xed   : > { %1560 = vmatprep.subr.bf16.mxu1 %v5496_v62  ;;  %1486 = vmatpush1.bf16.msra.mxu0 %v5501_v63  ;;  %v7810_v62 = vsub.s32 6, %v6645_v58  ;;  %v6654_v63 = vsub.s32 2, %v6645_v58 }
  0xee   : > { %1487 = vmatprep.subr.bf16.mxu0 %v5505_v1  ;;  %v898_v1 = vrot.slane %v773_v60, %v7811_v61 }
  0xf0   : > { %1561 = vmatpush1.bf16.msra.mxu1 %v5498_v0  ;;  %v6657_v0 = vsub.s32 0, %v6645_v58 }
  0xf1   : > { %1562 = vmatprep.subr.bf16.mxu1 %v5502_v2  ;;  %1488 = vmatpush1.bf16.msra.mxu0 %v5507_v3  ;;  %v902_v2 = vrot.slane %v773_v60, %v7810_v62 }
  0xf2   : > { %1489 = vmatprep.subr.bf16.mxu0 %v5511_v5  ;;  %v890_v3 = vrot.slane %v773_v60, %v6657_v0  ;;  %v6666_v5 = vrot.slane %v898_v1, %v6657_v0 }
  0xf4   : > { %1563 = vmatpush1.bf16.msra.mxu1 %v5504_v4  ;;  %v894_v4 = vrot.slane %v773_v60, %v6654_v63 }
  0xf5   : > { %1564 = vmatprep.subr.bf16.mxu1 %v5508_v6  ;;  %1490 = vmatpush1.bf16.msra.mxu0 %v5514_v8  ;;  %v6672_v8 = vrot.slane %v890_v3, %v6657_v0 }
  0xf6   : > { %1491 = vmatprep.subr.bf16.mxu0 %v5516_v9  ;;  %v6675_v10 = vrot.slane %v894_v4, %v6657_v0 }
  0xf8   : > { %1565 = vmatpush1.bf16.msra.mxu1 %v5510_v7  ;;  %v6669_v7 = vrot.slane %v902_v2, %v6657_v0 }
  0xf9   : > { %1492 = vmatpush1.bf16.msra.mxu0 %v5518_v13  ;;  %5170 = vmatprep.subr.bf16.mxu1 %v6137_v56 }
  0xfa   : > { %1607 = vmatprep.subr.bf16.mxu0 %v5527_v15 }
  0xfb   : > { %1567 = vmatmul.mubr.bf16.vlgmr.msra.gmra.mrb[0].mxu1 %v6580_v12 }
  0xfc   : > { %1576 = vmatprep.mubr.bf16.mxu1 %v6583_v14  ;;  %1494 = vmatmul.mubr.bf16.vlgmr.msra.gmra.mrb[0].mxu0 %v6580_v12 }
  0xfd   : > { %1503 = vmatprep.mubr.bf16.mxu0 %v6583_v14  ;;  %1608 = vmatpush1.bf16.msra.mxu0 %v5525_v18 }
  0xfe   : > { %1609 = vmatprep.subr.bf16.mxu0 %v5530_v19 }
 0x101   : > { %1610 = vmatpush1.bf16.msra.mxu0 %v5528_v20 }
 0x102   : > { %1611 = vmatprep.subr.bf16.mxu0 %v5533_v21 }
 0x103   : > { %1577 = vmatmul.mubr.bf16.gmra.mrb[4].mxu1 %v6593_v22 }
 0x104   : > { %1586 = vmatprep.mubr.bf16.mxu1 %v6596_v23  ;;  %1504 = vmatmul.mubr.bf16.gmra.mrb[4].mxu0 %v6593_v22 }
 0x105   : > { %1513 = vmatprep.mubr.bf16.mxu0 %v6596_v23  ;;  %1612 = vmatpush1.bf16.msra.mxu0 %v5531_v24 }
 0x106   : > { %1613 = vmatprep.subr.bf16.mxu0 %v5536_v25 }
 0x109   : > { %1614 = vmatpush1.bf16.msra.mxu0 %v5534_v28 }
 0x10a   : > { %1615 = vmatprep.subr.bf16.mxu0 %v5539_v29 }
 0x10b   : > { %1587 = vmatmul.mubr.bf16.gmra.mrb[8].mxu1 %v6605_v30 }
 0x10c   : > { %1596 = vmatprep.mubr.bf16.mxu1 %v4850_v31  ;;  %1514 = vmatmul.mubr.bf16.gmra.mrb[8].mxu0 %v6605_v30 }
 0x10d   : > { %1523 = vmatprep.mubr.bf16.mxu0 %v4850_v31  ;;  %1616 = vmatpush1.bf16.msra.mxu0 %v5537_v32 }
 0x10e   : > { %1617 = vmatprep.subr.bf16.mxu0 %v5542_v33 }
 0x111   : > { %1618 = vmatpush1.bf16.msra.mxu0 %v5540_v34 }
 0x112   : > { %1619 = vmatprep.subr.bf16.mxu0 %v5545_v35 }
 0x113   : > { %1597 = vmatmul.mubr.bf16.gmra.mrb[12].mxu1 %v4849_v36 }
 0x114   : > { %1524 = vmatmul.mubr.bf16.gmra.mrb[12].mxu0 %v4849_v36  ;;  %5172 = vmatprep.mubr.msk.bf16.mxu1 %vm6138_vm0, %v6137_v56 }
 0x115   : > { %1620 = vmatpush1.bf16.msra.mxu0 %v5543_v37  ;;  %1639 = vmatprep.mubr.bf16.mxu0 %v6558_v55  ;;  %v5570_v55 = vld [vmem:[%s6429_s25 + $0x2e0] ss:$24 sps:$4 sm:$0xff]  }
 0x116   : > { %1621 = vmatprep.subr.bf16.mxu0 %v5548_v38 }
 0x119   : > { %1622 = vmatpush1.bf16.msra.mxu0 %v5546_v39 }
 0x11a   : > { %1623 = vmatprep.subr.bf16.mxu0 %v5551_v40 }
 0x11d   : > { %1624 = vmatpush1.bf16.msra.mxu0 %v5549_v41 }
 0x11e   : > { %1625 = vmatprep.subr.bf16.mxu0 %v5554_v42 }
 0x121   : > { %1626 = vmatpush1.bf16.msra.mxu0 %v5552_v43 }
 0x122   : > { %1627 = vmatprep.subr.bf16.mxu0 %v5557_v44 }
 0x125   : > { %1628 = vmatpush1.bf16.msra.mxu0 %v5555_v45 }
 0x126   : > { %1629 = vmatprep.subr.bf16.mxu0 %v5560_v46 }
 0x129   : > { %1630 = vmatpush1.bf16.msra.mxu0 %v5558_v47 }
 0x12a   : > { %1631 = vmatprep.subr.bf16.mxu0 %v5563_v48 }
 0x12d   : > { %1632 = vmatpush1.bf16.msra.mxu0 %v5561_v49 }
 0x12e   : > { %1633 = vmatprep.subr.bf16.mxu0 %v5566_v50 }
 0x131   : > { %1634 = vmatpush1.bf16.msra.mxu0 %v5564_v51 }
 0x132   : > { %1635 = vmatprep.subr.bf16.mxu0 %v5569_v52 }
 0x135   : > { %1636 = vmatpush1.bf16.msra.mxu0 %v5567_v53 }
 0x136   : > { %1637 = vmatprep.subr.bf16.mxu0 %v5572_v54 }
 0x139   : > { %1638 = vmatpush1.bf16.msra.mxu0 %v5570_v55 }
 0x13a   : > { %5218 = vmatprep.subr.bf16.mxu0 %v6137_v56 }
 0x13c   : > { %1640 = vmatmul.mubr.bf16.vlgmr.msra.gmra.mrb[16].mxu0 %v6580_v12 }
 0x13d   : > { %1649 = vmatprep.mubr.bf16.mxu0 %v6583_v14 }
 0x144   : > { %1650 = vmatmul.mubr.bf16.gmra.mrb[20].mxu0 %v6593_v22 }
 0x145   : > { %1659 = vmatprep.mubr.bf16.mxu0 %v6596_v23 }
 0x14c   : > { %1660 = vmatmul.mubr.bf16.gmra.mrb[24].mxu0 %v6605_v30 }
 0x14d   : > { %1669 = vmatprep.mubr.bf16.mxu0 %v4850_v31 }
 0x154   : > { %1670 = vmatmul.mubr.bf16.gmra.mrb[28].mxu0 %v4849_v36 }
 0x155   : > { %5220 = vmatprep.mubr.msk.bf16.mxu0 %vm6138_vm0, %v6137_v56 }
 0x1ce   : > { %v1568_v6 = vpop.f32.mrb[0].mxu1 }
 0x1cf   : > { %v1570_v9 = vpop.f32.mrb[1].mxu1  ;;  %v1569_v12 = vadd.f32 %v1568_v6, %v6666_v5  ;;  %v1495_v15 = vpop.f32.mrb[0].mxu0 }
 0x1d0   : > { %v1572_v11 = vpop.f32.mrb[2].mxu1  ;;  %v1571_v16 = vadd.f32 %v1570_v9, %v6669_v7  ;;  %v1496_v18 = vadd.f32 %v1495_v15, %v6672_v8  ;;  %v1497_v19 = vpop.f32.mrb[1].mxu0 }
 0x1d1   : > { %v1573_v13 = vadd.f32 %v1572_v11, %v6666_v5  ;;  %v1574_v14 = vpop.f32.mrb[3].mxu1  ;;  %v1498_v21 = vadd.f32 %v1497_v19, %v6675_v10  ;;  %v1499_v22 = vpop.f32.mrb[2].mxu0 }
 0x1d2   : > { %v1575_v17 = vadd.f32 %v1574_v14, %v6669_v7  ;;  %v1500_v24 = vadd.f32 %v1499_v22, %v6672_v8  ;;  %v1501_v25 = vpop.f32.mrb[3].mxu0 }
 0x1d3   : > { %v1688_v20 = vpack.c.bf16 %v1573_v13, %v1569_v12  ;;  %v1502_v26 = vadd.f32 %v1501_v25, %v6675_v10 }
 0x1d4   : > { %v1689_v23 = vpack.c.bf16 %v1575_v17, %v1571_v16  ;;  %v1680_v28 = vpack.c.bf16 %v1500_v24, %v1496_v18 }
 0x1d5   : > { %5171 = vmatpush3.bf16.xpose.msra.mxu1 %v1688_v20  ;;  %v1681_v30 = vpack.c.bf16 %v1502_v26, %v1498_v21 }
 0x1d6   : > { %v1578_v27 = vpop.f32.mrb[4].mxu1  ;;  %5219 = vmatpush3.bf16.xpose.msra.mxu0 %v1689_v23  ;;  %5176 = vmatprep.subr.bf16.mxu1 %v6137_v56 }
 0x1d7   : > { %v1580_v29 = vpop.f32.mrb[5].mxu1  ;;  %5230 = vmatprep.subr.bf16.mxu0 %v6137_v56  ;;  %v1579_v33 = vadd.f32 %v1578_v27, %v6666_v5  ;;  %v1505_v35 = vpop.f32.mrb[4].mxu0 }
 0x1d8   : > { %v6688_v31 = vadd.f32 %v1580_v29, %v6669_v7  ;;  %v1582_v32 = vpop.f32.mrb[6].mxu1  ;;  %v1506_v37 = vadd.f32 %v1505_v35, %v6672_v8  ;;  %v1507_v39 = vpop.f32.mrb[5].mxu0 }
 0x1d9   : > { %v1583_v34 = vadd.f32 %v1582_v32, %v6666_v5  ;;  %v1584_v36 = vpop.f32.mrb[7].mxu1  ;;  %v6697_v41 = vadd.f32 %v1507_v39, %v6675_v10  ;;  %v1509_v42 = vpop.f32.mrb[6].mxu0 }
 0x1da   : > { %v6694_v38 = vadd.f32 %v1584_v36, %v6669_v7  ;;  %v1510_v44 = vadd.f32 %v1509_v42, %v6672_v8  ;;  %v1511_v45 = vpop.f32.mrb[7].mxu0 }
 0x1db   : > { %v1690_v40 = vpack.c.bf16 %v1583_v34, %v1579_v33  ;;  %v6705_v46 = vadd.f32 %v1511_v45, %v6675_v10 }
 0x1dc   : > { %5173 = vmatmul.mubr.bf16.vlgmr.msra.gmra.mrb[16].mxu1 %v1680_v28  ;;  %v1691_v43 = vpack.c.bf16 %v6694_v38, %v6688_v31  ;;  %v1682_v48 = vpack.c.bf16 %v1510_v44, %v1506_v37 }
 0x1dd   : > { %5177 = vmatpush3.bf16.xpose.msra.mxu1 %v1690_v40  ;;  %5178 = vmatprep.mubr.msk.bf16.mxu1 %vm6138_vm0, %v6137_v56  ;;  %v1683_v51 = vpack.c.bf16 %v6705_v46, %v6697_v41 }
 0x1de   : > { %v1588_v47 = vpop.f32.mrb[8].mxu1  ;;  %5182 = vmatprep.subr.bf16.mxu1 %v6137_v56  ;;  %5221 = vmatmul.mubr.bf16.vlgmr.msra.gmra.mrb[32].mxu0 %v1681_v30 }
 0x1df   : > { %v1589_v49 = vadd.f32 %v1588_v47, %v6666_v5  ;;  %v1590_v50 = vpop.f32.mrb[9].mxu1  ;;  %5232 = vmatprep.mubr.msk.bf16.mxu0 %vm6138_vm0, %v6137_v56  ;;  %v1515_v55 = vpop.f32.mrb[8].mxu0 }
 0x1e0   : > { %v1591_v52 = vadd.f32 %v1590_v50, %v6669_v7  ;;  %v1592_v53 = vpop.f32.mrb[10].mxu1  ;;  %v1516_v60 = vadd.f32 %v1515_v55, %v6672_v8  ;;  %v1517_v2 = vpop.f32.mrb[9].mxu0 }
 0x1e1   : > { %v1593_v54 = vadd.f32 %v1592_v53, %v6666_v5  ;;  %v1594_v57 = vpop.f32.mrb[11].mxu1  ;;  %v1518_v4 = vadd.f32 %v1517_v2, %v6675_v10  ;;  %v1519_v6 = vpop.f32.mrb[10].mxu0  ;;  %v774_v53 = vunpack.c.h.bf16 %v6648_v59 }
 0x1e2   : > { %v1595_v1 = vadd.f32 %v1594_v57, %v6669_v7  ;;  %v1520_v11 = vadd.f32 %v1519_v6, %v6672_v8  ;;  %v1521_v12 = vpop.f32.mrb[11].mxu0 }
 0x1e3   : > { %v1692_v3 = vpack.c.bf16 %v1593_v54, %v1589_v49  ;;  %v1522_v13 = vadd.f32 %v1521_v12, %v6675_v10  ;;  %v906_v55 = vrot.slane %v774_v53, %v6657_v0  ;;  %v910_v57 = vrot.slane %v774_v53, %v6654_v63 }
 0x1e4   : > { %5179 = vmatmul.mubr.bf16.vlgmr.msra.gmra.mrb[20].mxu1 %v1682_v48  ;;  %v1693_v9 = vpack.c.bf16 %v1595_v1, %v1591_v52  ;;  %v1684_v15 = vpack.c.bf16 %v1520_v11, %v1516_v60 }
 0x1e5   : > { %5183 = vmatpush3.bf16.xpose.msra.mxu1 %v1692_v3  ;;  %5184 = vmatprep.mubr.msk.bf16.mxu1 %vm6138_vm0, %v6137_v56  ;;  %v1685_v18 = vpack.c.bf16 %v1522_v13, %v1518_v4  ;;  %v936_v60 = vrot.slane %v906_v55, %v6657_v0  ;;  %v940_v1 = vrot.slane %v910_v57, %v6657_v0 }
 0x1e6   : > { %v1598_v14 = vpop.f32.mrb[12].mxu1  ;;  %5188 = vmatprep.subr.bf16.mxu1 %v6137_v56  ;;  %5231 = vmatpush3.bf16.xpose.msra.mxu0 %v1693_v9 }
 0x1e7   : > { %v1599_v16 = vadd.f32 %v1598_v14, %v6666_v5  ;;  %v1600_v17 = vpop.f32.mrb[13].mxu1  ;;  %5242 = vmatprep.subr.bf16.mxu0 %v6137_v56  ;;  %v1525_v22 = vpop.f32.mrb[12].mxu0 }
 0x1e8   : > { %v6726_v19 = vadd.f32 %v1600_v17, %v6669_v7  ;;  %v1602_v20 = vpop.f32.mrb[14].mxu1  ;;  %v1526_v24 = vadd.f32 %v1525_v22, %v6672_v8  ;;  %v1527_v25 = vpop.f32.mrb[13].mxu0 }
 0x1e9   : > { %v1603_v21 = vadd.f32 %v1602_v20, %v6666_v5  ;;  %v1604_v23 = vpop.f32.mrb[15].mxu1  ;;  %v6734_v28 = vadd.f32 %v1527_v25, %v6675_v10  ;;  %v1529_v29 = vpop.f32.mrb[14].mxu0 }
 0x1ea   : > { %v6731_v26 = vadd.f32 %v1604_v23, %v6669_v7  ;;  %v1530_v30 = vadd.f32 %v1529_v29, %v6672_v8  ;;  %v1531_v5 = vpop.f32.mrb[15].mxu0 }
 0x1eb   : > { %v1694_v27 = vpack.c.bf16 %v1603_v21, %v1599_v16  ;;  %v6742_v33 = vadd.f32 %v1531_v5, %v6675_v10 }
 0x1ec   : > { %5185 = vmatmul.mubr.bf16.vlgmr.msra.gmra.mrb[24].mxu1 %v1684_v15  ;;  %v1695_v32 = vpack.c.bf16 %v6731_v26, %v6726_v19  ;;  %v1686_v7 = vpack.c.bf16 %v1530_v30, %v1526_v24 }
 0x1ed   : > { %5189 = vmatpush3.bf16.xpose.msra.mxu1 %v1694_v27  ;;  %5190 = vmatprep.mubr.msk.bf16.mxu1 %vm6138_vm0, %v6137_v56  ;;  %v1687_v34 = vpack.c.bf16 %v6742_v33, %v6734_v28 }
 0x1ee   : > { %5233 = vmatmul.mubr.bf16.vlgmr.msra.gmra.mrb[36].mxu0 %v1685_v18  ;;  %5194 = vmatprep.subr.bf16.mxu1 %v6137_v56 }
 0x1ef   : > { %5244 = vmatprep.mubr.msk.bf16.mxu0 %vm6138_vm0, %v6137_v56 }
 0x1f4   : > { %5191 = vmatmul.mubr.bf16.vlgmr.msra.gmra.mrb[28].mxu1 %v1686_v7 }
 0x1f5   : > { %5196 = vmatprep.mubr.msk.bf16.mxu1 %vm6138_vm0, %v6137_v56 }
 0x20f   : > { %v1641_v8 = vpop.f32.mrb[16].mxu0 }
 0x210   : > { %v1643_v35 = vpop.f32.mrb[17].mxu0  ;;  %v1642_v2 = vadd.f32 %v1641_v8, %v936_v60 }
 0x211   : > { %v1645_v36 = vpop.f32.mrb[18].mxu0  ;;  %v1644_v3 = vadd.f32 %v1643_v35, %v940_v1 }
 0x212   : > { %v1647_v37 = vpop.f32.mrb[19].mxu0  ;;  %v1646_v4 = vadd.f32 %v1645_v36, %v936_v60 }
 0x213   : > { %v1648_v6 = vadd.f32 %v1647_v37, %v940_v1 }
 0x214   : > { %v1696_v12 = vpack.c.bf16 %v1646_v4, %v1642_v2 }
 0x215   : > { %v1697_v13 = vpack.c.bf16 %v1648_v6, %v1644_v3 }
 0x216   : > { %5195 = vmatpush3.bf16.msra.mxu1 %v1696_v12 }
 0x217   : > { %v1651_v10 = vpop.f32.mrb[20].mxu0  ;;  %5243 = vmatpush3.bf16.msra.mxu0 %v1697_v13  ;;  %5200 = vmatprep.subr.bf16.mxu1 %v6137_v56 }
 0x218   : > { %v1653_v39 = vpop.f32.mrb[21].mxu0  ;;  %v6756_v9 = vadd.f32 %v1651_v10, %v936_v60  ;;  %5254 = vmatprep.subr.bf16.mxu0 %v6137_v56 }
 0x219   : > { %v1655_v40 = vpop.f32.mrb[22].mxu0  ;;  %v6758_v11 = vadd.f32 %v1653_v39, %v940_v1 }
 0x21a   : > { %v1657_v42 = vpop.f32.mrb[23].mxu0  ;;  %v6760_v59 = vadd.f32 %v1655_v40, %v936_v60 }
 0x21b   : > { %v6762_v14 = vadd.f32 %v1657_v42, %v940_v1 }
 0x21c   : > { %v1698_v17 = vpack.c.bf16 %v6760_v59, %v6756_v9 }
 0x21d   : > { %v1699_v18 = vpack.c.bf16 %v6762_v14, %v6758_v11 }
 0x21f   : > { %v1661_v44 = vpop.f32.mrb[24].mxu0 }
 0x220   : > { %v1663_v45 = vpop.f32.mrb[25].mxu0  ;;  %v6764_v15 = vadd.f32 %v1661_v44, %v936_v60 }
 0x221   : > { %v1665_v47 = vpop.f32.mrb[26].mxu0  ;;  %v6766_v16 = vadd.f32 %v1663_v45, %v940_v1 }
 0x222   : > { %v1667_v48 = vpop.f32.mrb[27].mxu0  ;;  %v6772_v20 = vadd.f32 %v1665_v47, %v936_v60 }
 0x223   : > { %v6774_v21 = vadd.f32 %v1667_v48, %v940_v1 }
 0x224   : > { %v1700_v24 = vpack.c.bf16 %v6772_v20, %v6764_v15 }
 0x225   : > { %v1701_v25 = vpack.c.bf16 %v6774_v21, %v6766_v16 }
 0x227   : > { %v1671_v49 = vpop.f32.mrb[28].mxu0 }
 0x228   : > { %v1673_v50 = vpop.f32.mrb[29].mxu0  ;;  %v6776_v22 = vadd.f32 %v1671_v49, %v936_v60 }
 0x229   : > { %v1675_v52 = vpop.f32.mrb[30].mxu0  ;;  %v6778_v23 = vadd.f32 %v1673_v50, %v940_v1 }
 0x22a   : > { %v1677_v54 = vpop.f32.mrb[31].mxu0  ;;  %v6786_v27 = vadd.f32 %v1675_v52, %v936_v60 }
 0x22b   : > { %v6788_v29 = vadd.f32 %v1677_v54, %v940_v1 }
 0x22c   : > { %v1702_v30 = vpack.c.bf16 %v6786_v27, %v6776_v22 }
 0x22d   : > { %v1703_v5 = vpack.c.bf16 %v6788_v29, %v6778_v23  ;;  %v5581_v29 = vld [vmem:[%s6436_s12 + $0x24] ss:$8 sps:$4 sm:$0xff]  }
 0x2af   : > { %v1738_v7 = vpop.f32.mrb[16].mxu1 }
 0x2b0   : > { %v1868_v8 = vmul.f32 0.088388346, %v1738_v7  ;;  %v5174_v35 = vpop.f32.mrb[17].mxu1 }
 0x2b1   : > { %v1741_v36 = vpop.f32.mrb[18].mxu1  ;;  %v6794_v37 = vpop.f32.mrb[32].mxu0 }
 0x2b2   : > { %v1877_v10 = vsel %vm1876_vm1, %v1868_v8, -inf  ;;  %v1869_v39 = vmul.f32 0.088388346, %v1741_v36  ;;  %v5175_v40 = vpop.f32.mrb[19].mxu1  ;;  %v5222_v42 = vpop.f32.mrb[33].mxu0 }
 0x2b3   : > { %1878 = vmax.xlane.f32.xlu0 %v1877_v10  ;;  %v6797_v44 = vpop.f32.mrb[34].mxu0 }
 0x2b4   : > { %v5223_v45 = vpop.f32.mrb[35].mxu0  ;;  %v1880_v47 = vsel %vm1876_vm1, %v1869_v39, -inf }
 0x2b7   : > { %1881 = vmax.xlane.f32.xlu0 %v1880_v47  ;;  %v1779_v48 = vpop.f32.mrb[20].mxu1 }
 0x2b8   : > { %v1870_v49 = vmul.f32 0.088388346, %v1779_v48  ;;  %v5180_v50 = vpop.f32.mrb[21].mxu1 }
 0x2b9   : > { %v1782_v52 = vpop.f32.mrb[22].mxu1 }
 0x2ba   : > { %v1883_v53 = vsel %vm1876_vm1, %v1870_v49, -inf  ;;  %v1871_v54 = vmul.f32 0.088388346, %v1782_v52  ;;  %v5181_v55 = vpop.f32.mrb[23].mxu1 }
 0x2bb   : > { %1884 = vmax.xlane.f32.xlu1 %v1883_v53 }
 0x2bc   : > { %v1886_v57 = vsel %vm1876_vm1, %v1871_v54, -inf }
 0x2bf   : > { %1887 = vmax.xlane.f32.xlu1 %v1886_v57  ;;  %v1820_v60 = vpop.f32.mrb[24].mxu1 }
 0x2c0   : > { %v1872_v1 = vmul.f32 0.088388346, %v1820_v60  ;;  %v5186_v2 = vpop.f32.mrb[25].mxu1 }
 0x2c1   : > { %v1823_v3 = vpop.f32.mrb[26].mxu1  ;;  %v6802_v4 = vpop.f32.mrb[36].mxu0 }
 0x2c2   : > { %v1873_v6 = vmul.f32 0.088388346, %v1823_v3  ;;  %v1889_v12 = vsel %vm1876_vm1, %v1872_v1, -inf  ;;  %v5187_v13 = vpop.f32.mrb[27].mxu1  ;;  %v5234_v7 = vpop.f32.mrb[37].mxu0 }
 0x2c3   : > { %1890 = vmax.xlane.f32.xlu0 %v1889_v12  ;;  %v6806_v36 = vpop.f32.mrb[38].mxu0 }
 0x2c4   : > { %v1892_v35 = vsel %vm1876_vm1, %v1873_v6, -inf  ;;  %v5235_v10 = vpop.f32.mrb[39].mxu0 }
 0x2c5   : > { %1893 = vmax.xlane.f32.xlu1 %v1892_v35 }
 0x2c7   : > { %v1861_v40 = vpop.f32.mrb[28].mxu1 }
 0x2c8   : > { %v1874_v42 = vmul.f32 0.088388346, %v1861_v40  ;;  %v5192_v45 = vpop.f32.mrb[29].mxu1 }
 0x2c9   : > { %v1864_v47 = vpop.f32.mrb[30].mxu1 }
 0x2ca   : > { %v1875_v48 = vmul.f32 0.088388346, %v1864_v47  ;;  %v1895_v50 = vsel %vm1876_vm1, %v1874_v42, -inf  ;;  %v5193_v52 = vpop.f32.mrb[31].mxu1 }
 0x2cb   : > { %1896 = vmax.xlane.f32.xlu0 %v1895_v50 }
 0x2cc   : > { %v1898_v53 = vsel %vm1876_vm1, %v1875_v48, -inf }
 0x2cd   : > { %1899 = vmax.xlane.f32.xlu1 %v1898_v53 }
 0x340   : > { %v1879_v55 = vpop.xlane.xlu0 %1878 }
 0x341   : > { %v1901_v57 = vsub.f32 %v1868_v8, %v1879_v55 }
 0x343   : > { %v1909_v60 = vmul.f32 1.442695, %v1901_v57 }
 0x344   : > { %v1882_v2 = vpop.xlane.xlu0 %1881 }
 0x345   : > { %5813 = vpow2.f32 %v1909_v60  ;;  %v1902_v3 = vsub.f32 %v1869_v39, %v1882_v2 }
 0x347   : > { %v1911_v12 = vmul.f32 1.442695, %v1902_v3 }
 0x348   : > { %v1885_v13 = vpop.xlane.xlu1 %1884 }
 0x349   : > { %5815 = vpow2.f32 %v1911_v12  ;;  %v1903_v7 = vsub.f32 %v1870_v49, %v1885_v13 }
 0x34b   : > { %v1913_v35 = vmul.f32 1.442695, %v1903_v7 }
 0x34c   : > { %v1888_v10 = vpop.xlane.xlu1 %1887 }
 0x34d   : > { %5817 = vpow2.f32 %v1913_v35  ;;  %v1904_v40 = vsub.f32 %v1871_v54, %v1888_v10 }
 0x34f   : > { %v5814_v45 = vpop.eup %5813  ;;  %v1915_v47 = vmul.f32 1.442695, %v1904_v40 }
 0x350   : > { %v1891_v50 = vpop.xlane.xlu0 %1890  ;;  %v1925_v52 = vsel %vm1876_vm1, %v5814_v45, 0.0 }
 0x351   : > { %5819 = vpow2.f32 %v1915_v47  ;;  %v1905_v53 = vsub.f32 %v1872_v1, %v1891_v50  ;;  %1926 = vadd.xlane.f32.xlu0 %v1925_v52 }
 0x352   : > { %v1894_v8 = vpop.xlane.xlu1 %1893 }
 0x353   : > { %v5816_v55 = vpop.eup %5815  ;;  %v1917_v57 = vmul.f32 1.442695, %v1905_v53  ;;  %v1906_v39 = vsub.f32 %v1873_v6, %v1894_v8  ;;  %v6817_v53 = vmul.f32 0.088388346, %v6794_v37 }
 0x354   : > { %v1928_v60 = vsel %vm1876_vm1, %v5816_v55, 0.0 }
 0x355   : > { %5821 = vpow2.f32 %v1917_v57  ;;  %v1919_v49 = vmul.f32 1.442695, %v1906_v39  ;;  %1929 = vadd.xlane.f32.xlu1 %v1928_v60  ;;  %v6821_v57 = vmul.f32 0.088388346, %v6797_v44  ;;  %v2325_v60 = vsel %vm1876_vm1, %v6817_v53, -inf }
 0x357   : > { %v5818_v2 = vpop.eup %5817  ;;  %5823 = vpow2.f32 %v1919_v49  ;;  %v2328_v49 = vsel %vm1876_vm1, %v6821_v57, -inf }
 0x358   : > { %v1897_v54 = vpop.xlane.xlu0 %1896  ;;  %v1931_v3 = vsel %vm1876_vm1, %v5818_v2, 0.0 }
 0x359   : > { %v1907_v12 = vsub.f32 %v1874_v42, %v1897_v54  ;;  %1932 = vadd.xlane.f32.xlu0 %v1931_v3 }
 0x35a   : > { %v1900_v13 = vpop.xlane.xlu1 %1899 }
 0x35b   : > { %v5820_v7 = vpop.eup %5819  ;;  %v1921_v1 = vmul.f32 1.442695, %v1907_v12  ;;  %v1908_v35 = vsub.f32 %v1875_v48, %v1900_v13 }
 0x35c   : > { %v1934_v10 = vsel %vm1876_vm1, %v5820_v7, 0.0 }
 0x35d   : > { %5825 = vpow2.f32 %v1921_v1  ;;  %v1923_v6 = vmul.f32 1.442695, %v1908_v35  ;;  %1935 = vadd.xlane.f32.xlu1 %v1934_v10 }
 0x35f   : > { %v5822_v40 = vpop.eup %5821  ;;  %5827 = vpow2.f32 %v1923_v6 }
 0x360   : > { %v1937_v47 = vsel %vm1876_vm1, %v5822_v40, 0.0 }
 0x361   : > { %v5824_v50 = vpop.eup %5823  ;;  %1938 = vadd.xlane.f32.xlu0 %v1937_v47 }
 0x362   : > { %v1940_v52 = vsel %vm1876_vm1, %v5824_v50, 0.0 }
 0x363   : > { %1941 = vadd.xlane.f32.xlu1 %v1940_v52 }
 0x367   : > { %v5826_v42 = vpop.eup %5825 }
 0x368   : > { %v1943_v48 = vsel %vm1876_vm1, %v5826_v42, 0.0 }
 0x369   : > { %v5828_v8 = vpop.eup %5827  ;;  %1944 = vadd.xlane.f32.xlu0 %v1943_v48 }
 0x36a   : > { %v1946_v39 = vsel %vm1876_vm1, %v5828_v8, 0.0 }
 0x36b   : > { %1947 = vadd.xlane.f32.xlu1 %v1946_v39 }
 0x36d   : > { %2326 = vmax.xlane.f32.xlu0 %v2325_v60 }
 0x36f   : > { %2329 = vmax.xlane.f32.xlu1 %v2328_v49 }
 0x3de   : > { %v1927_v37 = vpop.xlane.xlu0 %1926 }
 0x3df   : > { %5829 = vrcp.f32 %v1927_v37 }
 0x3e2   : > { %v1930_v54 = vpop.xlane.xlu1 %1929 }
 0x3e3   : > { %5831 = vrcp.f32 %v1930_v54 }
 0x3e6   : > { %v1933_v3 = vpop.xlane.xlu0 %1932 }
 0x3e7   : > { %5833 = vrcp.f32 %v1933_v3 }
 0x3e9   : > { %v5830_v44 = vpop.eup %5829 }
 0x3ea   : > { %v1936_v12 = vpop.xlane.xlu1 %1935  ;;  %v1957_v1 = vmul.f32 %v5830_v44, %v5814_v45 }
 0x3eb   : > { %5835 = vrcp.f32 %v1936_v12 }
 0x3ed   : > { %v5832_v13 = vpop.eup %5831 }
 0x3ee   : > { %v1958_v35 = vmul.f32 %v5832_v13, %v5816_v55  ;;  %v1939_v10 = vpop.xlane.xlu0 %1938 }
 0x3ef   : > { %5837 = vrcp.f32 %v1939_v10 }
 0x3f0   : > { %v1942_v6 = vpop.xlane.xlu1 %1941  ;;  %v1965_v47 = vpack.c.bf16 %v1958_v35, %v1957_v1 }
 0x3f1   : > { %5839 = vrcp.f32 %v1942_v6  ;;  %v5834_v52 = vpop.eup %5833 }
 0x3f2   : > { %5197 = vmatmul.mubr.msk.bf16.vlgmr.msra.gmra.mrb[32].mxu1 %vm1876_vm1, %v1965_v47  ;;  %v1959_v45 = vmul.f32 %v5834_v52, %v5818_v2  ;;  %v2321_v47 = vmul.f32 0.088388346, %v6802_v4 }
 0x3f3   : > { %5201 = vmatpush3.bf16.msra.mxu1 %v1698_v17  ;;  %5202 = vmatprep.mubr.msk.bf16.mxu1 %vm6138_vm0, %v6137_v56 }
 0x3f4   : > { %5206 = vmatprep.subr.bf16.mxu1 %v6137_v56 }
 0x3f5   : > { %v5836_v48 = vpop.eup %5835 }
 0x3f6   : > { %v1960_v55 = vmul.f32 %v5836_v48, %v5820_v7  ;;  %v1945_v39 = vpop.xlane.xlu0 %1944 }
 0x3f7   : > { %5841 = vrcp.f32 %v1945_v39 }
 0x3f8   : > { %v1948_v60 = vpop.xlane.xlu1 %1947  ;;  %v1966_v49 = vpack.c.bf16 %v1960_v55, %v1959_v45 }
 0x3f9   : > { %5843 = vrcp.f32 %v1948_v60  ;;  %v5838_v37 = vpop.eup %5837 }
 0x3fa   : > { %5203 = vmatmul.mubr.msk.bf16.vlgmr.msra.gmra.mrb[36].mxu1 %vm1876_vm1, %v1966_v49  ;;  %v1961_v59 = vmul.f32 %v5838_v37, %v5822_v40  ;;  %v2327_v22 = vpop.xlane.xlu0 %2326 }
 0x3fb   : > { %v5840_v54 = vpop.eup %5839  ;;  %5207 = vmatpush3.bf16.msra.mxu1 %v1700_v24  ;;  %5208 = vmatprep.mubr.msk.bf16.mxu1 %vm6138_vm0, %v6137_v56 }
 0x3fc   : > { %v1962_v9 = vmul.f32 %v5840_v54, %v5824_v50  ;;  %5212 = vmatprep.subr.bf16.mxu1 %v6137_v56  ;;  %v2330_v40 = vpop.xlane.xlu1 %2329 }
 0x3fd   : > { %v2350_v12 = vsub.f32 %v6821_v57, %v2330_v40  ;;  %v2337_v57 = vsel %vm1876_vm1, %v2321_v47, -inf }
 0x3fe   : > { %v1967_v17 = vpack.c.bf16 %v1962_v9, %v1961_v59 }
 0x3ff   : > { %v2359_v13 = vmul.f32 1.442695, %v2350_v12 }
 0x401   : > { %v5842_v2 = vpop.eup %5841 }
 0x402   : > { %5209 = vmatmul.mubr.msk.bf16.vlgmr.msra.gmra.mrb[40].mxu1 %vm1876_vm1, %v1967_v17  ;;  %v1963_v20 = vmul.f32 %v5842_v2, %v5826_v42  ;;  %v2349_v42 = vsub.f32 %v6817_v53, %v2327_v22  ;;  %v2322_v53 = vmul.f32 0.088388346, %v6806_v36 }
 0x403   : > { %v5844_v7 = vpop.eup %5843  ;;  %5213 = vmatpush3.bf16.msra.mxu1 %v1702_v30  ;;  %5214 = vmatprep.mubr.msk.bf16.mxu1 %vm6138_vm0, %v6137_v56 }
 0x404   : > { %v1964_v15 = vmul.f32 %v5844_v7, %v5828_v8  ;;  %5224 = vmatprep.subr.bf16.mxu1 %v6137_v56  ;;  %v2357_v44 = vmul.f32 1.442695, %v2349_v42  ;;  %v2340_v37 = vsel %vm1876_vm1, %v2322_v53, -inf }
 0x406   : > { %v1968_v24 = vpack.c.bf16 %v1964_v15, %v1963_v20  ;;  %5845 = vpow2.f32 %v2357_v44 }
 0x407   : > { %5847 = vpow2.f32 %v2359_v13 }
 0x40a   : > { %5215 = vmatmul.mubr.msk.bf16.vlgmr.msra.gmra.mrb[44].mxu1 %vm1876_vm1, %v1968_v24 }
 0x40b   : > { %5226 = vmatprep.mubr.msk.bf16.mxu1 %vm6138_vm0, %v6137_v56 }
 0x40c   : > { %5225 = vmatpush3.bf16.xpose.msra.mxu1 %v1691_v43 }
 0x40d   : > { %5236 = vmatprep.subr.bf16.mxu1 %v6137_v56 }
 0x410   : > { %v5846_v17 = vpop.eup %5845 }
 0x411   : > { %v5848_v2 = vpop.eup %5847  ;;  %v2373_v7 = vsel %vm1876_vm1, %v5846_v17, 0.0 }
 0x412   : > { %v2376_v15 = vsel %vm1876_vm1, %v5848_v2, 0.0 }
 0x413   : > { %5227 = vmatmul.mubr.bf16.vlgmr.msra.gmra.mrb[48].mxu1 %v1683_v51 }
 0x414   : > { %5237 = vmatpush3.bf16.xpose.msra.mxu1 %v1695_v32  ;;  %5238 = vmatprep.mubr.msk.bf16.mxu1 %vm6138_vm0, %v6137_v56 }
 0x415   : > { %5248 = vmatprep.subr.bf16.mxu1 %v6137_v56 }
 0x41b   : > { %5239 = vmatmul.mubr.bf16.vlgmr.msra.gmra.mrb[52].mxu1 %v1687_v34 }
 0x41c   : > { %5249 = vmatpush3.bf16.msra.mxu1 %v1699_v18  ;;  %5250 = vmatprep.mubr.msk.bf16.mxu1 %vm6138_vm0, %v6137_v56 }
 0x41d   : > { %5260 = vmatprep.subr.bf16.mxu1 %v6137_v56 }
 0x4c5   : > { %v6874_v31 = vpop.f32.mrb[32].mxu1 }
 0x4c6   : > { %v5198_v38 = vpop.f32.mrb[33].mxu1 }
 0x4c7   : > { %v6876_v41 = vpop.f32.mrb[34].mxu1 }
 0x4c8   : > { %v2145_v43 = vpack.c.bf16 %v6876_v41, %v6874_v31  ;;  %v5199_v46 = vpop.f32.mrb[35].mxu1 }
 0x4cd   : > { %v6880_v51 = vpop.f32.mrb[36].mxu1 }
 0x4ce   : > { %v5204_v19 = vpop.f32.mrb[37].mxu1 }
 0x4cf   : > { %v6882_v26 = vpop.f32.mrb[38].mxu1 }
 0x4d0   : > { %v2146_v28 = vpack.c.bf16 %v6882_v26, %v6880_v51  ;;  %v5205_v32 = vpop.f32.mrb[39].mxu1  ;;  %v775_v51 = vld [vmem:[%s7857_s21] sm:$0x3] }
 0x4d1   : > { %v776_v26 = vunpack.c.l.bf16 %v775_v51 }
 0x4d5   : > { %v6886_v33 = vpop.f32.mrb[40].mxu1 }
 0x4d6   : > { %v5210_v34 = vpop.f32.mrb[41].mxu1 }
 0x4d7   : > { %v6888_v11 = vpop.f32.mrb[42].mxu1 }
 0x4d8   : > { %v2147_v14 = vpack.c.bf16 %v6888_v11, %v6886_v33  ;;  %v5211_v18 = vpop.f32.mrb[43].mxu1  ;;  %v5909_v11 = vld [vmem:[#allocation11] sm:$0xff] }
 0x4dd   : > { %v6892_v27 = vpop.f32.mrb[44].mxu1 }
 0x4de   : > { %v5216_v30 = vpop.f32.mrb[45].mxu1 }
 0x4df   : > { %v6894_v50 = vpop.f32.mrb[46].mxu1 }
 0x4e0   : > { %v2148_v8 = vpack.c.bf16 %v6894_v50, %v6892_v27  ;;  %v5217_v3 = vpop.f32.mrb[47].mxu1  ;;  %v2894_v50 = vunpack.c.h.bf16 %v5909_v11 }
 0x4e6   : > { %v2228_v1 = vpop.f32.mrb[48].mxu1 }
 0x4e7   : > { %v2319_v35 = vmul.f32 0.088388346, %v2228_v1  ;;  %v5228_v10 = vpop.f32.mrb[49].mxu1 }
 0x4e8   : > { %v2231_v6 = vpop.f32.mrb[50].mxu1 }
 0x4e9   : > { %v2320_v52 = vmul.f32 0.088388346, %v2231_v6  ;;  %v5229_v48 = vpop.f32.mrb[51].mxu1  ;;  %v2331_v45 = vsel %vm1876_vm1, %v2319_v35, -inf }
 0x4ea   : > { %2332 = vmax.xlane.f32.xlu0 %v2331_v45 }
 0x4eb   : > { %v2334_v55 = vsel %vm1876_vm1, %v2320_v52, -inf }
 0x4ec   : > { %2335 = vmax.xlane.f32.xlu1 %v2334_v55 }
 0x4ee   : > { %2338 = vmax.xlane.f32.xlu0 %v2337_v57  ;;  %v2310_v39 = vpop.f32.mrb[52].mxu1 }
 0x4ef   : > { %v2323_v60 = vmul.f32 0.088388346, %v2310_v39  ;;  %v5240_v49 = vpop.f32.mrb[53].mxu1 }
 0x4f0   : > { %2341 = vmax.xlane.f32.xlu1 %v2340_v37  ;;  %v2313_v4 = vpop.f32.mrb[54].mxu1 }
 0x4f1   : > { %v2324_v54 = vmul.f32 0.088388346, %v2313_v4  ;;  %v5241_v9 = vpop.f32.mrb[55].mxu1  ;;  %v2343_v59 = vsel %vm1876_vm1, %v2323_v60, -inf }
 0x4f2   : > { %2344 = vmax.xlane.f32.xlu0 %v2343_v59 }
 0x4f3   : > { %v2346_v36 = vsel %vm1876_vm1, %v2324_v54, -inf }
 0x4f4   : > { %2347 = vmax.xlane.f32.xlu1 %v2346_v36 }
 0x4f6   : > { %2374 = vadd.xlane.f32.xlu0 %v2373_v7 }
 0x4f8   : > { %2377 = vadd.xlane.f32.xlu1 %v2376_v15  ;;  %v5575_v15 = vld [vmem:[%s6436_s12 + $0x4] ss:$8 sps:$4 sm:$0xff]  }
 0x577   : > { %v2333_v20 = vpop.xlane.xlu0 %2332 }
 0x578   : > { %v2351_v24 = vsub.f32 %v2319_v35, %v2333_v20 }
 0x579   : > { %v2336_v38 = vpop.xlane.xlu1 %2335 }
 0x57a   : > { %v2361_v46 = vmul.f32 1.442695, %v2351_v24  ;;  %v2352_v19 = vsub.f32 %v2320_v52, %v2336_v38 }
 0x57b   : > { %v2339_v32 = vpop.xlane.xlu0 %2338 }
 0x57c   : > { %5849 = vpow2.f32 %v2361_v46  ;;  %v2363_v34 = vmul.f32 1.442695, %v2352_v19  ;;  %v2353_v18 = vsub.f32 %v2321_v47, %v2339_v32 }
 0x57d   : > { %v2342_v22 = vpop.xlane.xlu1 %2341 }
 0x57e   : > { %5851 = vpow2.f32 %v2363_v34  ;;  %v2365_v30 = vmul.f32 1.442695, %v2353_v18  ;;  %v2354_v40 = vsub.f32 %v2322_v53, %v2342_v22 }
 0x57f   : > { %v2345_v42 = vpop.xlane.xlu0 %2344 }
 0x580   : > { %5853 = vpow2.f32 %v2365_v30  ;;  %v2367_v3 = vmul.f32 1.442695, %v2354_v40  ;;  %v2355_v12 = vsub.f32 %v2323_v60, %v2345_v42  ;;  %v5573_v42 = vld [vmem:[%s6436_s12] ss:$8 sps:$4 sm:$0xff]  }
 0x581   : > { %v2348_v44 = vpop.xlane.xlu1 %2347 }
 0x582   : > { %5855 = vpow2.f32 %v2367_v3  ;;  %v2369_v13 = vmul.f32 1.442695, %v2355_v12  ;;  %v2356_v1 = vsub.f32 %v2324_v54, %v2348_v44  ;;  %v5578_v12 = vld [vmem:[%s6436_s12 + $0x14] ss:$8 sps:$4 sm:$0xff]  }
 0x583   : > { %v2375_v35 = vpop.xlane.xlu0 %2374 }
 0x584   : > { %5857 = vpow2.f32 %v2369_v13  ;;  %v2371_v10 = vmul.f32 1.442695, %v2356_v1 }
 0x585   : > { %5859 = vrcp.f32 %v2375_v35  ;;  %v2378_v6 = vpop.xlane.xlu1 %2377  ;;  %v5576_v35 = vld [vmem:[%s6436_s12 + $0x10] ss:$8 sps:$4 sm:$0xff]  }
 0x586   : > { %v5850_v52 = vpop.eup %5849  ;;  %5861 = vpow2.f32 %v2371_v10  ;;  %v5582_v10 = vld [vmem:[%s6436_s12 + $0x30] ss:$8 sps:$4 sm:$0xff]  }
 0x587   : > { %5863 = vrcp.f32 %v2378_v6  ;;  %v2379_v47 = vsel %vm1876_vm1, %v5850_v52, 0.0  ;;  %v5587_v6 = vld [vmem:[%s6436_s12 + $0x44] ss:$8 sps:$4 sm:$0xff]  }
 0x588   : > { %v5852_v48 = vpop.eup %5851  ;;  %2380 = vadd.xlane.f32.xlu0 %v2379_v47  ;;  %v5590_v47 = vld [vmem:[%s6436_s12 + $0x54] ss:$8 sps:$4 sm:$0xff]  }
 0x589   : > { %v2382_v45 = vsel %vm1876_vm1, %v5852_v48, 0.0 }
 0x58a   : > { %v5854_v53 = vpop.eup %5853  ;;  %2383 = vadd.xlane.f32.xlu1 %v2382_v45  ;;  %v5593_v45 = vld [vmem:[%s6436_s12 + $0x64] ss:$8 sps:$4 sm:$0xff]  }
 0x58b   : > { %v2385_v55 = vsel %vm1876_vm1, %v5854_v53, 0.0 }
 0x58c   : > { %v5856_v57 = vpop.eup %5855  ;;  %2386 = vadd.xlane.f32.xlu0 %v2385_v55  ;;  %v5596_v55 = vld [vmem:[%s6436_s12 + $0x74] ss:$8 sps:$4 sm:$0xff]  }
 0x58d   : > { %v2388_v39 = vsel %vm1876_vm1, %v5856_v57, 0.0 }
 0x58e   : > { %v5858_v60 = vpop.eup %5857  ;;  %2389 = vadd.xlane.f32.xlu1 %v2388_v39  ;;  %v5599_v39 = vld [vmem:[%s6436_s12 + $0x84] ss:$8 sps:$4 sm:$0xff]  }
 0x58f   : > { %v5860_v49 = vpop.eup %5859  ;;  %v2391_v37 = vsel %vm1876_vm1, %v5858_v60, 0.0 }
 0x590   : > { %v5862_v4 = vpop.eup %5861  ;;  %2392 = vadd.xlane.f32.xlu0 %v2391_v37  ;;  %v2405_v59 = vmul.f32 %v5860_v49, %v5846_v17  ;;  %v5602_v49 = vld [vmem:[%s6436_s12 + $0x94] ss:$8 sps:$4 sm:$0xff]   ;;  %v5600_v37 = vld [vmem:[%s6436_s12 + $0x90] ss:$8 sps:$4 sm:$0xff]  }
 0x591   : > { %v5864_v54 = vpop.eup %5863  ;;  %v2394_v9 = vsel %vm1876_vm1, %v5862_v4, 0.0 }
 0x592   : > { %v2406_v36 = vmul.f32 %v5864_v54, %v5848_v2  ;;  %2395 = vadd.xlane.f32.xlu1 %v2394_v9  ;;  %v5603_v54 = vld [vmem:[%s6436_s12 + $0xa0] ss:$8 sps:$4 sm:$0xff]   ;;  %v5608_v9 = vld [vmem:[%s6436_s12 + $0xb4] ss:$8 sps:$4 sm:$0xff]  }
 0x594   : > { %v2413_v7 = vpack.c.bf16 %v2406_v36, %v2405_v59  ;;  %v5606_v59 = vld [vmem:[%s6436_s12 + $0xb0] ss:$8 sps:$4 sm:$0xff]   ;;  %v5611_v36 = vld [vmem:[%s6436_s12 + $0xc4] ss:$8 sps:$4 sm:$0xff]  }
 0x596   : > { %5245 = vmatmul.mubr.msk.bf16.vlgmr.msra.gmra.mrb[40].mxu0 %vm1876_vm1, %v2413_v7  ;;  %v5609_v7 = vld [vmem:[%s6436_s12 + $0xc0] ss:$8 sps:$4 sm:$0xff]  }
 0x597   : > { %5255 = vmatpush3.bf16.msra.mxu0 %v1701_v25  ;;  %5256 = vmatprep.mubr.msk.bf16.mxu0 %vm6138_vm0, %v6137_v56 }
 0x598   : > { %2820 = vmatprep.subr.bf16.mxu0 %v5575_v15  ;;  %v5614_v15 = vld [vmem:[%s6436_s12 + $0xd4] ss:$8 sps:$4 sm:$0xff]  }
 0x615   : > { %v2381_v20 = vpop.xlane.xlu0 %2380 }
 0x616   : > { %5865 = vrcp.f32 %v2381_v20  ;;  %v5612_v20 = vld [vmem:[%s6436_s12 + $0xd0] ss:$8 sps:$4 sm:$0xff]  }
 0x617   : > { %v2384_v24 = vpop.xlane.xlu1 %2383 }
 0x618   : > { %5867 = vrcp.f32 %v2384_v24  ;;  %v5617_v24 = vld [vmem:[%s6436_s12 + $0xe4] ss:$8 sps:$4 sm:$0xff]  }
 0x619   : > { %v2387_v38 = vpop.xlane.xlu0 %2386 }
 0x61a   : > { %5869 = vrcp.f32 %v2387_v38  ;;  %v5615_v38 = vld [vmem:[%s6436_s12 + $0xe0] ss:$8 sps:$4 sm:$0xff]  }
 0x61b   : > { %v2390_v17 = vpop.xlane.xlu1 %2389 }
 0x61c   : > { %5871 = vrcp.f32 %v2390_v17  ;;  %v5620_v17 = vld [vmem:[%s6436_s12 + $0xf4] ss:$8 sps:$4 sm:$0xff]  }
 0x61d   : > { %v2393_v2 = vpop.xlane.xlu0 %2392 }
 0x61e   : > { %5873 = vrcp.f32 %v2393_v2  ;;  %v5618_v2 = vld [vmem:[%s6436_s12 + $0xf0] ss:$8 sps:$4 sm:$0xff]  }
 0x61f   : > { %v2396_v46 = vpop.xlane.xlu1 %2395 }
 0x620   : > { %v5866_v19 = vpop.eup %5865  ;;  %5875 = vrcp.f32 %v2396_v46 }
 0x621   : > { %v2407_v21 = vmul.f32 %v5866_v19, %v5850_v52  ;;  %v5585_v52 = vld [vmem:[%s6436_s12 + $0x40] ss:$8 sps:$4 sm:$0xff]  }
 0x622   : > { %v5868_v16 = vpop.eup %5867 }
 0x623   : > { %v2408_v25 = vmul.f32 %v5868_v16, %v5852_v48  ;;  %v5588_v48 = vld [vmem:[%s6436_s12 + $0x50] ss:$8 sps:$4 sm:$0xff]  }
 0x624   : > { %v5870_v32 = vpop.eup %5869 }
 0x625   : > { %v2414_v34 = vpack.c.bf16 %v2408_v25, %v2407_v21  ;;  %v2409_v22 = vmul.f32 %v5870_v32, %v5854_v53  ;;  %v5591_v53 = vld [vmem:[%s6436_s12 + $0x60] ss:$8 sps:$4 sm:$0xff]  }
 0x626   : > { %v5872_v18 = vpop.eup %5871 }
 0x627   : > { %v2410_v30 = vmul.f32 %v5872_v18, %v5856_v57  ;;  %5251 = vmatmul.mubr.msk.bf16.vlgmr.msra.gmra.mrb[56].mxu1 %vm1876_vm1, %v2414_v34  ;;  %v5594_v57 = vld [vmem:[%s6436_s12 + $0x70] ss:$8 sps:$4 sm:$0xff]  }
 0x628   : > { %v5874_v40 = vpop.eup %5873  ;;  %5261 = vmatpush3.bf16.msra.mxu1 %v1703_v5  ;;  %5262 = vmatprep.mubr.msk.bf16.mxu1 %vm6138_vm0, %v6137_v56  ;;  %v5579_v56 = vld [vmem:[%s6436_s12 + $0x20] ss:$8 sps:$4 sm:$0xff]   ;;  %v5584_v5 = vld [vmem:[%s6436_s12 + $0x34] ss:$8 sps:$4 sm:$0xff]  }
 0x629   : > { %v2415_v3 = vpack.c.bf16 %v2410_v30, %v2409_v22  ;;  %v2411_v13 = vmul.f32 %v5874_v40, %v5858_v60  ;;  %v5597_v60 = vld [vmem:[%s6436_s12 + $0x80] ss:$8 sps:$4 sm:$0xff]  }
 0x62a   : > { %v5876_v44 = vpop.eup %5875 }
 0x62b   : > { %v2412_v1 = vmul.f32 %v5876_v44, %v5862_v4  ;;  %5257 = vmatmul.mubr.msk.bf16.vlgmr.msra.gmra.mrb[44].mxu0 %vm1876_vm1, %v2415_v3  ;;  %v5605_v4 = vld [vmem:[%s6436_s12 + $0xa4] ss:$8 sps:$4 sm:$0xff]  }
 0x62c   : > { %2821 = vmatpush1.bf16.msra.mxu0 %v5573_v42 }
 0x62d   : > { %v2416_v23 = vpack.c.bf16 %v2412_v1, %v2411_v13  ;;  %2822 = vmatprep.subr.bf16.mxu0 %v5578_v12 }
 0x62f   : > { %5263 = vmatmul.mubr.msk.bf16.vlgmr.msra.gmra.mrb[60].mxu1 %vm1876_vm1, %v2416_v23 }
 0x630   : > { %2823 = vmatpush1.bf16.msra.mxu0 %v5576_v35  ;;  %v2649_v35 = vrot.slane %v776_v26, %v6654_v63 }
 0x631   : > { %2824 = vmatprep.subr.bf16.mxu0 %v5581_v29 }
 0x632   : > { %v6985_v33 = vrot.slane %v2649_v35, %v6657_v0 }
 0x634   : > { %2825 = vmatpush1.bf16.msra.mxu0 %v5579_v56  ;;  %v5910_v56 = vld [vmem:[#allocation11 + $0x8] sm:$0xff] }
 0x635   : > { %2826 = vmatprep.subr.bf16.mxu0 %v5584_v5  ;;  %v2895_v5 = vunpack.c.l.bf16 %v5910_v56 }
 0x638   : > { %2827 = vmatpush1.bf16.msra.mxu0 %v5582_v10 }
 0x639   : > { %2828 = vmatprep.subr.bf16.mxu0 %v5587_v6 }
 0x63c   : > { %2829 = vmatpush1.bf16.msra.mxu0 %v5585_v52  ;;  %v2896_v52 = vunpack.c.h.bf16 %v5910_v56 }
 0x63d   : > { %2830 = vmatprep.subr.bf16.mxu0 %v5590_v47 }
 0x640   : > { %2831 = vmatpush1.bf16.msra.mxu0 %v5588_v48 }
 0x641   : > { %2832 = vmatprep.subr.bf16.mxu0 %v5593_v45 }
 0x644   : > { %2833 = vmatpush1.bf16.msra.mxu0 %v5591_v53 }
 0x645   : > { %2834 = vmatprep.subr.bf16.mxu0 %v5596_v55 }
 0x648   : > { %2835 = vmatpush1.bf16.msra.mxu0 %v5594_v57 }
 0x649   : > { %2836 = vmatprep.subr.bf16.mxu0 %v5599_v39 }
 0x64c   : > { %2837 = vmatpush1.bf16.msra.mxu0 %v5597_v60 }
 0x64d   : > { %2838 = vmatprep.subr.bf16.mxu0 %v5602_v49 }
 0x650   : > { %2839 = vmatpush1.bf16.msra.mxu0 %v5600_v37  ;;  %v5621_v37 = vld [vmem:[%s6442_s23] ss:$16 sps:$4 sm:$0xff]  }
 0x651   : > { %2840 = vmatprep.subr.bf16.mxu0 %v5605_v4  ;;  %v5623_v4 = vld [vmem:[%s6442_s23 + $0x4] ss:$16 sps:$4 sm:$0xff]  }
 0x652   : > { %3553 = vmatprep.subr.bf16.mxu1 %v5623_v4 }
 0x653   : > { %3554 = vmatpush1.bf16.msra.mxu1 %v5621_v37 }
 0x654   : > { %2841 = vmatpush1.bf16.msra.mxu0 %v5603_v54  ;;  %v5624_v54 = vld [vmem:[%s6442_s23 + $0x8] ss:$16 sps:$4 sm:$0xff]  }
 0x655   : > { %2842 = vmatprep.subr.bf16.mxu0 %v5608_v9  ;;  %v5626_v9 = vld [vmem:[%s6442_s23 + $0xc] ss:$16 sps:$4 sm:$0xff]  }
 0x658   : > { %2843 = vmatpush1.bf16.msra.mxu0 %v5606_v59  ;;  %v5629_v59 = vld [vmem:[%s6442_s23 + $0x24] ss:$16 sps:$4 sm:$0xff]  }
 0x659   : > { %2844 = vmatprep.subr.bf16.mxu0 %v5611_v36  ;;  %v5632_v36 = vld [vmem:[%s6442_s23 + $0x2c] ss:$16 sps:$4 sm:$0xff]   ;;  %3555 = vmatprep.subr.bf16.mxu1 %v5629_v59 }
 0x65c   : > { %2845 = vmatpush1.bf16.msra.mxu0 %v5609_v7  ;;  %v5627_v7 = vld [vmem:[%s6442_s23 + $0x20] ss:$16 sps:$4 sm:$0xff]  }
 0x65d   : > { %2846 = vmatprep.subr.bf16.mxu0 %v5614_v15  ;;  %v5630_v15 = vld [vmem:[%s6442_s23 + $0x28] ss:$16 sps:$4 sm:$0xff]   ;;  %3556 = vmatpush1.bf16.msra.mxu1 %v5627_v7 }
 0x660   : > { %2847 = vmatpush1.bf16.msra.mxu0 %v5612_v20  ;;  %v5635_v20 = vld [vmem:[%s6442_s23 + $0x44] ss:$16 sps:$4 sm:$0xff]  }
 0x661   : > { %2848 = vmatprep.subr.bf16.mxu0 %v5617_v24  ;;  %v5638_v24 = vld [vmem:[%s6442_s23 + $0x4c] ss:$16 sps:$4 sm:$0xff]   ;;  %3557 = vmatprep.subr.bf16.mxu1 %v5635_v20 }
 0x664   : > { %2849 = vmatpush1.bf16.msra.mxu0 %v5615_v38  ;;  %v5633_v38 = vld [vmem:[%s6442_s23 + $0x40] ss:$16 sps:$4 sm:$0xff]  }
 0x665   : > { %2850 = vmatprep.subr.bf16.mxu0 %v5620_v17  ;;  %v5636_v17 = vld [vmem:[%s6442_s23 + $0x48] ss:$16 sps:$4 sm:$0xff]   ;;  %3558 = vmatpush1.bf16.msra.mxu1 %v5633_v38 }
 0x668   : > { %2851 = vmatpush1.bf16.msra.mxu0 %v5618_v2  ;;  %v5641_v2 = vld [vmem:[%s6442_s23 + $0x64] ss:$16 sps:$4 sm:$0xff]  }
 0x669   : > { %v2454_v46 = vpop.f32.mrb[40].mxu0  ;;  %3626 = vmatprep.subr.bf16.mxu0 %v5626_v9  ;;  %3559 = vmatprep.subr.bf16.mxu1 %v5641_v2 }
 0x66a   : > { %v5246_v19 = vpop.f32.mrb[41].mxu0 }
 0x66b   : > { %v2457_v16 = vpop.f32.mrb[42].mxu0  ;;  %v5639_v19 = vld [vmem:[%s6442_s23 + $0x60] ss:$16 sps:$4 sm:$0xff]  }
 0x66c   : > { %v2593_v21 = vpack.c.bf16 %v2457_v16, %v2454_v46  ;;  %v5247_v25 = vpop.f32.mrb[43].mxu0  ;;  %v5644_v46 = vld [vmem:[%s6442_s23 + $0x6c] ss:$16 sps:$4 sm:$0xff]   ;;  %v5642_v16 = vld [vmem:[%s6442_s23 + $0x68] ss:$16 sps:$4 sm:$0xff]   ;;  %3560 = vmatpush1.bf16.msra.mxu1 %v5639_v19 }
 0x66d   : > { %v5650_v25 = vld [vmem:[%s6442_s23 + $0x8c] ss:$16 sps:$4 sm:$0xff]  }
 0x66e   : > { %2852 = vmatprep.mubr.bf16.mxu0 %v2593_v21  ;;  %v5647_v21 = vld [vmem:[%s6442_s23 + $0x84] ss:$16 sps:$4 sm:$0xff]  }
 0x66f   : > { %2853 = vmatmul.mubr.bf16.vlgmr.msra.gmra.mrb[48].mxu0 %v2145_v43  ;;  %3561 = vmatprep.subr.bf16.mxu1 %v5647_v21 }
 0x670   : > { %3627 = vmatpush1.bf16.msra.mxu0 %v5624_v54 }
 0x671   : > { %3628 = vmatprep.subr.bf16.mxu0 %v5632_v36 }
 0x674   : > { %3629 = vmatpush1.bf16.msra.mxu0 %v5630_v15 }
 0x675   : > { %3630 = vmatprep.subr.bf16.mxu0 %v5638_v24  ;;  %v5915_v24 = vld [vmem:[#allocation11 + $0x30] sm:$0xff] }
 0x676   : > { %v2905_v38 = vunpack.c.l.bf16 %v5915_v24 }
 0x678   : > { %3631 = vmatpush1.bf16.msra.mxu0 %v5636_v17 }
 0x679   : > { %3632 = vmatprep.subr.bf16.mxu0 %v5644_v46  ;;  %v2906_v46 = vunpack.c.h.bf16 %v5915_v24  ;;  %v5678_v24 = vld [vmem:[%s6442_s23 + $0x128] ss:$16 sps:$4 sm:$0xff]  }
 0x67c   : > { %3633 = vmatpush1.bf16.msra.mxu0 %v5642_v16 }
 0x67d   : > { %3634 = vmatprep.subr.bf16.mxu0 %v5650_v25  ;;  %v5916_v25 = vld [vmem:[#allocation11 + $0x38] sm:$0xff] }
 0x6fa   : > { %v2498_v32 = vpop.f32.mrb[56].mxu1 }
 0x6fb   : > { %v5252_v34 = vpop.f32.mrb[57].mxu1 }
 0x6fc   : > { %v2501_v18 = vpop.f32.mrb[58].mxu1  ;;  %v5648_v34 = vld [vmem:[%s6442_s23 + $0x88] ss:$16 sps:$4 sm:$0xff]  }
 0x6fd   : > { %v2594_v22 = vpack.c.bf16 %v2501_v18, %v2498_v32  ;;  %v5253_v30 = vpop.f32.mrb[59].mxu1  ;;  %v5645_v32 = vld [vmem:[%s6442_s23 + $0x80] ss:$16 sps:$4 sm:$0xff]   ;;  %3635 = vmatpush1.bf16.msra.mxu0 %v5648_v34 }
 0x6fe   : > { %v2542_v40 = vpop.f32.mrb[44].mxu0  ;;  %3562 = vmatpush1.bf16.msra.mxu1 %v5645_v32  ;;  %v5911_v18 = vld [vmem:[#allocation11 + $0x10] sm:$0xff]  ;;  %v2907_v32 = vunpack.c.l.bf16 %v5916_v25 }
 0x6ff   : > { %v5258_v42 = vpop.f32.mrb[45].mxu0  ;;  %2862 = vmatprep.mubr.bf16.mxu0 %v2594_v22  ;;  %v2897_v22 = vunpack.c.l.bf16 %v5911_v18 }
 0x700   : > { %v2545_v3 = vpop.f32.mrb[46].mxu0  ;;  %2863 = vmatmul.mubr.bf16.gmra.mrb[52].mxu0 %v2146_v28  ;;  %v2645_v28 = vrot.slane %v776_v26, %v6657_v0 }
 0x701   : > { %v2595_v12 = vpack.c.bf16 %v2545_v3, %v2542_v40  ;;  %v5259_v44 = vpop.f32.mrb[47].mxu0  ;;  %v2898_v40 = vunpack.c.h.bf16 %v5911_v18 }
 0x702   : > { %v2586_v13 = vpop.f32.mrb[60].mxu1  ;;  %v6982_v23 = vrot.slane %v2645_v28, %v6657_v0 }
 0x703   : > { %v5264_v1 = vpop.f32.mrb[61].mxu1  ;;  %2872 = vmatprep.mubr.bf16.mxu0 %v2595_v12  ;;  %v5912_v12 = vld [vmem:[#allocation11 + $0x18] sm:$0xff] }
 0x704   : > { %v2589_v31 = vpop.f32.mrb[62].mxu1  ;;  %v2899_v44 = vunpack.c.l.bf16 %v5912_v12 }
 0x705   : > { %v2596_v41 = vpack.c.bf16 %v2589_v31, %v2586_v13  ;;  %v5265_v43 = vpop.f32.mrb[63].mxu1  ;;  %v2900_v31 = vunpack.c.h.bf16 %v5912_v12 }
 0x708   : > { %2873 = vmatmul.mubr.bf16.gmra.mrb[56].mxu0 %v2147_v14  ;;  %v2893_v14 = vunpack.c.l.bf16 %v5909_v11 }
 0x709   : > { %2882 = vmatprep.mubr.bf16.mxu0 %v2596_v41 }
 0x710   : > { %2883 = vmatmul.mubr.bf16.gmra.mrb[60].mxu0 %v2148_v8 }
 0x742   : > { %v2854_v27 = vpop.f32.mrb[48].mxu0 }
 0x743   : > { %v2855_v8 = vadd.f32 %v2854_v27, %v6982_v23  ;;  %v2856_v29 = vpop.f32.mrb[49].mxu0  ;;  %v5913_v27 = vld [vmem:[#allocation11 + $0x20] sm:$0xff] }
 0x744   : > { %v2857_v10 = vadd.f32 %v2856_v29, %v6985_v33  ;;  %v2858_v6 = vpop.f32.mrb[50].mxu0  ;;  %v2902_v29 = vunpack.c.h.bf16 %v5913_v27 }
 0x745   : > { %v6989_v47 = vadd.f32 %v2893_v14, %v2855_v8  ;;  %v2859_v48 = vadd.f32 %v2858_v6, %v6982_v23  ;;  %v2860_v45 = vpop.f32.mrb[51].mxu0  ;;  %v5914_v6 = vld [vmem:[#allocation11 + $0x28] sm:$0xff] }
 0x746   : > { %v6992_v53 = vadd.f32 %v2894_v50, %v2857_v10  ;;  %v2861_v55 = vadd.f32 %v2860_v45, %v6985_v33  ;;  %v2901_v50 = vunpack.c.l.bf16 %v5913_v27  ;;  %v5651_v27 = vld [vmem:[%s6442_s23 + $0xa0] ss:$16 sps:$4 sm:$0xff]  }
 0x747   : > { %v6995_v57 = vadd.f32 %v2895_v5, %v2859_v48 }
 0x748   : > { %v6997_v39 = vadd.f32 %v2896_v52, %v2861_v55  ;;  %v2925_v60 = vadd.f32 %v6992_v53, %v6989_v47  ;;  %v2903_v52 = vunpack.c.l.bf16 %v5914_v6  ;;  %v2904_v55 = vunpack.c.h.bf16 %v5914_v6  ;;  %v5660_v6 = vld [vmem:[%s6442_s23 + $0xc8] ss:$16 sps:$4 sm:$0xff]  }
 0x74a   : > { %2926 = vadd.xlane.f32.xlu0 %v2925_v60  ;;  %v2928_v49 = vadd.f32 %v6997_v39, %v6995_v57 }
 0x74c   : > { %2929 = vadd.xlane.f32.xlu1 %v2928_v49 }
 0x7d3   : > { %v2864_v30 = vpop.f32.mrb[52].mxu0 }
 0x7d4   : > { %v2865_v42 = vadd.f32 %v2864_v30, %v6982_v23  ;;  %v2866_v3 = vpop.f32.mrb[53].mxu0 }
 0x7d5   : > { %v2867_v13 = vadd.f32 %v2866_v3, %v6985_v33  ;;  %v2868_v1 = vpop.f32.mrb[54].mxu0 }
 0x7d6   : > { %v7025_v41 = vadd.f32 %v2897_v22, %v2865_v42  ;;  %v2869_v43 = vadd.f32 %v2868_v1, %v6982_v23  ;;  %v2870_v51 = vpop.f32.mrb[55].mxu0 }
 0x7d7   : > { %v7028_v26 = vadd.f32 %v2898_v40, %v2867_v13  ;;  %v2871_v28 = vadd.f32 %v2870_v51, %v6985_v33  ;;  %v2927_v60 = vpop.xlane.xlu0 %2926  ;;  %v2908_v40 = vunpack.c.h.bf16 %v5916_v25  ;;  %v5690_v25 = vld [vmem:[%s6442_s23 + $0x168] ss:$16 sps:$4 sm:$0xff]  }
 0x7d8   : > { %v7031_v35 = vadd.f32 %v2899_v44, %v2869_v43  ;;  %v2950_v7 = vmul.f32 0.00390625, %v2927_v60  ;;  %v5671_v60 = vld [vmem:[%s6442_s23 + $0x104] ss:$16 sps:$4 sm:$0xff]  }
 0x7d9   : > { %v7033_v11 = vadd.f32 %v2900_v31, %v2871_v28  ;;  %v2931_v14 = vadd.f32 %v7028_v26, %v7025_v41  ;;  %v2930_v59 = vpop.xlane.xlu1 %2929  ;;  %v5653_v28 = vld [vmem:[%s6442_s23 + $0xa4] ss:$16 sps:$4 sm:$0xff]  }
 0x7da   : > { %v2951_v17 = vmul.f32 0.00390625, %v2930_v59  ;;  %v7057_v34 = vsub.f32 %v6989_v47, %v2950_v7  ;;  %v7060_v18 = vsub.f32 %v6992_v53, %v2950_v7  ;;  %3563 = vmatprep.subr.bf16.mxu1 %v5653_v28  ;;  %v5677_v59 = vld [vmem:[%s6442_s23 + $0x124] ss:$16 sps:$4 sm:$0xff]   ;;  %v5680_v7 = vld [vmem:[%s6442_s23 + $0x12c] ss:$16 sps:$4 sm:$0xff]  }
 0x7db   : > { %v2874_v8 = vpop.f32.mrb[56].mxu0  ;;  %2932 = vadd.xlane.f32.xlu0 %v2931_v14  ;;  %v2934_v56 = vadd.f32 %v7033_v11, %v7031_v35  ;;  %v5656_v14 = vld [vmem:[%s6442_s23 + $0xac] ss:$16 sps:$4 sm:$0xff]   ;;  %3564 = vmatpush1.bf16.msra.mxu1 %v5651_v27  ;;  %v5714_v27 = vld [vmem:[%s6442_s23 + $0x1e8] ss:$16 sps:$4 sm:$0xff]  }
 0x7dc   : > { %v2875_v5 = vadd.f32 %v2874_v8, %v6982_v23  ;;  %v2876_v10 = vpop.f32.mrb[57].mxu0  ;;  %v7067_v44 = vsub.f32 %v6995_v57, %v2951_v17  ;;  %v7070_v47 = vsub.f32 %v6997_v39, %v2951_v17  ;;  %v2974_v57 = vmul.f32 %v7057_v34, %v7057_v34  ;;  %3636 = vmatprep.subr.bf16.mxu0 %v5656_v14  ;;  %v5686_v17 = vld [vmem:[%s6442_s23 + $0x14c] ss:$16 sps:$4 sm:$0xff]   ;;  %v5711_v14 = vld [vmem:[%s6442_s23 + $0x1e0] ss:$16 sps:$4 sm:$0xff]  }
 0x7dd   : > { %v2877_v48 = vadd.f32 %v2876_v10, %v6985_v33  ;;  %v2878_v45 = vpop.f32.mrb[58].mxu0  ;;  %2935 = vadd.xlane.f32.xlu1 %v2934_v56  ;;  %v2975_v39 = vmul.f32 %v7060_v18, %v7060_v18  ;;  %v5657_v56 = vld [vmem:[%s6442_s23 + $0xc0] ss:$16 sps:$4 sm:$0xff]   ;;  %v5716_v28 = vld [vmem:[%s6442_s23 + $0x1ec] ss:$16 sps:$4 sm:$0xff]  }
 0x7de   : > { %v7041_v49 = vadd.f32 %v2901_v50, %v2875_v5  ;;  %v2879_v37 = vadd.f32 %v2878_v45, %v6982_v23  ;;  %v2880_v4 = vpop.f32.mrb[59].mxu0  ;;  %v2976_v43 = vmul.f32 %v7067_v44, %v7067_v44  ;;  %v2977_v51 = vmul.f32 %v7070_v47, %v7070_v47  ;;  %v5654_v50 = vld [vmem:[%s6442_s23 + $0xa8] ss:$16 sps:$4 sm:$0xff]   ;;  %v5662_v5 = vld [vmem:[%s6442_s23 + $0xcc] ss:$16 sps:$4 sm:$0xff]  }
 0x7df   : > { %v7044_v54 = vadd.f32 %v2902_v29, %v2877_v48  ;;  %v2881_v9 = vadd.f32 %v2880_v4, %v6985_v33  ;;  %v2990_v8 = vadd.f32 %v2975_v39, %v2974_v57  ;;  %v5659_v29 = vld [vmem:[%s6442_s23 + $0xc4] ss:$16 sps:$4 sm:$0xff]   ;;  %3637 = vmatpush1.bf16.msra.mxu0 %v5654_v50  ;;  %v5668_v48 = vld [vmem:[%s6442_s23 + $0xec] ss:$16 sps:$4 sm:$0xff]   ;;  %v5663_v45 = vld [vmem:[%s6442_s23 + $0xe0] ss:$16 sps:$4 sm:$0xff]  }
 0x7e0   : > { %v7047_v36 = vadd.f32 %v2903_v52, %v2879_v37  ;;  %v2993_v10 = vadd.f32 %v2977_v51, %v2976_v43  ;;  %3565 = vmatprep.subr.bf16.mxu1 %v5659_v29  ;;  %3638 = vmatprep.subr.bf16.mxu0 %v5662_v5  ;;  %v5665_v52 = vld [vmem:[%s6442_s23 + $0xe4] ss:$16 sps:$4 sm:$0xff]   ;;  %v5669_v37 = vld [vmem:[%s6442_s23 + $0x100] ss:$16 sps:$4 sm:$0xff]   ;;  %v5674_v4 = vld [vmem:[%s6442_s23 + $0x10c] ss:$16 sps:$4 sm:$0xff]  }
 0x7e1   : > { %v7049_v15 = vadd.f32 %v2904_v55, %v2881_v9  ;;  %v2937_v20 = vadd.f32 %v7044_v54, %v7041_v49  ;;  %3566 = vmatpush1.bf16.msra.mxu1 %v5657_v56  ;;  %v5666_v55 = vld [vmem:[%s6442_s23 + $0xe8] ss:$16 sps:$4 sm:$0xff]   ;;  %v5705_v57 = vld [vmem:[%s6442_s23 + $0x1c0] ss:$16 sps:$4 sm:$0xff]   ;;  %v5707_v39 = vld [vmem:[%s6442_s23 + $0x1c4] ss:$16 sps:$4 sm:$0xff]  }
 0x7e2   : > { %3567 = vmatprep.subr.bf16.mxu1 %v5665_v52  ;;  %v5672_v9 = vld [vmem:[%s6442_s23 + $0x108] ss:$16 sps:$4 sm:$0xff]   ;;  %v5710_v43 = vld [vmem:[%s6442_s23 + $0x1cc] ss:$16 sps:$4 sm:$0xff]   ;;  %v5713_v51 = vld [vmem:[%s6442_s23 + $0x1e4] ss:$16 sps:$4 sm:$0xff]  }
 0x7e3   : > { %2938 = vadd.xlane.f32.xlu0 %v2937_v20  ;;  %v2884_v2 = vpop.f32.mrb[60].mxu0  ;;  %v2940_v19 = vadd.f32 %v7049_v15, %v7047_v36  ;;  %3639 = vmatpush1.bf16.msra.mxu0 %v5660_v6  ;;  %v5675_v20 = vld [vmem:[%s6442_s23 + $0x120] ss:$16 sps:$4 sm:$0xff]  }
 0x7e4   : > { %v2885_v16 = vadd.f32 %v2884_v2, %v6982_v23  ;;  %v2886_v21 = vpop.f32.mrb[61].mxu0  ;;  %3640 = vmatprep.subr.bf16.mxu0 %v5668_v48  ;;  %v5681_v2 = vld [vmem:[%s6442_s23 + $0x140] ss:$16 sps:$4 sm:$0xff]  }
 0x7e5   : > { %v2887_v22 = vadd.f32 %v2886_v21, %v6985_v33  ;;  %2941 = vadd.xlane.f32.xlu1 %v2940_v19  ;;  %v2888_v30 = vpop.f32.mrb[62].mxu0  ;;  %3568 = vmatpush1.bf16.msra.mxu1 %v5663_v45  ;;  %v5689_v19 = vld [vmem:[%s6442_s23 + $0x164] ss:$16 sps:$4 sm:$0xff]   ;;  %v5687_v21 = vld [vmem:[%s6442_s23 + $0x160] ss:$16 sps:$4 sm:$0xff]  }
 0x7e6   : > { %v7063_v42 = vadd.f32 %v2905_v38, %v2885_v16  ;;  %v2889_v3 = vadd.f32 %v2888_v30, %v6982_v23  ;;  %v2890_v12 = vpop.f32.mrb[63].mxu0  ;;  %3569 = vmatprep.subr.bf16.mxu1 %v5671_v60  ;;  %v5683_v38 = vld [vmem:[%s6442_s23 + $0x144] ss:$16 sps:$4 sm:$0xff]   ;;  %v5692_v16 = vld [vmem:[%s6442_s23 + $0x16c] ss:$16 sps:$4 sm:$0xff]  }
 0x7e7   : > { %v7072_v53 = vadd.f32 %v2906_v46, %v2887_v22  ;;  %v2891_v13 = vadd.f32 %v2890_v12, %v6985_v33  ;;  %3641 = vmatpush1.bf16.msra.mxu0 %v5666_v55  ;;  %v5684_v46 = vld [vmem:[%s6442_s23 + $0x148] ss:$16 sps:$4 sm:$0xff]   ;;  %v5698_v22 = vld [vmem:[%s6442_s23 + $0x18c] ss:$16 sps:$4 sm:$0xff]   ;;  %v5693_v30 = vld [vmem:[%s6442_s23 + $0x180] ss:$16 sps:$4 sm:$0xff]  }
 0x7e8   : > { %v7075_v1 = vadd.f32 %v2907_v32, %v2889_v3  ;;  %3642 = vmatprep.subr.bf16.mxu0 %v5674_v4  ;;  %v5695_v32 = vld [vmem:[%s6442_s23 + $0x184] ss:$16 sps:$4 sm:$0xff]   ;;  %v5704_v12 = vld [vmem:[%s6442_s23 + $0x1ac] ss:$16 sps:$4 sm:$0xff]  }
 0x7e9   : > { %v7077_v31 = vadd.f32 %v2908_v40, %v2891_v13  ;;  %v2943_v23 = vadd.f32 %v7072_v53, %v7063_v42  ;;  %3570 = vmatpush1.bf16.msra.mxu1 %v5669_v37  ;;  %v5696_v40 = vld [vmem:[%s6442_s23 + $0x188] ss:$16 sps:$4 sm:$0xff]   ;;  %v5701_v3 = vld [vmem:[%s6442_s23 + $0x1a4] ss:$16 sps:$4 sm:$0xff]   ;;  %v5699_v13 = vld [vmem:[%s6442_s23 + $0x1a0] ss:$16 sps:$4 sm:$0xff]  }
 0x7ea   : > { %3571 = vmatprep.subr.bf16.mxu1 %v5677_v59 }
 0x7eb   : > { %2944 = vadd.xlane.f32.xlu0 %v2943_v23  ;;  %v2946_v33 = vadd.f32 %v7077_v31, %v7075_v1  ;;  %3643 = vmatpush1.bf16.msra.mxu0 %v5672_v9  ;;  %v5702_v23 = vld [vmem:[%s6442_s23 + $0x1a8] ss:$16 sps:$4 sm:$0xff]  }
 0x7ec   : > { %3644 = vmatprep.subr.bf16.mxu0 %v5680_v7 }
 0x7ed   : > { %2947 = vadd.xlane.f32.xlu1 %v2946_v33  ;;  %3572 = vmatpush1.bf16.msra.mxu1 %v5675_v20  ;;  %v5708_v33 = vld [vmem:[%s6442_s23 + $0x1c8] ss:$16 sps:$4 sm:$0xff]  }
 0x7ee   : > { %3573 = vmatprep.subr.bf16.mxu1 %v5683_v38 }
 0x7ef   : > { %2991 = vadd.xlane.f32.xlu0 %v2990_v8  ;;  %3645 = vmatpush1.bf16.msra.mxu0 %v5678_v24 }
 0x7f0   : > { %3646 = vmatprep.subr.bf16.mxu0 %v5686_v17 }
 0x7f1   : > { %2994 = vadd.xlane.f32.xlu1 %v2993_v10  ;;  %3574 = vmatpush1.bf16.msra.mxu1 %v5681_v2 }
 0x7f2   : > { %3575 = vmatprep.subr.bf16.mxu1 %v5689_v19 }
 0x7f3   : > { %3647 = vmatpush1.bf16.msra.mxu0 %v5684_v46 }
 0x7f4   : > { %3648 = vmatprep.subr.bf16.mxu0 %v5692_v16 }
 0x7f5   : > { %3576 = vmatpush1.bf16.msra.mxu1 %v5687_v21 }
 0x7f6   : > { %3577 = vmatprep.subr.bf16.mxu1 %v5695_v32 }
 0x7f7   : > { %3649 = vmatpush1.bf16.msra.mxu0 %v5690_v25 }
 0x7f8   : > { %3650 = vmatprep.subr.bf16.mxu0 %v5698_v22 }
 0x7f9   : > { %3578 = vmatpush1.bf16.msra.mxu1 %v5693_v30 }
 0x7fa   : > { %3579 = vmatprep.subr.bf16.mxu1 %v5701_v3 }
 0x7fb   : > { %3651 = vmatpush1.bf16.msra.mxu0 %v5696_v40 }
 0x7fc   : > { %3652 = vmatprep.subr.bf16.mxu0 %v5704_v12 }
 0x7fd   : > { %3580 = vmatpush1.bf16.msra.mxu1 %v5699_v13 }
 0x7fe   : > { %3581 = vmatprep.subr.bf16.mxu1 %v5707_v39 }
 0x7ff   : > { %3653 = vmatpush1.bf16.msra.mxu0 %v5702_v23 }
 0x800   : > { %3654 = vmatprep.subr.bf16.mxu0 %v5710_v43  ;;  %v779_v43 = vld [vmem:[%s725_s22] sm:$0x3] }
 0x801   : > { %3582 = vmatpush1.bf16.msra.mxu1 %v5705_v57 }
 0x802   : > { %3583 = vmatprep.subr.bf16.mxu1 %v5713_v51  ;;  %v780_v51 = vunpack.c.l.bf16 %v779_v43  ;;  %v7296_v43 = vld [vmem:[%s6444_s1 + $0x154] ss:$8 sps:$4 sm:$0xff]  }
 0x803   : > { %3655 = vmatpush1.bf16.msra.mxu0 %v5708_v33 }
 0x804   : > { %3656 = vmatprep.subr.bf16.mxu0 %v5716_v28 }
 0x805   : > { %3584 = vmatpush1.bf16.msra.mxu1 %v5711_v14 }
 0x807   : > { %3657 = vmatpush1.bf16.msra.mxu0 %v5714_v27  ;;  %v3097_v27 = vrot.slane %v780_v51, %v6654_v63 }
 0x868   : > { %v2933_v50 = vpop.xlane.xlu0 %2932 }
 0x869   : > { %v2952_v8 = vmul.f32 0.00390625, %v2933_v50  ;;  %v3093_v50 = vrot.slane %v780_v51, %v6657_v0  ;;  %v5747_v51 = vld [vmem:[%s6444_s1 + $0x50] ss:$8 sps:$4 sm:$0xff]  }
 0x86a   : > { %v2936_v29 = vpop.xlane.xlu1 %2935 }
 0x86b   : > { %v7136_v56 = vsub.f32 %v7025_v41, %v2952_v8  ;;  %v7139_v5 = vsub.f32 %v7028_v26, %v2952_v8  ;;  %v2953_v10 = vmul.f32 0.00390625, %v2936_v29 }
 0x86d   : > { %v7142_v6 = vsub.f32 %v7031_v35, %v2953_v10  ;;  %v7145_v52 = vsub.f32 %v7033_v11, %v2953_v10  ;;  %v2978_v48 = vmul.f32 %v7136_v56, %v7136_v56  ;;  %v2979_v45 = vmul.f32 %v7139_v5, %v7139_v5 }
 0x86f   : > { %v2996_v55 = vadd.f32 %v2979_v45, %v2978_v48  ;;  %v2980_v41 = vmul.f32 %v7142_v6, %v7142_v6  ;;  %v2981_v26 = vmul.f32 %v7145_v52, %v7145_v52 }
 0x870   : > { %v2939_v60 = vpop.xlane.xlu0 %2938 }
 0x871   : > { %v2954_v37 = vmul.f32 0.00390625, %v2939_v60  ;;  %2997 = vadd.xlane.f32.xlu0 %v2996_v55  ;;  %v2999_v35 = vadd.f32 %v2981_v26, %v2980_v41  ;;  %v7218_v41 = vrot.slane %v3097_v27, %v6657_v0  ;;  %v7221_v26 = vrot.slane %v3093_v50, %v6657_v0  ;;  %v7306_v27 = vld [vmem:[%s6444_s1 + $0x164] ss:$8 sps:$4 sm:$0xff]   ;;  %v5753_v50 = vld [vmem:[%s6444_s1 + $0x60] ss:$8 sps:$4 sm:$0xff]  }
 0x872   : > { %v2942_v4 = vpop.xlane.xlu1 %2941 }
 0x873   : > { %v7156_v11 = vsub.f32 %v7041_v49, %v2954_v37  ;;  %v7159_v9 = vsub.f32 %v7044_v54, %v2954_v37  ;;  %v2955_v59 = vmul.f32 0.00390625, %v2942_v4  ;;  %3000 = vadd.xlane.f32.xlu1 %v2999_v35 }
 0x875   : > { %v7162_v7 = vsub.f32 %v7047_v36, %v2955_v59  ;;  %v7165_v20 = vsub.f32 %v7049_v15, %v2955_v59  ;;  %v2982_v24 = vmul.f32 %v7156_v11, %v7156_v11  ;;  %v2983_v38 = vmul.f32 %v7159_v9, %v7159_v9 }
 0x877   : > { %v3002_v17 = vadd.f32 %v2983_v38, %v2982_v24  ;;  %v2984_v49 = vmul.f32 %v7162_v7, %v7162_v7  ;;  %v2985_v54 = vmul.f32 %v7165_v20, %v7165_v20 }
 0x878   : > { %v2945_v2 = vpop.xlane.xlu0 %2944 }
 0x879   : > { %v2956_v46 = vmul.f32 0.00390625, %v2945_v2  ;;  %3003 = vadd.xlane.f32.xlu0 %v3002_v17  ;;  %v3005_v36 = vadd.f32 %v2985_v54, %v2984_v49  ;;  %v5717_v49 = vld [vmem:[%s6444_s1] ss:$8 sps:$4 sm:$0xff]   ;;  %v5719_v54 = vld [vmem:[%s6444_s1 + $0x4] ss:$8 sps:$4 sm:$0xff]  }
 0x87a   : > { %v2948_v19 = vpop.xlane.xlu1 %2947  ;;  %v7248_v2 = vld [vmem:[%s6444_s1 + $0x100] ss:$8 sps:$4 sm:$0xff]   ;;  %4150 = vmatprep.subr.bf16.mxu1 %v5719_v54  ;;  %v5779_v54 = vld [vmem:[%s6444_s1 + $0xa4] ss:$8 sps:$4 sm:$0xff]  }
 0x87b   : > { %v7176_v15 = vsub.f32 %v7063_v42, %v2956_v46  ;;  %v7179_v16 = vsub.f32 %v7072_v53, %v2956_v46  ;;  %v2957_v21 = vmul.f32 0.00390625, %v2948_v19  ;;  %3006 = vadd.xlane.f32.xlu1 %v3005_v36  ;;  %v7251_v46 = vld [vmem:[%s6444_s1 + $0x104] ss:$8 sps:$4 sm:$0xff]   ;;  %v5725_v36 = vld [vmem:[%s6444_s1 + $0x14] ss:$8 sps:$4 sm:$0xff]  }
 0x87c   : > { %v2992_v25 = vpop.xlane.xlu0 %2991  ;;  %v7255_v19 = vld [vmem:[%s6444_s1 + $0x114] ss:$8 sps:$4 sm:$0xff]   ;;  %4223 = vmatprep.subr.bf16.mxu0 %v7251_v46 }
 0x87d   : > { %v7182_v32 = vsub.f32 %v7075_v1, %v2957_v21  ;;  %v7185_v22 = vsub.f32 %v7077_v31, %v2957_v21  ;;  %v3014_v30 = vmul.f32 0.00390625, %v2992_v25  ;;  %v2986_v40 = vmul.f32 %v7176_v15, %v7176_v15  ;;  %v777_v31 = vld [vmem:[%s7858_s17] sm:$0x3]  ;;  %v5723_v21 = vld [vmem:[%s6444_s1 + $0x10] ss:$8 sps:$4 sm:$0xff]  }
 0x87e   : > { %v2995_v3 = vpop.xlane.xlu1 %2994  ;;  %v2987_v42 = vmul.f32 %v7179_v16, %v7179_v16  ;;  %v778_v33 = vunpack.c.l.bf16 %v777_v31  ;;  %v7261_v25 = vld [vmem:[%s6444_s1 + $0x110] ss:$8 sps:$4 sm:$0xff]   ;;  %v5743_v31 = vld [vmem:[%s6444_s1 + $0x44] ss:$8 sps:$4 sm:$0xff]  }
 0x87f   : > { %v3022_v53 = vadd.f32 1e-05, %v3014_v30  ;;  %v3015_v12 = vmul.f32 0.00390625, %v2995_v3  ;;  %v2988_v13 = vmul.f32 %v7182_v32, %v7182_v32  ;;  %v2989_v1 = vmul.f32 %v7185_v22, %v7185_v22  ;;  %v5731_v30 = vld [vmem:[%s6444_s1 + $0x24] ss:$8 sps:$4 sm:$0xff]  }
 0x880   : > { %v3008_v23 = vadd.f32 %v2987_v42, %v2986_v40  ;;  %v3062_v28 = vrot.slane %v778_v33, %v6654_v63  ;;  %v3058_v14 = vrot.slane %v778_v33, %v6657_v0  ;;  %v7266_v40 = vld [vmem:[%s6444_s1 + $0x124] ss:$8 sps:$4 sm:$0xff]   ;;  %v5729_v3 = vld [vmem:[%s6444_s1 + $0x20] ss:$8 sps:$4 sm:$0xff]   ;;  %v5749_v33 = vld [vmem:[%s6444_s1 + $0x54] ss:$8 sps:$4 sm:$0xff]  }
 0x881   : > { %5877 = vrsqrt.f32 %v3022_v53  ;;  %v3023_v57 = vadd.f32 1e-05, %v3015_v12  ;;  %v3011_v39 = vadd.f32 %v2989_v1, %v2988_v13  ;;  %v7271_v42 = vld [vmem:[%s6444_s1 + $0x120] ss:$8 sps:$4 sm:$0xff]   ;;  %v5737_v53 = vld [vmem:[%s6444_s1 + $0x34] ss:$8 sps:$4 sm:$0xff]  }
 0x882   : > { %3009 = vadd.xlane.f32.xlu0 %v3008_v23  ;;  %v7210_v8 = vrot.slane %v3062_v28, %v6657_v0  ;;  %v7213_v29 = vrot.slane %v3058_v14, %v6657_v0  ;;  %v7276_v12 = vld [vmem:[%s6444_s1 + $0x134] ss:$8 sps:$4 sm:$0xff]   ;;  %v5735_v13 = vld [vmem:[%s6444_s1 + $0x30] ss:$8 sps:$4 sm:$0xff]   ;;  %v7286_v23 = vld [vmem:[%s6444_s1 + $0x144] ss:$8 sps:$4 sm:$0xff]  }
 0x883   : > { %5879 = vrsqrt.f32 %v3023_v57  ;;  %3012 = vadd.xlane.f32.xlu1 %v3011_v39  ;;  %v7281_v1 = vld [vmem:[%s6444_s1 + $0x130] ss:$8 sps:$4 sm:$0xff]   ;;  %v5741_v57 = vld [vmem:[%s6444_s1 + $0x40] ss:$8 sps:$4 sm:$0xff]   ;;  %v5755_v14 = vld [vmem:[%s6444_s1 + $0x64] ss:$8 sps:$4 sm:$0xff]  }
 0x884   : > { %v7291_v39 = vld [vmem:[%s6444_s1 + $0x140] ss:$8 sps:$4 sm:$0xff]   ;;  %v7301_v28 = vld [vmem:[%s6444_s1 + $0x150] ss:$8 sps:$4 sm:$0xff]  }
 0x88b   : > { %v5878_v10 = vpop.eup %5877 }
 0x88c   : > { %v3038_v48 = vmul.f32 %v5878_v10, %v7057_v34  ;;  %v3039_v45 = vmul.f32 %v5878_v10, %v7060_v18  ;;  %v7311_v10 = vld [vmem:[%s6444_s1 + $0x160] ss:$8 sps:$4 sm:$0xff]  }
 0x88d   : > { %v5880_v55 = vpop.eup %5879 }
 0x88e   : > { %v3040_v60 = vmul.f32 %v5880_v55, %v7067_v44  ;;  %v3041_v37 = vmul.f32 %v5880_v55, %v7070_v47  ;;  %v3074_v35 = vmul.f32 %v7210_v8, %v3039_v45  ;;  %v3073_v34 = vmul.f32 %v7213_v29, %v3038_v48  ;;  %v5761_v48 = vld [vmem:[%s6444_s1 + $0x74] ss:$8 sps:$4 sm:$0xff]   ;;  %v5759_v55 = vld [vmem:[%s6444_s1 + $0x70] ss:$8 sps:$4 sm:$0xff]  }
 0x88f   : > { %v7316_v45 = vld [vmem:[%s6444_s1 + $0x174] ss:$8 sps:$4 sm:$0xff]  }
 0x890   : > { %v3076_v18 = vmul.f32 %v7210_v8, %v3041_v37  ;;  %v3075_v4 = vmul.f32 %v7213_v29, %v3040_v60  ;;  %v7230_v59 = vadd.f32 %v7218_v41, %v3074_v35  ;;  %v7236_v47 = vadd.f32 %v7221_v26, %v3073_v34  ;;  %v7321_v60 = vld [vmem:[%s6444_s1 + $0x170] ss:$8 sps:$4 sm:$0xff]   ;;  %v5767_v37 = vld [vmem:[%s6444_s1 + $0x84] ss:$8 sps:$4 sm:$0xff]   ;;  %v5765_v34 = vld [vmem:[%s6444_s1 + $0x80] ss:$8 sps:$4 sm:$0xff]  }
 0x891   : > { %v7326_v35 = vld [vmem:[%s6444_s1 + $0x184] ss:$8 sps:$4 sm:$0xff]  }
 0x892   : > { %7859 = vst [vmem:[#allocation23_spill] sm:$0xff] %v7230_v59  ;;  %v7233_v44 = vadd.f32 %v7218_v41, %v3076_v18  ;;  %7861 = vst [vmem:[#allocation25_spill] sm:$0xff] %v7236_v47  ;;  %v7239_v24 = vadd.f32 %v7221_v26, %v3075_v4  ;;  %v7331_v18 = vld [vmem:[%s6444_s1 + $0x180] ss:$8 sps:$4 sm:$0xff]   ;;  %v5773_v4 = vld [vmem:[%s6444_s1 + $0x94] ss:$8 sps:$4 sm:$0xff]  }
 0x894   : > { %7860 = vst [vmem:[#allocation24_spill] sm:$0xff] %v7233_v44  ;;  %7862 = vst [vmem:[#allocation26_spill] sm:$0xff] %v7239_v24  ;;  %v3125_v38 = vpack.c.bf16 %v7233_v44, %v7230_v59  ;;  %v3124_v17 = vpack.c.bf16 %v7239_v24, %v7236_v47 }
 0x896   : > { %3585 = vmatprep.mubr.bf16.mxu1 %v3125_v38  ;;  %3658 = vmatprep.mubr.bf16.mxu0 %v3125_v38  ;;  %v7336_v38 = vld [vmem:[%s6444_s1 + $0x194] ss:$8 sps:$4 sm:$0xff]  }
 0x897   : > { %3586 = vmatmul.mubr.bf16.vlgmr.msra.gmra.mrb[64].mxu1 %v3124_v17  ;;  %3659 = vmatmul.mubr.bf16.vlgmr.msra.gmra.mrb[64].mxu0 %v3124_v17  ;;  %v5771_v17 = vld [vmem:[%s6444_s1 + $0x90] ss:$8 sps:$4 sm:$0xff]  }
 0x898   : > { %4151 = vmatpush1.bf16.msra.mxu1 %v5717_v49  ;;  %4224 = vmatpush1.bf16.msra.mxu0 %v7248_v2  ;;  %v7341_v49 = vld [vmem:[%s6444_s1 + $0x190] ss:$8 sps:$4 sm:$0xff]  }
 0x899   : > { %4152 = vmatprep.subr.bf16.mxu1 %v5725_v36  ;;  %4225 = vmatprep.subr.bf16.mxu0 %v7255_v19  ;;  %v7346_v36 = vld [vmem:[%s6444_s1 + $0x1a4] ss:$8 sps:$4 sm:$0xff]  }
 0x89c   : > { %4153 = vmatpush1.bf16.msra.mxu1 %v5723_v21  ;;  %4226 = vmatpush1.bf16.msra.mxu0 %v7261_v25  ;;  %v5777_v21 = vld [vmem:[%s6444_s1 + $0xa0] ss:$8 sps:$4 sm:$0xff]  }
 0x89d   : > { %4154 = vmatprep.subr.bf16.mxu1 %v5731_v30  ;;  %4227 = vmatprep.subr.bf16.mxu0 %v7266_v40  ;;  %v7351_v30 = vld [vmem:[%s6444_s1 + $0x1a0] ss:$8 sps:$4 sm:$0xff]  }
 0x8a0   : > { %4155 = vmatpush1.bf16.msra.mxu1 %v5729_v3  ;;  %4228 = vmatpush1.bf16.msra.mxu0 %v7271_v42  ;;  %v5785_v3 = vld [vmem:[%s6444_s1 + $0xb4] ss:$8 sps:$4 sm:$0xff]  }
 0x8a1   : > { %4156 = vmatprep.subr.bf16.mxu1 %v5737_v53  ;;  %4229 = vmatprep.subr.bf16.mxu0 %v7276_v12  ;;  %v7356_v53 = vld [vmem:[%s6444_s1 + $0x1b4] ss:$8 sps:$4 sm:$0xff]  }
 0x8a4   : > { %4157 = vmatpush1.bf16.msra.mxu1 %v5735_v13  ;;  %4230 = vmatpush1.bf16.msra.mxu0 %v7281_v1  ;;  %v5783_v13 = vld [vmem:[%s6444_s1 + $0xb0] ss:$8 sps:$4 sm:$0xff]  }
 0x8a5   : > { %4158 = vmatprep.subr.bf16.mxu1 %v5743_v31  ;;  %4231 = vmatprep.subr.bf16.mxu0 %v7286_v23  ;;  %v7361_v31 = vld [vmem:[%s6444_s1 + $0x1b0] ss:$8 sps:$4 sm:$0xff]  }
 0x8a8   : > { %4159 = vmatpush1.bf16.msra.mxu1 %v5741_v57  ;;  %4232 = vmatpush1.bf16.msra.mxu0 %v7291_v39  ;;  %v5791_v57 = vld [vmem:[%s6444_s1 + $0xc4] ss:$8 sps:$4 sm:$0xff]  }
 0x8a9   : > { %4160 = vmatprep.subr.bf16.mxu1 %v5749_v33  ;;  %4233 = vmatprep.subr.bf16.mxu0 %v7296_v43  ;;  %v7366_v33 = vld [vmem:[%s6444_s1 + $0x1c4] ss:$8 sps:$4 sm:$0xff]  }
 0x8ac   : > { %4161 = vmatpush1.bf16.msra.mxu1 %v5747_v51  ;;  %4234 = vmatpush1.bf16.msra.mxu0 %v7301_v28  ;;  %v5789_v51 = vld [vmem:[%s6444_s1 + $0xc0] ss:$8 sps:$4 sm:$0xff]  }
 0x8ad   : > { %4162 = vmatprep.subr.bf16.mxu1 %v5755_v14  ;;  %4235 = vmatprep.subr.bf16.mxu0 %v7306_v27  ;;  %v7371_v14 = vld [vmem:[%s6444_s1 + $0x1c0] ss:$8 sps:$4 sm:$0xff]  }
 0x8b0   : > { %4163 = vmatpush1.bf16.msra.mxu1 %v5753_v50  ;;  %4236 = vmatpush1.bf16.msra.mxu0 %v7311_v10  ;;  %v5797_v50 = vld [vmem:[%s6444_s1 + $0xd4] ss:$8 sps:$4 sm:$0xff]  }
 0x8b1   : > { %4164 = vmatprep.subr.bf16.mxu1 %v5761_v48  ;;  %4237 = vmatprep.subr.bf16.mxu0 %v7316_v45  ;;  %v7376_v48 = vld [vmem:[%s6444_s1 + $0x1d4] ss:$8 sps:$4 sm:$0xff]  }
 0x8b4   : > { %4165 = vmatpush1.bf16.msra.mxu1 %v5759_v55  ;;  %4238 = vmatpush1.bf16.msra.mxu0 %v7321_v60  ;;  %v5795_v55 = vld [vmem:[%s6444_s1 + $0xd0] ss:$8 sps:$4 sm:$0xff]  }
 0x8b5   : > { %4166 = vmatprep.subr.bf16.mxu1 %v5767_v37  ;;  %4239 = vmatprep.subr.bf16.mxu0 %v7326_v35  ;;  %v7381_v37 = vld [vmem:[%s6444_s1 + $0x1d0] ss:$8 sps:$4 sm:$0xff]  }
 0x8b8   : > { %4167 = vmatpush1.bf16.msra.mxu1 %v5765_v34  ;;  %4240 = vmatpush1.bf16.msra.mxu0 %v7331_v18  ;;  %v5803_v34 = vld [vmem:[%s6444_s1 + $0xe4] ss:$8 sps:$4 sm:$0xff]  }
 0x8b9   : > { %4168 = vmatprep.subr.bf16.mxu1 %v5773_v4  ;;  %4241 = vmatprep.subr.bf16.mxu0 %v7336_v38  ;;  %v7387_v4 = vld [vmem:[%s6444_s1 + $0x1e4] ss:$8 sps:$4 sm:$0xff]  }
 0x8bc   : > { %4169 = vmatpush1.bf16.msra.mxu1 %v5771_v17  ;;  %4242 = vmatpush1.bf16.msra.mxu0 %v7341_v49  ;;  %v5801_v17 = vld [vmem:[%s6444_s1 + $0xe0] ss:$8 sps:$4 sm:$0xff]  }
 0x8bd   : > { %4170 = vmatprep.subr.bf16.mxu1 %v5779_v54  ;;  %4243 = vmatprep.subr.bf16.mxu0 %v7346_v36  ;;  %v7391_v54 = vld [vmem:[%s6444_s1 + $0x1e0] ss:$8 sps:$4 sm:$0xff]  }
 0x8c0   : > { %4171 = vmatpush1.bf16.msra.mxu1 %v5777_v21  ;;  %4244 = vmatpush1.bf16.msra.mxu0 %v7351_v30  ;;  %v5809_v21 = vld [vmem:[%s6444_s1 + $0xf4] ss:$8 sps:$4 sm:$0xff]  }
 0x8c1   : > { %4172 = vmatprep.subr.bf16.mxu1 %v5785_v3  ;;  %4245 = vmatprep.subr.bf16.mxu0 %v7356_v53  ;;  %v7397_v3 = vld [vmem:[%s6444_s1 + $0x1f4] ss:$8 sps:$4 sm:$0xff]  }
 0x8c2   : > { %7863 = vst [vmem:[#allocation27_spill] sm:$0xff] %v7397_v3 }
 0x8c4   : > { %4173 = vmatpush1.bf16.msra.mxu1 %v5783_v13  ;;  %4246 = vmatpush1.bf16.msra.mxu0 %v7361_v31  ;;  %v5807_v13 = vld [vmem:[%s6444_s1 + $0xf0] ss:$8 sps:$4 sm:$0xff]  }
 0x8c5   : > { %4174 = vmatprep.subr.bf16.mxu1 %v5791_v57  ;;  %4247 = vmatprep.subr.bf16.mxu0 %v7366_v33  ;;  %v7401_v57 = vld [vmem:[%s6444_s1 + $0x1f0] ss:$8 sps:$4 sm:$0xff]  }
 0x8c6   : > { %7864 = vst [vmem:[#allocation28_spill] sm:$0xff] %v7401_v57 }
 0x8c8   : > { %4175 = vmatpush1.bf16.msra.mxu1 %v5789_v51  ;;  %4248 = vmatpush1.bf16.msra.mxu0 %v7371_v14 }
 0x8c9   : > { %4176 = vmatprep.subr.bf16.mxu1 %v5797_v50  ;;  %4249 = vmatprep.subr.bf16.mxu0 %v7376_v48 }
 0x8cc   : > { %4177 = vmatpush1.bf16.msra.mxu1 %v5795_v55  ;;  %4250 = vmatpush1.bf16.msra.mxu0 %v7381_v37 }
 0x8cd   : > { %4178 = vmatprep.subr.bf16.mxu1 %v5803_v34  ;;  %4251 = vmatprep.subr.bf16.mxu0 %v7387_v4 }
 0x8d0   : > { %4179 = vmatpush1.bf16.msra.mxu1 %v5801_v17  ;;  %4252 = vmatpush1.bf16.msra.mxu0 %v7391_v54 }
 0x8d1   : > { %4180 = vmatprep.subr.bf16.mxu1 %v5809_v21  ;;  %4253 = vmatprep.subr.bf16.mxu0 %v7397_v3 }
 0x8d4   : > { %4181 = vmatpush1.bf16.msra.mxu1 %v5807_v13  ;;  %4254 = vmatpush1.bf16.msra.mxu0 %v7401_v57 }
 0x8d5   : > { %5266 = vmatprep.subr.bf16.mxu1 %v7251_v46 }
 0x8fe   : > { %v2998_v51 = vpop.xlane.xlu0 %2997 }
 0x8ff   : > { %v3016_v50 = vmul.f32 0.00390625, %v2998_v51 }
 0x900   : > { %v3001_v55 = vpop.xlane.xlu1 %3000 }
 0x901   : > { %v3024_v34 = vadd.f32 1e-05, %v3016_v50  ;;  %v3017_v17 = vmul.f32 0.00390625, %v3001_v55 }
 0x903   : > { %5881 = vrsqrt.f32 %v3024_v34  ;;  %v3025_v62 = vadd.f32 1e-05, %v3017_v17 }
 0x905   : > { %5883 = vrsqrt.f32 %v3025_v62 }
 0x906   : > { %v3004_v61 = vpop.xlane.xlu0 %3003 }
 0x907   : > { %v3018_v44 = vmul.f32 0.00390625, %v3004_v61 }
 0x908   : > { %v3007_v24 = vpop.xlane.xlu1 %3006 }
 0x909   : > { %v3026_v59 = vadd.f32 1e-05, %v3018_v44  ;;  %v3019_v21 = vmul.f32 0.00390625, %v3007_v24 }
 0x90b   : > { %5885 = vrsqrt.f32 %v3026_v59  ;;  %v3027_v47 = vadd.f32 1e-05, %v3019_v21 }
 0x90d   : > { %v5882_v13 = vpop.eup %5881  ;;  %5887 = vrsqrt.f32 %v3027_v47 }
 0x90e   : > { %v3043_v57 = vmul.f32 %v5882_v13, %v7139_v5  ;;  %v3042_v46 = vmul.f32 %v5882_v13, %v7136_v56 }
 0x90f   : > { %v5884_v51 = vpop.eup %5883  ;;  %v3010_v3 = vpop.xlane.xlu0 %3009 }
 0x910   : > { %v3020_v50 = vmul.f32 0.00390625, %v3010_v3  ;;  %v3013_v55 = vpop.xlane.xlu1 %3012  ;;  %v3045_v34 = vmul.f32 %v5884_v51, %v7145_v52  ;;  %v3078_v62 = vmul.f32 %v7210_v8, %v3043_v57  ;;  %v3044_v61 = vmul.f32 %v5884_v51, %v7142_v6 }
 0x911   : > { %v3021_v44 = vmul.f32 0.00390625, %v3013_v55  ;;  %v3077_v59 = vmul.f32 %v7213_v29, %v3042_v46 }
 0x912   : > { %v3028_v24 = vadd.f32 1e-05, %v3020_v50  ;;  %v3080_v47 = vmul.f32 %v7210_v8, %v3045_v34  ;;  %v3079_v5 = vmul.f32 %v7213_v29, %v3044_v61  ;;  %v7415_v56 = vadd.f32 %v7218_v41, %v3078_v62 }
 0x913   : > { %v3029_v17 = vadd.f32 1e-05, %v3021_v44  ;;  %v7421_v52 = vadd.f32 %v7221_v26, %v3077_v59 }
 0x914   : > { %5889 = vrsqrt.f32 %v3028_v24  ;;  %v7418_v3 = vadd.f32 %v7218_v41, %v3080_v47  ;;  %v7424_v6 = vadd.f32 %v7221_v26, %v3079_v5 }
 0x915   : > { %v5886_v57 = vpop.eup %5885  ;;  %5891 = vrsqrt.f32 %v3029_v17 }
 0x916   : > { %v3127_v21 = vpack.c.bf16 %v7418_v3, %v7415_v56  ;;  %v3126_v13 = vpack.c.bf16 %v7424_v6, %v7421_v52  ;;  %v3047_v46 = vmul.f32 %v5886_v57, %v7159_v9  ;;  %v3046_v51 = vmul.f32 %v5886_v57, %v7156_v11 }
 0x917   : > { %v5888_v50 = vpop.eup %5887 }
 0x918   : > { %3595 = vmatprep.mubr.bf16.mxu1 %v3127_v21  ;;  %3668 = vmatprep.mubr.bf16.mxu0 %v3127_v21  ;;  %v3049_v55 = vmul.f32 %v5888_v50, %v7165_v20  ;;  %v3082_v34 = vmul.f32 %v7210_v8, %v3047_v46  ;;  %v3048_v62 = vmul.f32 %v5888_v50, %v7162_v7 }
 0x919   : > { %3596 = vmatmul.mubr.bf16.gmra.mrb[68].mxu1 %v3126_v13  ;;  %3669 = vmatmul.mubr.bf16.gmra.mrb[68].mxu0 %v3126_v13  ;;  %v3081_v61 = vmul.f32 %v7213_v29, %v3046_v51 }
 0x91a   : > { %v3084_v44 = vmul.f32 %v7210_v8, %v3049_v55  ;;  %v3083_v59 = vmul.f32 %v7213_v29, %v3048_v62  ;;  %v7439_v9 = vadd.f32 %v7218_v41, %v3082_v34 }
 0x91b   : > { %v7445_v20 = vadd.f32 %v7221_v26, %v3081_v61 }
 0x91c   : > { %v7442_v11 = vadd.f32 %v7218_v41, %v3084_v44  ;;  %v7448_v24 = vadd.f32 %v7221_v26, %v3083_v59  ;;  %v7871_v44 = vsub.s32 4, %v6645_v58 }
 0x91e   : > { %7865 = vst [vmem:[#allocation29_spill] sm:$0xff] %v7442_v11  ;;  %7866 = vst [vmem:[#allocation30_spill] sm:$0xff] %v7448_v24  ;;  %v5890_v7 = vpop.eup %5889  ;;  %v3129_v47 = vpack.c.bf16 %v7442_v11, %v7439_v9  ;;  %v3128_v5 = vpack.c.bf16 %v7448_v24, %v7445_v20 }
 0x91f   : > { %v5892_v17 = vpop.eup %5891  ;;  %v3051_v57 = vmul.f32 %v5890_v7, %v7179_v16  ;;  %v3050_v21 = vmul.f32 %v5890_v7, %v7176_v15  ;;  %v7872_v7 = vsub.s32 6, %v6645_v58 }
 0x920   : > { %3605 = vmatprep.mubr.bf16.mxu1 %v3129_v47  ;;  %3678 = vmatprep.mubr.bf16.mxu0 %v3129_v47  ;;  %v3053_v13 = vmul.f32 %v5892_v17, %v7185_v22  ;;  %v3052_v46 = vmul.f32 %v5892_v17, %v7182_v32 }
 0x921   : > { %3606 = vmatmul.mubr.bf16.gmra.mrb[72].mxu1 %v3128_v5  ;;  %3679 = vmatmul.mubr.bf16.gmra.mrb[72].mxu0 %v3128_v5  ;;  %v3086_v51 = vmul.f32 %v7210_v8, %v3051_v57  ;;  %v3085_v50 = vmul.f32 %v7213_v29, %v3050_v21 }
 0x922   : > { %v3088_v55 = vmul.f32 %v7210_v8, %v3053_v13  ;;  %v3087_v34 = vmul.f32 %v7213_v29, %v3052_v46  ;;  %v781_v29 = vld [vmem:[%s6478_s26] sm:$0xf] }
 0x923   : > { %v7463_v16 = vadd.f32 %v7218_v41, %v3086_v51  ;;  %v7469_v22 = vadd.f32 %v7221_v26, %v3085_v50  ;;  %v782_v61 = vunpack.c.l.bf16 %v781_v29 }
 0x924   : > { %v7466_v15 = vadd.f32 %v7218_v41, %v3088_v55  ;;  %v7472_v32 = vadd.f32 %v7221_v26, %v3087_v34 }
 0x925   : > { %7867 = vst [vmem:[#allocation31_spill] sm:$0xff] %v7463_v16  ;;  %7869 = vst [vmem:[#allocation33_spill] sm:$0xff] %v7469_v22  ;;  %v3200_v41 = vrot.slane %v782_v61, %v6657_v0  ;;  %v3208_v59 = vrot.slane %v782_v61, %v7871_v44  ;;  %v3204_v26 = vrot.slane %v782_v61, %v6654_v63 }
 0x926   : > { %7868 = vst [vmem:[#allocation32_spill] sm:$0xff] %v7466_v15  ;;  %7870 = vst [vmem:[#allocation34_spill] sm:$0xff] %v7472_v32  ;;  %v3131_v62 = vpack.c.bf16 %v7466_v15, %v7463_v16  ;;  %v3130_v8 = vpack.c.bf16 %v7472_v32, %v7469_v22  ;;  %v3212_v47 = vrot.slane %v782_v61, %v7872_v7 }
 0x927   : > { %v7486_v5 = vrot.slane %v3200_v41, %v6657_v0  ;;  %v7489_v17 = vrot.slane %v3208_v59, %v6657_v0  ;;  %v7492_v57 = vrot.slane %v3204_v26, %v6657_v0 }
 0x928   : > { %3615 = vmatprep.mubr.bf16.mxu1 %v3131_v62  ;;  %3688 = vmatprep.mubr.bf16.mxu0 %v3131_v62  ;;  %v7495_v21 = vrot.slane %v3212_v47, %v6657_v0 }
 0x929   : > { %3616 = vmatmul.mubr.bf16.gmra.mrb[76].mxu1 %v3130_v8  ;;  %3689 = vmatmul.mubr.bf16.gmra.mrb[76].mxu0 %v3130_v8 }
 0x96a   : > { %v3587_v13 = vpop.f32.mrb[64].mxu1  ;;  %v3660_v46 = vpop.f32.mrb[64].mxu0 }
 0x96b   : > { %v3588_v51 = vadd.f32 %v3587_v13, %v7486_v5  ;;  %v3661_v50 = vadd.f32 %v3660_v46, %v7489_v17  ;;  %v3589_v58 = vpop.f32.mrb[65].mxu1  ;;  %v3662_v55 = vpop.f32.mrb[65].mxu0 }
 0x96c   : > { %v3590_v34 = vadd.f32 %v3589_v58, %v7492_v57  ;;  %v3663_v62 = vadd.f32 %v3662_v55, %v7495_v21  ;;  %v3591_v8 = vpop.f32.mrb[66].mxu1  ;;  %v3664_v29 = vpop.f32.mrb[66].mxu0 }
 0x96d   : > { %v3592_v61 = vadd.f32 %v3591_v8, %v7486_v5  ;;  %v3665_v41 = vadd.f32 %v3664_v29, %v7489_v17  ;;  %v3593_v44 = vpop.f32.mrb[67].mxu1  ;;  %v3666_v59 = vpop.f32.mrb[67].mxu0  ;;  %v3699_v47 = vmax.f32 %v3588_v51, 0.0  ;;  %v3701_v13 = vmax.f32 %v3661_v50, 0.0 }
 0x96e   : > { %v3594_v26 = vadd.f32 %v3593_v44, %v7492_v57  ;;  %v3667_v7 = vadd.f32 %v3666_v59, %v7495_v21  ;;  %v3700_v32 = vmax.f32 %v3590_v34, 0.0  ;;  %v3702_v58 = vmax.f32 %v3663_v62, 0.0 }
 0x96f   : > { %v3703_v46 = vmax.f32 %v3592_v61, 0.0  ;;  %v3705_v15 = vmax.f32 %v3665_v41, 0.0 }
 0x970   : > { %v3704_v16 = vmax.f32 %v3594_v26, 0.0  ;;  %v3706_v55 = vmax.f32 %v3667_v7, 0.0 }
 0x971   : > { %v3731_v22 = vpack.c.bf16 %v3703_v46, %v3699_v47  ;;  %v3733_v11 = vpack.c.bf16 %v3705_v15, %v3701_v13 }
 0x972   : > { %v3732_v24 = vpack.c.bf16 %v3704_v16, %v3700_v32  ;;  %v3734_v8 = vpack.c.bf16 %v3706_v55, %v3702_v58 }
 0x974   : > { %4182 = vmatprep.mubr.bf16.mxu1 %v3732_v24  ;;  %4255 = vmatprep.mubr.bf16.mxu0 %v3734_v8 }
 0x975   : > { %4183 = vmatmul.mubr.bf16.vlgmr.msra.gmra.mrb[80].mxu1 %v3731_v22  ;;  %4256 = vmatmul.mubr.bf16.vlgmr.msra.gmra.mrb[80].mxu0 %v3733_v11 }
 0x976   : > { %5282 = vmatpush1.bf16.msra.mxu1 %v7248_v2  ;;  %v7873_v2 = vld [vmem:[#allocation27_spill] sm:$0xff] }
 0x977   : > { %5267 = vmatprep.subr.bf16.mxu1 %v7255_v19  ;;  %v7874_v19 = vld [vmem:[#allocation28_spill] sm:$0xff] }
 0x97a   : > { %5283 = vmatpush1.bf16.msra.mxu1 %v7261_v25 }
 0x97b   : > { %5268 = vmatprep.subr.bf16.mxu1 %v7266_v40 }
 0x97e   : > { %5284 = vmatpush1.bf16.msra.mxu1 %v7271_v42 }
 0x97f   : > { %5269 = vmatprep.subr.bf16.mxu1 %v7276_v12 }
 0x982   : > { %5285 = vmatpush1.bf16.msra.mxu1 %v7281_v1 }
 0x983   : > { %5270 = vmatprep.subr.bf16.mxu1 %v7286_v23 }
 0x986   : > { %5286 = vmatpush1.bf16.msra.mxu1 %v7291_v39 }
 0x987   : > { %5271 = vmatprep.subr.bf16.mxu1 %v7296_v43 }
 0x98a   : > { %5287 = vmatpush1.bf16.msra.mxu1 %v7301_v28 }
 0x98b   : > { %5272 = vmatprep.subr.bf16.mxu1 %v7306_v27 }
 0x98e   : > { %5288 = vmatpush1.bf16.msra.mxu1 %v7311_v10 }
 0x98f   : > { %5273 = vmatprep.subr.bf16.mxu1 %v7316_v45 }
 0x992   : > { %5289 = vmatpush1.bf16.msra.mxu1 %v7321_v60 }
 0x993   : > { %5274 = vmatprep.subr.bf16.mxu1 %v7326_v35 }
 0x996   : > { %5290 = vmatpush1.bf16.msra.mxu1 %v7331_v18 }
 0x997   : > { %5275 = vmatprep.subr.bf16.mxu1 %v7336_v38 }
 0x99a   : > { %5291 = vmatpush1.bf16.msra.mxu1 %v7341_v49 }
 0x99b   : > { %5276 = vmatprep.subr.bf16.mxu1 %v7346_v36 }
 0x99e   : > { %5292 = vmatpush1.bf16.msra.mxu1 %v7351_v30 }
 0x99f   : > { %5277 = vmatprep.subr.bf16.mxu1 %v7356_v53 }
 0x9a2   : > { %5293 = vmatpush1.bf16.msra.mxu1 %v7361_v31 }
 0x9a3   : > { %5278 = vmatprep.subr.bf16.mxu1 %v7366_v33 }
 0x9a6   : > { %5294 = vmatpush1.bf16.msra.mxu1 %v7371_v14 }
 0x9a7   : > { %5279 = vmatprep.subr.bf16.mxu1 %v7376_v48 }
 0x9aa   : > { %5295 = vmatpush1.bf16.msra.mxu1 %v7381_v37 }
 0x9ab   : > { %5280 = vmatprep.subr.bf16.mxu1 %v7387_v4 }
 0x9ae   : > { %5296 = vmatpush1.bf16.msra.mxu1 %v7391_v54 }
 0x9af   : > { %5281 = vmatprep.subr.bf16.mxu1 %v7873_v2 }
 0x9b2   : > { %5297 = vmatpush1.bf16.msra.mxu1 %v7874_v19 }
 0x9ec   : > { %v3597_v25 = vpop.f32.mrb[68].mxu1  ;;  %v3670_v40 = vpop.f32.mrb[68].mxu0 }
 0x9ed   : > { %v3598_v42 = vadd.f32 %v3597_v25, %v7486_v5  ;;  %v3671_v12 = vadd.f32 %v3670_v40, %v7489_v17  ;;  %v3599_v1 = vpop.f32.mrb[69].mxu1  ;;  %v3672_v23 = vpop.f32.mrb[69].mxu0 }
 0x9ee   : > { %v3600_v39 = vadd.f32 %v3599_v1, %v7492_v57  ;;  %v3673_v43 = vadd.f32 %v3672_v23, %v7495_v21  ;;  %v3601_v28 = vpop.f32.mrb[70].mxu1  ;;  %v3674_v27 = vpop.f32.mrb[70].mxu0 }
 0x9ef   : > { %v3602_v10 = vadd.f32 %v3601_v28, %v7486_v5  ;;  %v3675_v45 = vadd.f32 %v3674_v27, %v7489_v17  ;;  %v3603_v60 = vpop.f32.mrb[71].mxu1  ;;  %v3676_v35 = vpop.f32.mrb[71].mxu0  ;;  %v3707_v49 = vmax.f32 %v3598_v42, 0.0  ;;  %v3709_v36 = vmax.f32 %v3671_v12, 0.0 }
 0x9f0   : > { %v3604_v18 = vadd.f32 %v3603_v60, %v7492_v57  ;;  %v3677_v38 = vadd.f32 %v3676_v35, %v7495_v21  ;;  %v3708_v31 = vmax.f32 %v3600_v39, 0.0  ;;  %v3710_v33 = vmax.f32 %v3673_v43, 0.0 }
 0x9f1   : > { %v3711_v30 = vmax.f32 %v3602_v10, 0.0  ;;  %v3713_v53 = vmax.f32 %v3675_v45, 0.0 }
 0x9f2   : > { %v3712_v14 = vmax.f32 %v3604_v18, 0.0  ;;  %v3714_v48 = vmax.f32 %v3677_v38, 0.0 }
 0x9f3   : > { %v3735_v37 = vpack.c.bf16 %v3711_v30, %v3707_v49  ;;  %v3737_v4 = vpack.c.bf16 %v3713_v53, %v3709_v36 }
 0x9f4   : > { %v3736_v54 = vpack.c.bf16 %v3712_v14, %v3708_v31  ;;  %v3738_v11 = vpack.c.bf16 %v3714_v48, %v3710_v33  ;;  %v3607_v24 = vpop.f32.mrb[72].mxu1  ;;  %v3680_v16 = vpop.f32.mrb[72].mxu0 }
 0x9f5   : > { %v3608_v15 = vadd.f32 %v3607_v24, %v7486_v5  ;;  %v3681_v22 = vadd.f32 %v3680_v16, %v7489_v17  ;;  %v3609_v32 = vpop.f32.mrb[73].mxu1  ;;  %v3682_v51 = vpop.f32.mrb[73].mxu0 }
 0x9f6   : > { %v3610_v50 = vadd.f32 %v3609_v32, %v7492_v57  ;;  %v3683_v34 = vadd.f32 %v3682_v51, %v7495_v21  ;;  %v3611_v62 = vpop.f32.mrb[74].mxu1  ;;  %v3684_v29 = vpop.f32.mrb[74].mxu0  ;;  %4192 = vmatprep.mubr.bf16.mxu1 %v3736_v54  ;;  %4265 = vmatprep.mubr.bf16.mxu0 %v3738_v11 }
 0x9f7   : > { %v3612_v61 = vadd.f32 %v3611_v62, %v7486_v5  ;;  %v3685_v41 = vadd.f32 %v3684_v29, %v7489_v17  ;;  %v3613_v44 = vpop.f32.mrb[75].mxu1  ;;  %v3686_v59 = vpop.f32.mrb[75].mxu0  ;;  %4193 = vmatmul.mubr.bf16.gmra.mrb[84].mxu1 %v3735_v37  ;;  %4266 = vmatmul.mubr.bf16.gmra.mrb[84].mxu0 %v3737_v4  ;;  %v3715_v47 = vmax.f32 %v3608_v15, 0.0  ;;  %v3717_v13 = vmax.f32 %v3681_v22, 0.0 }
 0x9f8   : > { %v3614_v26 = vadd.f32 %v3613_v44, %v7492_v57  ;;  %v3687_v7 = vadd.f32 %v3686_v59, %v7495_v21  ;;  %v3716_v55 = vmax.f32 %v3610_v50, 0.0  ;;  %v3718_v8 = vmax.f32 %v3683_v34, 0.0 }
 0x9f9   : > { %v3719_v46 = vmax.f32 %v3612_v61, 0.0  ;;  %v3721_v58 = vmax.f32 %v3685_v41, 0.0 }
 0x9fa   : > { %v3720_v2 = vmax.f32 %v3614_v26, 0.0  ;;  %v3722_v19 = vmax.f32 %v3687_v7, 0.0 }
 0x9fb   : > { %v3739_v25 = vpack.c.bf16 %v3719_v46, %v3715_v47  ;;  %v3741_v40 = vpack.c.bf16 %v3721_v58, %v3717_v13 }
 0x9fc   : > { %v3740_v42 = vpack.c.bf16 %v3720_v2, %v3716_v55  ;;  %v3742_v12 = vpack.c.bf16 %v3722_v19, %v3718_v8  ;;  %v3617_v1 = vpop.f32.mrb[76].mxu1  ;;  %v3690_v23 = vpop.f32.mrb[76].mxu0  ;;  %v7875_v55 = vld [vmem:[#allocation25_spill] sm:$0xff]  ;;  %v7876_v19 = vld [vmem:[#allocation23_spill] sm:$0xff] }
 0x9fd   : > { %v3618_v39 = vadd.f32 %v3617_v1, %v7486_v5  ;;  %v3691_v43 = vadd.f32 %v3690_v23, %v7489_v17  ;;  %v3619_v28 = vpop.f32.mrb[77].mxu1  ;;  %v3692_v27 = vpop.f32.mrb[77].mxu0  ;;  %v7878_v1 = vld [vmem:[#allocation24_spill] sm:$0xff] }
 0x9fe   : > { %v3620_v10 = vadd.f32 %v3619_v28, %v7492_v57  ;;  %v3693_v45 = vadd.f32 %v3692_v27, %v7495_v21  ;;  %v3621_v60 = vpop.f32.mrb[78].mxu1  ;;  %v3694_v35 = vpop.f32.mrb[78].mxu0  ;;  %4202 = vmatprep.mubr.bf16.mxu1 %v3740_v42  ;;  %v7877_v42 = vld [vmem:[#allocation26_spill] sm:$0xff] }
 0x9ff   : > { %v3622_v18 = vadd.f32 %v3621_v60, %v7486_v5  ;;  %v3695_v38 = vadd.f32 %v3694_v35, %v7489_v17  ;;  %v3623_v49 = vpop.f32.mrb[79].mxu1  ;;  %v3696_v36 = vpop.f32.mrb[79].mxu0  ;;  %4203 = vmatmul.mubr.bf16.gmra.mrb[88].mxu1 %v3739_v25  ;;  %v3723_v31 = vmax.f32 %v3618_v39, 0.0  ;;  %v3725_v33 = vmax.f32 %v3691_v43, 0.0 }
 0xa00   : > { %v3624_v30 = vadd.f32 %v3623_v49, %v7492_v57  ;;  %v3697_v53 = vadd.f32 %v3696_v36, %v7495_v21  ;;  %v3724_v37 = vmax.f32 %v3620_v10, 0.0  ;;  %v3726_v4 = vmax.f32 %v3693_v45, 0.0  ;;  %v783_v57 = vld [vmem:[%s733_s9] sm:$0x3] }
 0xa01   : > { %v3727_v14 = vmax.f32 %v3622_v18, 0.0  ;;  %v3729_v48 = vmax.f32 %v3695_v38, 0.0  ;;  %v784_v21 = vunpack.c.l.bf16 %v783_v57 }
 0xa02   : > { %v3728_v54 = vmax.f32 %v3624_v30, 0.0  ;;  %v3730_v11 = vmax.f32 %v3697_v53, 0.0 }
 0xa03   : > { %v3743_v24 = vpack.c.bf16 %v3727_v14, %v3723_v31  ;;  %v3745_v5 = vpack.c.bf16 %v3729_v48, %v3725_v33  ;;  %v3815_v15 = vrot.slane %v784_v21, %v6657_v0  ;;  %v3819_v22 = vrot.slane %v784_v21, %v6654_v63 }
 0xa04   : > { %v3744_v16 = vpack.c.bf16 %v3728_v54, %v3724_v37  ;;  %v3746_v17 = vpack.c.bf16 %v3730_v11, %v3726_v4 }
 0xa05   : > { %v7568_v32 = vrot.slane %v3815_v15, %v6657_v0  ;;  %v7571_v51 = vrot.slane %v3819_v22, %v6657_v0 }
 0xa06   : > { %4212 = vmatprep.mubr.bf16.mxu1 %v3744_v16 }
 0xa07   : > { %4213 = vmatmul.mubr.bf16.gmra.mrb[92].mxu1 %v3743_v24 }
 0xa08   : > { %4275 = vmatprep.mubr.bf16.mxu1 %v3742_v12 }
 0xa0f   : > { %4276 = vmatmul.mubr.bf16.vlgmr.msra.gmra.mrb[88].mxu1 %v3741_v40 }
 0xa10   : > { %4285 = vmatprep.mubr.bf16.mxu1 %v3746_v17 }
 0xa17   : > { %4286 = vmatmul.mubr.bf16.gmra.mrb[92].mxu1 %v3745_v5 }
 0xa48   : > { %v4184_v50 = vpop.f32.mrb[80].mxu1  ;;  %v4257_v34 = vpop.f32.mrb[80].mxu0 }
 0xa49   : > { %v4185_v62 = vadd.f32 %v4184_v50, %v7568_v32  ;;  %v4186_v29 = vpop.f32.mrb[81].mxu1  ;;  %v4259_v61 = vpop.f32.mrb[81].mxu0 }
 0xa4a   : > { %v4187_v41 = vadd.f32 %v4186_v29, %v7571_v51  ;;  %v4188_v44 = vpop.f32.mrb[82].mxu1  ;;  %v4261_v59 = vpop.f32.mrb[82].mxu0 }
 0xa4b   : > { %v4258_v26 = vadd.f32 %v4257_v34, %v4185_v62  ;;  %v4189_v7 = vadd.f32 %v4188_v44, %v7568_v32  ;;  %v4190_v47 = vpop.f32.mrb[83].mxu1  ;;  %v4263_v13 = vpop.f32.mrb[83].mxu0  ;;  %v7879_v62 = vld [vmem:[#allocation30_spill] sm:$0xff] }
 0xa4c   : > { %v4260_v46 = vadd.f32 %v4259_v61, %v4187_v41  ;;  %v4191_v58 = vadd.f32 %v4190_v47, %v7571_v51  ;;  %v7880_v41 = vld [vmem:[#allocation29_spill] sm:$0xff] }
 0xa4d   : > { %v4296_v8 = vadd.f32 %v4258_v26, %v7875_v55  ;;  %v4262_v2 = vadd.f32 %v4261_v59, %v4189_v7 }
 0xa4e   : > { %v4297_v25 = vadd.f32 %v4260_v46, %v7876_v19  ;;  %v4264_v40 = vadd.f32 %v4263_v13, %v4191_v58 }
 0xa4f   : > { %v4298_v12 = vadd.f32 %v4262_v2, %v7877_v42  ;;  %v7881_v2 = vld [vmem:[#allocation33_spill] sm:$0xff] }
 0xa50   : > { %v4299_v23 = vadd.f32 %v4264_v40, %v7878_v1  ;;  %v4312_v39 = vadd.f32 %v4297_v25, %v4296_v8 }
 0xa52   : > { %4313 = vadd.xlane.f32.xlu0 %v4312_v39  ;;  %v4315_v43 = vadd.f32 %v4299_v23, %v4298_v12 }
 0xa54   : > { %4316 = vadd.xlane.f32.xlu1 %v4315_v43  ;;  %v7882_v43 = vld [vmem:[#allocation31_spill] sm:$0xff] }
 0xaca   : > { %v4194_v28 = vpop.f32.mrb[84].mxu1  ;;  %v4267_v27 = vpop.f32.mrb[84].mxu0 }
 0xacb   : > { %v4195_v10 = vadd.f32 %v4194_v28, %v7568_v32  ;;  %v4196_v45 = vpop.f32.mrb[85].mxu1  ;;  %v4269_v60 = vpop.f32.mrb[85].mxu0 }
 0xacc   : > { %v4197_v35 = vadd.f32 %v4196_v45, %v7571_v51  ;;  %v4198_v18 = vpop.f32.mrb[86].mxu1  ;;  %v4271_v38 = vpop.f32.mrb[86].mxu0 }
 0xacd   : > { %v4268_v49 = vadd.f32 %v4267_v27, %v4195_v10  ;;  %v4199_v36 = vadd.f32 %v4198_v18, %v7568_v32  ;;  %v4200_v30 = vpop.f32.mrb[87].mxu1  ;;  %v4273_v53 = vpop.f32.mrb[87].mxu0  ;;  %v7883_v27 = vld [vmem:[#allocation34_spill] sm:$0xff]  ;;  %v7884_v10 = vld [vmem:[#allocation32_spill] sm:$0xff] }
 0xace   : > { %v4270_v31 = vadd.f32 %v4269_v60, %v4197_v35  ;;  %v4201_v33 = vadd.f32 %v4200_v30, %v7571_v51 }
 0xacf   : > { %v4300_v14 = vadd.f32 %v4268_v49, %v7421_v52  ;;  %v4272_v48 = vadd.f32 %v4271_v38, %v4199_v36 }
 0xad0   : > { %v4301_v37 = vadd.f32 %v4270_v31, %v7415_v56  ;;  %v4274_v4 = vadd.f32 %v4273_v53, %v4201_v33 }
 0xad1   : > { %v4302_v54 = vadd.f32 %v4272_v48, %v7424_v6 }
 0xad2   : > { %v4303_v11 = vadd.f32 %v4274_v4, %v7418_v3  ;;  %v4318_v24 = vadd.f32 %v4301_v37, %v4300_v14 }
 0xad4   : > { %4319 = vadd.xlane.f32.xlu0 %v4318_v24  ;;  %v4321_v5 = vadd.f32 %v4303_v11, %v4302_v54 }
 0xad6   : > { %4322 = vadd.xlane.f32.xlu1 %v4321_v5 }
 0xadf   : > { %v4314_v52 = vpop.xlane.xlu0 %4313 }
 0xae0   : > { %v4336_v61 = vmul.f32 0.00390625, %v4314_v52 }
 0xae1   : > { %v4317_v34 = vpop.xlane.xlu1 %4316 }
 0xae2   : > { %v4277_v16 = vpop.f32.mrb[88].mxu1  ;;  %v4337_v26 = vmul.f32 0.00390625, %v4317_v34  ;;  %v7598_v46 = vsub.f32 %v4296_v8, %v4336_v61  ;;  %v7600_v58 = vsub.f32 %v4297_v25, %v4336_v61 }
 0xae3   : > { %v5314_v17 = vadd.f32 %v4277_v16, %v7568_v32  ;;  %v4279_v57 = vpop.f32.mrb[89].mxu1 }
 0xae4   : > { %v5315_v21 = vadd.f32 %v4279_v57, %v7571_v51  ;;  %v4281_v15 = vpop.f32.mrb[90].mxu1  ;;  %v7605_v1 = vsub.f32 %v4298_v12, %v4337_v26  ;;  %v7607_v39 = vsub.f32 %v4299_v23, %v4337_v26  ;;  %v4360_v35 = vmul.f32 %v7598_v46, %v7598_v46 }
 0xae5   : > { %v4304_v22 = vadd.f32 %v5314_v17, %v7445_v20  ;;  %v5316_v56 = vadd.f32 %v4281_v15, %v7568_v32  ;;  %v4283_v50 = vpop.f32.mrb[91].mxu1 }
 0xae6   : > { %v4305_v6 = vadd.f32 %v5315_v21, %v7439_v9  ;;  %v5317_v3 = vadd.f32 %v4283_v50, %v7571_v51  ;;  %v4362_v23 = vmul.f32 %v7605_v1, %v7605_v1  ;;  %v4363_v18 = vmul.f32 %v7607_v39, %v7607_v39 }
 0xae7   : > { %v4306_v29 = vadd.f32 %v5316_v56, %v7879_v62 }
 0xae8   : > { %v4307_v44 = vadd.f32 %v5317_v3, %v7880_v41  ;;  %v4324_v59 = vadd.f32 %v4305_v6, %v4304_v22  ;;  %v4379_v38 = vadd.f32 %v4363_v18, %v4362_v23 }
 0xaea   : > { %v4287_v7 = vpop.f32.mrb[92].mxu1  ;;  %4325 = vadd.xlane.f32.xlu0 %v4324_v59  ;;  %v4327_v47 = vadd.f32 %v4307_v44, %v4306_v29 }
 0xaeb   : > { %v5318_v20 = vadd.f32 %v4287_v7, %v7568_v32  ;;  %v4289_v13 = vpop.f32.mrb[93].mxu1 }
 0xaec   : > { %v5319_v9 = vadd.f32 %v4289_v13, %v7571_v51  ;;  %v4291_v55 = vpop.f32.mrb[94].mxu1  ;;  %4328 = vadd.xlane.f32.xlu1 %v4327_v47 }
 0xaed   : > { %v4308_v19 = vadd.f32 %v5318_v20, %v7881_v2  ;;  %v5320_v40 = vadd.f32 %v4291_v55, %v7568_v32  ;;  %v4293_v42 = vpop.f32.mrb[95].mxu1  ;;  %v4361_v32 = vmul.f32 %v7600_v58, %v7600_v58 }
 0xaee   : > { %v4309_v28 = vadd.f32 %v5319_v9, %v7882_v43  ;;  %v5321_v8 = vadd.f32 %v4293_v42, %v7571_v51 }
 0xaef   : > { %v4310_v25 = vadd.f32 %v5320_v40, %v7883_v27  ;;  %v4376_v51 = vadd.f32 %v4361_v32, %v4360_v35 }
 0xaf0   : > { %v4311_v45 = vadd.f32 %v5321_v8, %v7884_v10  ;;  %v4330_v60 = vadd.f32 %v4309_v28, %v4308_v19 }
 0xaf2   : > { %4331 = vadd.xlane.f32.xlu0 %v4330_v60  ;;  %v4333_v12 = vadd.f32 %v4311_v45, %v4310_v25 }
 0xaf4   : > { %4334 = vadd.xlane.f32.xlu1 %v4333_v12 }
 0xaf6   : > { %4377 = vadd.xlane.f32.xlu0 %v4376_v51 }
 0xaf8   : > { %4380 = vadd.xlane.f32.xlu1 %v4379_v38 }
 0xb61   : > { %v4320_v49 = vpop.xlane.xlu0 %4319 }
 0xb62   : > { %v4338_v36 = vmul.f32 0.00390625, %v4320_v49 }
 0xb63   : > { %v4323_v30 = vpop.xlane.xlu1 %4322 }
 0xb64   : > { %v7621_v53 = vsub.f32 %v4300_v14, %v4338_v36  ;;  %v7623_v31 = vsub.f32 %v4301_v37, %v4338_v36  ;;  %v4339_v33 = vmul.f32 0.00390625, %v4323_v30 }
 0xb66   : > { %v7625_v48 = vsub.f32 %v4302_v54, %v4339_v33  ;;  %v7627_v4 = vsub.f32 %v4303_v11, %v4339_v33  ;;  %v4364_v24 = vmul.f32 %v7621_v53, %v7621_v53  ;;  %v4365_v5 = vmul.f32 %v7623_v31, %v7623_v31 }
 0xb68   : > { %v4382_v16 = vadd.f32 %v4365_v5, %v4364_v24  ;;  %v4366_v17 = vmul.f32 %v7625_v48, %v7625_v48  ;;  %v4367_v14 = vmul.f32 %v7627_v4, %v7627_v4 }
 0xb6a   : > { %4383 = vadd.xlane.f32.xlu0 %v4382_v16  ;;  %v4385_v37 = vadd.f32 %v4367_v14, %v4366_v17 }
 0xb6c   : > { %4386 = vadd.xlane.f32.xlu1 %v4385_v37 }
 0xb77   : > { %v4326_v54 = vpop.xlane.xlu0 %4325 }
 0xb78   : > { %v4340_v57 = vmul.f32 0.00390625, %v4326_v54 }
 0xb79   : > { %v4329_v11 = vpop.xlane.xlu1 %4328 }
 0xb7a   : > { %v7637_v21 = vsub.f32 %v4304_v22, %v4340_v57  ;;  %v7639_v15 = vsub.f32 %v4305_v6, %v4340_v57  ;;  %v4341_v52 = vmul.f32 0.00390625, %v4329_v11 }
 0xb7c   : > { %v7641_v56 = vsub.f32 %v4306_v29, %v4341_v52  ;;  %v7643_v50 = vsub.f32 %v4307_v44, %v4341_v52  ;;  %v4368_v3 = vmul.f32 %v7637_v21, %v7637_v21  ;;  %v4369_v34 = vmul.f32 %v7639_v15, %v7639_v15 }
 0xb7e   : > { %v4388_v62 = vadd.f32 %v4369_v34, %v4368_v3  ;;  %v4370_v61 = vmul.f32 %v7641_v56, %v7641_v56  ;;  %v4371_v22 = vmul.f32 %v7643_v50, %v7643_v50 }
 0xb7f   : > { %v4332_v6 = vpop.xlane.xlu0 %4331 }
 0xb80   : > { %v4342_v41 = vmul.f32 0.00390625, %v4332_v6  ;;  %4389 = vadd.xlane.f32.xlu0 %v4388_v62  ;;  %v4391_v29 = vadd.f32 %v4371_v22, %v4370_v61 }
 0xb81   : > { %v4335_v44 = vpop.xlane.xlu1 %4334 }
 0xb82   : > { %v7653_v59 = vsub.f32 %v4308_v19, %v4342_v41  ;;  %v7655_v26 = vsub.f32 %v4309_v28, %v4342_v41  ;;  %v4343_v7 = vmul.f32 0.00390625, %v4335_v44  ;;  %4392 = vadd.xlane.f32.xlu1 %v4391_v29  ;;  %v785_v19 = vld [vmem:[%s737_s30] sm:$0x3]  ;;  %s4576_s30 = sshll.u32 %s6139_s19, 4  ;;  %s4577_s30 = int_to_ptr.vmem [resolvable:$true] %s4576_s30 }
 0xb83   : > { %v4378_v47 = vpop.xlane.xlu0 %4377  ;;  %v786_v60 = vunpack.c.l.bf16 %v785_v19  ;;  %s6037_s0 = scalar_lea.vmem %s4577_s30, 1024  ;;  %p6044_p13 = scmp.lt.s32.totalorder %s4577_s30, %s4577_s30 }
 0xb84   : > { %v7657_v20 = vsub.f32 %v4310_v25, %v4343_v7  ;;  %v7659_v13 = vsub.f32 %v4311_v45, %v4343_v7  ;;  %v4400_v9 = vmul.f32 0.00390625, %v4378_v47  ;;  %v4372_v55 = vmul.f32 %v7653_v59, %v7653_v59  ;;  %v787_v25 = vld [vmem:[%s741_s14] sm:$0x3]  ;;  %s7887_s14 = sld [smem:[#allocation20_spill]]  ;;  %p6038_p8 = scmp.ne.s32.totalorder %s4577_s30, %s6037_s0 }
 0xb85   : > { %v4381_v2 = vpop.xlane.xlu1 %4380  ;;  %v4373_v40 = vmul.f32 %v7655_v26, %v7655_v26  ;;  %v788_v35 = vunpack.c.l.bf16 %v787_v25  ;;  %v4444_v32 = vrot.slane %v786_v60, %v6657_v0  ;;  %v4448_v12 = vrot.slane %v786_v60, %v6654_v63  ;;  %p6045_p1 = scmp.lt.s32.totalorder %s6037_s0, %s6037_s0 }
 0xb86   : > { %v4408_v42 = vadd.f32 1e-05, %v4400_v9  ;;  %v4401_v43 = vmul.f32 0.00390625, %v4381_v2  ;;  %v4374_v28 = vmul.f32 %v7657_v20, %v7657_v20  ;;  %v4375_v8 = vmul.f32 %v7659_v13, %v7659_v13 }
 0xb87   : > { %v4394_v27 = vadd.f32 %v4373_v40, %v4372_v55  ;;  %v4479_v23 = vrot.slane %v788_v35, %v6657_v0  ;;  %v4483_v18 = vrot.slane %v788_v35, %v6654_v63  ;;  %v7684_v51 = vrot.slane %v4444_v32, %v6657_v0  ;;  %p6046_p11 = por %p6045_p1, %p6044_p13 }
 0xb88   : > { %5893 = vrsqrt.f32 %v4408_v42  ;;  %v4409_v10 = vadd.f32 1e-05, %v4401_v43  ;;  %v4397_v45 = vadd.f32 %v4375_v8, %v4374_v28  ;;  %v7687_v38 = vrot.slane %v4448_v12, %v6657_v0 }
 0xb89   : > { %4395 = vadd.xlane.f32.xlu0 %v4394_v27  ;;  %v7690_v36 = vrot.slane %v4479_v23, %v6657_v0  ;;  %v7693_v30 = vrot.slane %v4483_v18, %v6657_v0 }
 0xb8a   : > { %5895 = vrsqrt.f32 %v4409_v10  ;;  %4398 = vadd.xlane.f32.xlu1 %v4397_v45  ;;  %p5360_p6 = scmp.eq.s32.totalorder %s7887_s14, 1 }
 0xb8c   : > { %p6039_p0 = pnand %p6038_p8, %p5360_p6 }
 0xb8e   : > { %p6040_p5 = pneg %p6039_p0 }
 0xb90   : > { %p6047_p2 = pnand %p6046_p11, %p6040_p5 }
 0xb92   : > { %v5894_v49 = vpop.eup %5893 }
 0xb93   : > { %v4424_v33 = vmul.f32 %v5894_v49, %v7598_v46  ;;  %v4425_v24 = vmul.f32 %v5894_v49, %v7600_v58 }
 0xb94   : > { %v5896_v5 = vpop.eup %5895 }
 0xb95   : > { %v4459_v63 = vmul.f32 %v7684_v51, %v4424_v33  ;;  %v4460_v16 = vmul.f32 %v7687_v38, %v4425_v24  ;;  %v4426_v17 = vmul.f32 %v5896_v5, %v7605_v1  ;;  %v4427_v14 = vmul.f32 %v5896_v5, %v7607_v39 }
 0xb97   : > { %v4494_v37 = vadd.f32 %v7690_v36, %v4459_v63  ;;  %v4495_v54 = vadd.f32 %v7693_v30, %v4460_v16  ;;  %v4461_v0 = vmul.f32 %v7684_v51, %v4426_v17  ;;  %v4462_v57 = vmul.f32 %v7687_v38, %v4427_v14 }
 0xb99   : > { %v5130_v46 = vpack.c.bf16 %v4495_v54, %v4494_v37  ;;  %v4496_v58 = vadd.f32 %v7690_v36, %v4461_v0  ;;  %v4497_v11 = vadd.f32 %v7693_v30, %v4462_v57 }
 0xb9b   : > { %4558 = vst [vmem:[#allocation11] sm:$0xff] %v5130_v46  ;;  %v5131_v52 = vpack.c.bf16 %v4497_v11, %v4496_v58 }
 0xb9d   : > { %4559 = vst [vmem:[#allocation11 + $0x8] sm:$0xff] %v5131_v52 }
 0xbf7   : > { %v4384_v3 = vpop.xlane.xlu0 %4383 }
 0xbf8   : > { %v4402_v1 = vmul.f32 0.00390625, %v4384_v3 }
 0xbf9   : > { %v4387_v34 = vpop.xlane.xlu1 %4386 }
 0xbfa   : > { %v4410_v39 = vadd.f32 1e-05, %v4402_v1  ;;  %v4403_v62 = vmul.f32 0.00390625, %v4387_v34 }
 0xbfc   : > { %5897 = vrsqrt.f32 %v4410_v39  ;;  %v4411_v61 = vadd.f32 1e-05, %v4403_v62 }
 0xbfe   : > { %5899 = vrsqrt.f32 %v4411_v61 }
 0xc06   : > { %v5898_v22 = vpop.eup %5897 }
 0xc07   : > { %v4428_v6 = vmul.f32 %v5898_v22, %v7621_v53  ;;  %v4429_v41 = vmul.f32 %v5898_v22, %v7623_v31 }
 0xc08   : > { %v5900_v29 = vpop.eup %5899 }
 0xc09   : > { %v4463_v44 = vmul.f32 %v7684_v51, %v4428_v6  ;;  %v4464_v7 = vmul.f32 %v7687_v38, %v4429_v41  ;;  %v4430_v47 = vmul.f32 %v5900_v29, %v7625_v48  ;;  %v4431_v9 = vmul.f32 %v5900_v29, %v7627_v4 }
 0xc0b   : > { %v4498_v55 = vadd.f32 %v7690_v36, %v4463_v44  ;;  %v4499_v2 = vadd.f32 %v7693_v30, %v4464_v7  ;;  %v4465_v40 = vmul.f32 %v7684_v51, %v4430_v47  ;;  %v4466_v19 = vmul.f32 %v7687_v38, %v4431_v9 }
 0xc0d   : > { %v5132_v53 = vpack.c.bf16 %v4499_v2, %v4498_v55  ;;  %v4500_v31 = vadd.f32 %v7690_v36, %v4465_v40  ;;  %v4501_v42 = vadd.f32 %v7693_v30, %v4466_v19  ;;  %v4390_v43 = vpop.xlane.xlu0 %4389 }
 0xc0e   : > { %v4404_v28 = vmul.f32 0.00390625, %v4390_v43 }
 0xc0f   : > { %4560 = vst [vmem:[#allocation11 + $0x10] sm:$0xff] %v5132_v53  ;;  %v5133_v8 = vpack.c.bf16 %v4501_v42, %v4500_v31  ;;  %v4393_v48 = vpop.xlane.xlu1 %4392 }
 0xc10   : > { %v4412_v27 = vadd.f32 1e-05, %v4404_v28  ;;  %v4405_v4 = vmul.f32 0.00390625, %v4393_v48 }
 0xc11   : > { %4561 = vst [vmem:[#allocation11 + $0x18] sm:$0xff] %v5133_v8 }
 0xc12   : > { %5901 = vrsqrt.f32 %v4412_v27  ;;  %v4413_v25 = vadd.f32 1e-05, %v4405_v4 }
 0xc14   : > { %5903 = vrsqrt.f32 %v4413_v25 }
 0xc16   : > { %v4396_v10 = vpop.xlane.xlu0 %4395 }
 0xc17   : > { %v4406_v45 = vmul.f32 0.00390625, %v4396_v10  ;;  %v4399_v60 = vpop.xlane.xlu1 %4398 }
 0xc18   : > { %v4407_v35 = vmul.f32 0.00390625, %v4399_v60 }
 0xc19   : > { %v4414_v32 = vadd.f32 1e-05, %v4406_v45 }
 0xc1a   : > { %v4415_v12 = vadd.f32 1e-05, %v4407_v35 }
 0xc1b   : > { %5905 = vrsqrt.f32 %v4414_v32 }
 0xc1c   : > { %v5902_v23 = vpop.eup %5901  ;;  %5907 = vrsqrt.f32 %v4415_v12 }
 0xc1d   : > { %v4432_v18 = vmul.f32 %v5902_v23, %v7637_v21  ;;  %v4433_v49 = vmul.f32 %v5902_v23, %v7639_v15 }
 0xc1e   : > { %v5904_v33 = vpop.eup %5903 }
 0xc1f   : > { %v4467_v24 = vmul.f32 %v7684_v51, %v4432_v18  ;;  %v4468_v5 = vmul.f32 %v7687_v38, %v4433_v49  ;;  %v4434_v63 = vmul.f32 %v5904_v33, %v7641_v56  ;;  %v4435_v16 = vmul.f32 %v5904_v33, %v7643_v50 }
 0xc21   : > { %v4502_v17 = vadd.f32 %v7690_v36, %v4467_v24  ;;  %v4503_v14 = vadd.f32 %v7693_v30, %v4468_v5  ;;  %v4469_v37 = vmul.f32 %v7684_v51, %v4434_v63  ;;  %v4470_v54 = vmul.f32 %v7687_v38, %v4435_v16 }
 0xc23   : > { %v5134_v21 = vpack.c.bf16 %v4503_v14, %v4502_v17  ;;  %v4504_v15 = vadd.f32 %v7690_v36, %v4469_v37  ;;  %v4505_v0 = vadd.f32 %v7693_v30, %v4470_v54 }
 0xc25   : > { %v5906_v57 = vpop.eup %5905  ;;  %4562 = vst [vmem:[#allocation11 + $0x20] sm:$0xff] %v5134_v21  ;;  %v5135_v46 = vpack.c.bf16 %v4505_v0, %v4504_v15 }
 0xc26   : > { %v5908_v58 = vpop.eup %5907  ;;  %v4436_v56 = vmul.f32 %v5906_v57, %v7653_v59  ;;  %v4437_v50 = vmul.f32 %v5906_v57, %v7655_v26 }
 0xc27   : > { %4563 = vst [vmem:[#allocation11 + $0x28] sm:$0xff] %v5135_v46  ;;  %v4438_v11 = vmul.f32 %v5908_v58, %v7657_v20  ;;  %v4439_v52 = vmul.f32 %v5908_v58, %v7659_v13 }
 0xc28   : > { %v4471_v3 = vmul.f32 %v7684_v51, %v4436_v56  ;;  %v4472_v1 = vmul.f32 %v7687_v38, %v4437_v50 }
 0xc29   : > { %v4473_v34 = vmul.f32 %v7684_v51, %v4438_v11  ;;  %v4474_v39 = vmul.f32 %v7687_v38, %v4439_v52 }
 0xc2a   : > { %v4506_v62 = vadd.f32 %v7690_v36, %v4471_v3  ;;  %v4507_v59 = vadd.f32 %v7693_v30, %v4472_v1 }
 0xc2b   : > { %v4508_v26 = vadd.f32 %v7690_v36, %v4473_v34  ;;  %v4509_v20 = vadd.f32 %v7693_v30, %v4474_v39 }
 0xc2c   : > { %v5136_v13 = vpack.c.bf16 %v4507_v59, %v4506_v62 }
 0xc2d   : > { %v5137_v61 = vpack.c.bf16 %v4509_v20, %v4508_v26 }
 0xc2e   : > { %4564 = vst [vmem:[#allocation11 + $0x30] sm:$0xff] %v5136_v13 }
 0xc2f   : > { %4565 = vst [vmem:[#allocation11 + $0x38] sm:$0xff] %v5137_v61 }
 0xc30   : > { %6050 = shalt.err (!%p6047_p2)
}
 0xc31   : > { %s7888_s20 = sld [smem:[#allocation43_spill]] }
 0xc37   : > { %s6051_s15 = scalar_lea.hbm %s7888_s20, 1024 }
 0xc38   : > { %p6052_p10 = scmp.ne.s32.totalorder %s7888_s20, %s6051_s15  ;;  %p6057_p7 = scmp.lt.u32.totalorder %s6051_s15, %s7888_s20 }
 0xc3a   : > { %p6053_p3 = pnand %p6052_p10, %p5360_p6 }
 0xc3c   : > { %p6054_p12 = pneg %p6053_p3 }
 0xc3e   : > { %p6059_p9 = pnand %p6057_p7, %p6054_p12 }
 0xc40   : > { %6062 = shalt.err (!%p6059_p9)
}
 0xc41   : > { %s6140_s23 = smov 128   ;;  %s6141_s16 = smov 8  }
 0xc42   : > { %5343 = dma.vmem_to_hbm [thread:$0]  (%p5360_p6), %s4577_s30, 1024, %s7888_s20, [#allocation5], %s6140_s23, %s6140_s23, %s6141_s16  }
 0xc43   : > { %6100 = dma.done.wait (%p5360_p6), [#allocation5], 1024  }
 0xc44   : > { %6102 = vsyncadd (%p5360_p6), [#allocation5], 4294966272 }
 0xc45 PF: > { %s7889_s3 = sld [smem:[#allocation19_spill]]  ;;  %s7890_s25 = sld [smem:[#allocation16_spill]] }
 0xc46   : > { %s7891_s26 = sld [smem:[#allocation17_spill]]  ;;  %s7892_s27 = sld [smem:[#allocation22_spill]] }
 0xc47   : > { %s7893_s28 = sld [smem:[#allocation18_spill]]  ;;  %s7894_s29 = sld [smem:[#allocation21_spill]] }
 0xc4b   : > { %s33_s30 = sadd.s32 1, %s7889_s3  }
 0xc4c   : > { %p30_p4 = scmp.ge.s32.totalorder %s33_s30, 4  }
 0xc4e   :  { %32 = sbr.rel (!%p30_p4) target bundleno = 19 (0x13), region = 178 }
 0xc55   :  { %4592 = vsyncpa [#allocation4], 1 }
 0xc56   :  { %4594 = vsyncpa [#allocation4 + $0x1], 1 }
 0xc57   :  { %4595 = vsyncpa [#allocation7], 1 }
 0xc58   :  { %4597 = vsyncpa [#allocation7 + $0x1], 1 }
 0xc59   :  { %4598 = vsyncpa [#allocation10], 1 }
 0xc5a   :  { %4600 = vsyncpa [#allocation10 + $0x1], 1 }
 0xc5b   :  { %4601 = vsyncpa [#allocation5], 1 }
 0xc5c   :  { %4603 = vsyncpa [#allocation5 + $0x1], 1 }

</bundles_post_ra>
